<compile_context>
chip_gen: v7x
topology: tpu7x:2x2x1
jax: 0.10.0
libtpu: 0.0.40
codegen_flags: <defaults>
</compile_context>

<pallas_src>
import functools

import jax
import jax.numpy as jnp
from jax import lax
from jax.experimental import pallas as pl
from jax.experimental.pallas import tpu as pltpu

_BSEARCH_ITERS = 32  # enough to resolve any f32 threshold exactly (bit-level)


def _pam_kernel(k_sel, x_hbm_ref, wq_ref, bq_ref, wk_ref, bk_ref, wv_ref,
                bv_ref, gamma_ref, o_ref, x_sc, k_sc, vt_sc, dma_sem):
    b = pl.program_id(0)
    qi = pl.program_id(1)
    Tq = o_ref.shape[2]
    HW = x_sc.shape[1]

    # x, K and V^T for the whole image: fetch / compute once per batch
    # element, keep resident in VMEM scratch across the query-tile axis.
    @pl.when(qi == 0)
    def _():
        cp = pltpu.make_async_copy(x_hbm_ref.at[b], x_sc, dma_sem)
        cp.start()
        cp.wait()
        xf = x_sc[...]                                               # (C, HW)
        k_sc[...] = (jnp.dot(wk_ref[...], xf,
                             preferred_element_type=jnp.float32) + bk_ref[...])
        v_full = (jnp.dot(wv_ref[...], xf,
                          preferred_element_type=jnp.float32) + bv_ref[...])
        # Transpose V once per batch (Cout, HW) -> (HW, Cout): guarantees the
        # per-tile attn @ V matmul below is in natural MXU orientation.
        vt_sc[...] = jnp.transpose(v_full)                           # (HW, Cout)

    col0 = pl.multiple_of(qi * Tq, Tq)
    x_t = x_sc[:, pl.ds(col0, Tq)]                                   # (C, Tq)
    q_t = (jnp.dot(wq_ref[...], x_t,
                   preferred_element_type=jnp.float32) + bq_ref[...])  # (Kd, Tq)

    # energy[i, j] = sum_c q[c, i] * k[c, j]   for i in this query tile.
    energy = lax.dot_general(q_t, k_sc[...], (((0,), (0,)), ((), ())),
                             preferred_element_type=jnp.float32)     # (Tq, HW)

    # ---- exact per-row k-th largest via binary search on int32 keys -------
    # Order-preserving map f32 -> int32 (NaN-free data; -0 collapses to +0).
    bits = pltpu.bitcast(energy, jnp.int32)
    i32_min = jnp.int32(jnp.iinfo(jnp.int32).min)
    keys = jnp.where(bits < 0, i32_min - bits, bits)                 # (Tq, HW)

    lo0 = jnp.min(keys, axis=-1, keepdims=True)      # count(>= lo) == HW >= k
    hi0 = jnp.max(keys, axis=-1, keepdims=True) + 1  # count(>= hi) == 0  <  k

    ones_col = jnp.ones((HW, 1), jnp.float32)        # loop-invariant (hoisted)
    k_sel_f = jnp.float32(k_sel)                     # exact for HW < 2**24

    def bsearch_body(_, carry):
        lo, hi = carry
        mid = (lo & hi) + ((lo ^ hi) >> 1)       # overflow-safe floor((lo+hi)/2)
        # Lane-count offloaded to the MXU: (Tq, HW) @ (HW, 1) of 0/1 values,
        # exact in f32 accumulation.  VPU only does the compare + select.
        ind = jnp.where(keys >= mid, 1.0, 0.0)
        cnt = jnp.dot(ind, ones_col, preferred_element_type=jnp.float32)
        ge = cnt >= k_sel_f
        return jnp.where(ge, mid, lo), jnp.where(ge, hi, mid)

    kth, _ = lax.fori_loop(0, _BSEARCH_ITERS, bsearch_body, (lo0, hi0))

    # Row max recovered from hi0 (= max key + 1) by inverting the bit map:
    # saves an extra full-width (Tq, HW) max reduction.
    max_key = hi0 - 1
    max_bits = jnp.where(max_key >= 0, max_key, i32_min - max_key)
    m = pltpu.bitcast(max_bits, jnp.float32)                         # (Tq, 1)

    # ---- masked softmax over the last axis (mask fused into the exp) -------
    exps = jnp.where(keys >= kth, jnp.exp(energy - m), 0.0)
    denom = jnp.sum(exps, axis=-1, keepdims=True)                    # (Tq, 1)
    inv = pl.reciprocal(denom, approx=True)
    inv = inv * (2.0 - denom * inv)          # one Newton step, (Tq, 1) only
    attn = exps * inv                                                # (Tq, HW)

    # out[i, c] = sum_j attn[i, j] * v[c, j]  -- natural MXU orientation.
    out_qt = jnp.dot(attn, vt_sc[...],
                     preferred_element_type=jnp.float32)             # (Tq, Cout)
    out_t = jnp.transpose(out_qt)                                    # (Cout, Tq)

    o_ref[0] = gamma_ref[0, 0] * out_t + x_t


def _vmem_capacity_bytes():
    try:
        return int(pltpu.get_tpu_info().vmem_capacity_bytes)
    except Exception:
        return 64 * 1024 * 1024  # conservative: v7x physical VMEM


def _pick_query_tile(HW, vmem_cap_bytes):
    # Largest lane-dense tile whose ~5 live (Tq, HW) 32-bit slabs fit in
    # roughly a third of this generation's VMEM (leaves room for the x / K /
    # V^T scratch, the double-buffered output and compiler-internal scratch).
    # 128 MiB parts (v5e/v6e) therefore pick larger tiles than v7x (64 MiB).
    slab_budget = max(vmem_cap_bytes // 3, 16 * 1024 * 1024)
    candidates = [t for t in (512, 256, 128, 64, 32, 16, 8) if HW % t == 0]
    if not candidates:
        return HW
    fitting = [t for t in candidates if 5 * t * HW * 4 <= slab_budget]
    return fitting[0] if fitting else candidates[-1]


def topk_pam_forward(x, wq, bq, wk, bk, wv, bv, gamma, *, topk=10,
                     query_tile=None, vmem_limit_bytes=None):
    """x: (B, C, H, W) float32. Returns (B, C, H, W)."""
    B, C, H, W = x.shape
    HW = H * W
    Kd = wq.shape[0]
    Cout = wv.shape[0]
    assert Cout == C, "out_dim must equal in_dim for the residual add"
    k_sel = HW // topk
    assert 1 <= k_sel <= HW

    vmem_cap = _vmem_capacity_bytes()
    Tq = query_tile if query_tile is not None else _pick_query_tile(HW, vmem_cap)
    assert HW % Tq == 0
    nq = HW // Tq

    xf = x.reshape(B, C, HW).astype(jnp.float32)
    bq2 = bq.reshape(Kd, 1).astype(jnp.float32)
    bk2 = bk.reshape(Kd, 1).astype(jnp.float32)
    bv2 = bv.reshape(Cout, 1).astype(jnp.float32)
    gamma2 = gamma.reshape(1, 1).astype(jnp.float32)

    kernel = functools.partial(_pam_kernel, k_sel)

    # VMEM requirement: ~5 live (Tq, HW) temporaries, single-buffered x
    # scratch, K / V^T scratch, double-buffered (C, Tq) output + small
    # weights.  1.3x margin, capped at 85% of physical VMEM (headroom for
    # compiler-internal scratch / pipeline buffers).
    if vmem_limit_bytes is None:
        est = 4 * (5 * Tq * HW
                   + C * HW
                   + (Kd + Cout) * HW
                   + 4 * Cout * Tq
                   + 2 * Kd * C + Cout * C + 2 * Kd + Cout + 8)
        vmem_limit_bytes = int(min(int(0.85 * vmem_cap),
                                   max(int(1.3 * est), 32 * 1024 * 1024)))

    cost = pl.CostEstimate(
        flops=int(B * (2 * (2 * Kd + Cout) * C * HW
                       + 2 * HW * HW * (Kd + Cout)
                       + 2 * _BSEARCH_ITERS * HW * HW)),
        transcendentals=int(B * HW * HW),
        bytes_accessed=int(4 * (2 * B * C * HW + 2 * Kd * C + Cout * C
                                + 2 * Kd + Cout + 1)),
    )

    out = pl.pallas_call(
        kernel,
        out_shape=jax.ShapeDtypeStruct((B, C, HW), jnp.float32),
        grid_spec=pltpu.PrefetchScalarGridSpec(
            num_scalar_prefetch=0,
            grid=(B, nq),
            in_specs=[
                pl.BlockSpec(memory_space=pl.ANY),                  # x (HBM)
                pl.BlockSpec((Kd, C), lambda b, q: (0, 0)),         # Wq
                pl.BlockSpec((Kd, 1), lambda b, q: (0, 0)),         # bq
                pl.BlockSpec((Kd, C), lambda b, q: (0, 0)),         # Wk
                pl.BlockSpec((Kd, 1), lambda b, q: (0, 0)),         # bk
                pl.BlockSpec((Cout, C), lambda b, q: (0, 0)),       # Wv
                pl.BlockSpec((Cout, 1), lambda b, q: (0, 0)),       # bv
                pl.BlockSpec(memory_space=pltpu.MemorySpace.SMEM),  # gamma
            ],
            out_specs=pl.BlockSpec((1, C, Tq), lambda b, q: (b, 0, q)),
            scratch_shapes=[
                pltpu.VMEM((C, HW), jnp.float32),                   # x (1 copy/batch)
                pltpu.VMEM((Kd, HW), jnp.float32),                  # K
                pltpu.VMEM((HW, Cout), jnp.float32),                # V^T
                pltpu.SemaphoreType.DMA(()),                        # x DMA sem
            ],
        ),
        compiler_params=pltpu.CompilerParams(
            dimension_semantics=("parallel", "arbitrary"),
            vmem_limit_bytes=vmem_limit_bytes,
        ),
        cost_estimate=cost,
    )(xf, wq.astype(jnp.float32), bq2, wk.astype(jnp.float32), bk2,
      wv.astype(jnp.float32), bv2, gamma2)

    return out.reshape(B, C, H, W)


def ref_forward(x, wq, bq, wk, bk, wv, bv, gamma, *, topk=10):
    """Pure-JAX reference mirroring the PyTorch forward."""
    B, C, H, W = x.shape
    HW = H * W
    xf = x.reshape(B, C, HW)
    q = jnp.einsum('kc,bcp->bkp', wq, xf) + bq[None, :, None]
    k = jnp.einsum('kc,bcp->bkp', wk, xf) + bk[None, :, None]
    v = jnp.einsum('kc,bcp->bkp', wv, xf) + bv[None, :, None]
    energy = jnp.einsum('bki,bkj->bij', q, k)                     # (B, HW, HW)
    k_sel = HW // topk
    thr = lax.top_k(energy, k_sel)[0][..., -1:]                   # kth largest
    mask = (energy >= thr).astype(jnp.float32)
    m = jnp.max(energy, axis=-1, keepdims=True)
    exps = jnp.exp(energy - m) * mask
    attn = exps / jnp.sum(exps, axis=-1, keepdims=True)
    out = jnp.einsum('bcj,bij->bci', v, attn)
    out = gamma.reshape(()) * out + xf
    return out.reshape(B, C, H, W)


if __name__ == "__main__":
    # Small shapes consistent with the module: in_dim = key_dim = out_dim = 4.
    # H = W = 16 -> HW = 256: lane-dense and divisible into 128-wide tiles.
    B, C, H, W = 2, 4, 16, 16
    key_dim, out_dim, topk = 4, 4, 10

    key = jax.random.PRNGKey(0)
    ks = jax.random.split(key, 8)
    x = jax.random.normal(ks[0], (B, C, H, W), jnp.float32)
    wq = jax.random.normal(ks[1], (key_dim, C), jnp.float32) * 0.1
    bq = jax.random.normal(ks[2], (key_dim,), jnp.float32) * 0.1
    wk = jax.random.normal(ks[3], (key_dim, C), jnp.float32) * 0.1
    bk = jax.random.normal(ks[4], (key_dim,), jnp.float32) * 0.1
    wv = jax.random.normal(ks[5], (out_dim, C), jnp.float32) * 0.1
    bv = jax.random.normal(ks[6], (out_dim,), jnp.float32) * 0.1
    # PyTorch inits gamma to 0 (output == x); use 0.5 to exercise the kernel path.
    gamma = jnp.array([0.5], jnp.float32)

    ref = ref_forward(x, wq, bq, wk, bk, wv, bv, gamma, topk=topk)

    # Multi-tile path (2 query tiles of 128): exercises the per-batch x DMA
    # plus K/V^T scratch reuse across query tiles.
    out = topk_pam_forward(x, wq, bq, wk, bk, wv, bv, gamma, topk=topk,
                           query_tile=128)
    out = jax.block_until_ready(out)
    assert out.shape == (B, C, H, W)
    assert jnp.allclose(out, ref, atol=1e-4, rtol=1e-4), "mismatch (tiled)"

    # Default tile selection path (single tile at this size).
    out2 = topk_pam_forward(x, wq, bq, wk, bk, wv, bv, gamma, topk=topk)
    out2 = jax.block_until_ready(out2)
    assert jnp.allclose(out2, ref, atol=1e-4, rtol=1e-4), "mismatch (default)"

    print("KERNEL_OK")
</pallas_src>

<mosaic_0001>
module attributes {stable_mosaic.version = 11 : i64} {
  func.func @_pam_kernel(%arg0: i32, %arg1: i32, %arg2: memref<2x4x256xf32, #tpu.memory_space<any>>, %arg3: memref<4x4xf32, #tpu.memory_space<vmem>>, %arg4: memref<4x1xf32, #tpu.memory_space<vmem>>, %arg5: memref<4x4xf32, #tpu.memory_space<vmem>>, %arg6: memref<4x1xf32, #tpu.memory_space<vmem>>, %arg7: memref<4x4xf32, #tpu.memory_space<vmem>>, %arg8: memref<4x1xf32, #tpu.memory_space<vmem>>, %arg9: memref<1x1xf32, #tpu.memory_space<smem>>, %arg10: memref<1x4x128xf32, #tpu.memory_space<vmem>>, %arg11: memref<4x256xf32, #tpu.memory_space<vmem>>, %arg12: memref<4x256xf32, #tpu.memory_space<vmem>>, %arg13: memref<256x4xf32, #tpu.memory_space<vmem>>, %arg14: memref<!tpu.dma_semaphore, #tpu.memory_space<semaphore_mem>>) attributes {dimension_semantics = [#tpu.dimension_semantics<parallel>, #tpu.dimension_semantics<arbitrary>], iteration_bounds = array<i64: 2, 2>, scalar_prefetch = 0 : i64, scratch_operands = 4 : i64, tpu.core_type = #tpu.core_type<tc>, window_params = [{}, {pipeline_mode = #tpu.pipeline_mode<synchronous>, transform_indices = @transform_1, window_bounds = array<i64: 4, 4>}, {pipeline_mode = #tpu.pipeline_mode<synchronous>, transform_indices = @transform_2, window_bounds = array<i64: 4, 1>}, {pipeline_mode = #tpu.pipeline_mode<synchronous>, transform_indices = @transform_3, window_bounds = array<i64: 4, 4>}, {pipeline_mode = #tpu.pipeline_mode<synchronous>, transform_indices = @transform_4, window_bounds = array<i64: 4, 1>}, {pipeline_mode = #tpu.pipeline_mode<synchronous>, transform_indices = @transform_5, window_bounds = array<i64: 4, 4>}, {pipeline_mode = #tpu.pipeline_mode<synchronous>, transform_indices = @transform_6, window_bounds = array<i64: 4, 1>}, {transform_indices = @transform_7, window_bounds = array<i64: 1, 1>}, {transform_indices = @transform_8, window_bounds = array<i64: 1, 4, 128>}]} {
    %c0_i32 = arith.constant 0 : i32
    %0 = arith.cmpi eq, %arg1, %c0_i32 : i32
    %1 = arith.extui %0 : i1 to i32
    %c0_i32_0 = arith.constant 0 : i32
    %2 = arith.cmpi ne, %1, %c0_i32_0 : i32
    scf.if %2 {
      %c0_i32_29 = arith.constant 0 : i32
      %c0_i32_30 = arith.constant 0 : i32
      %63 = tpu.memref_slice %arg2[%arg0, %c0_i32_29, %c0_i32_30] : memref<2x4x256xf32, #tpu.memory_space<any>> -> memref<1x4x256xf32, #tpu.memory_space<any>>
      %64 = tpu.memref_squeeze %63 : memref<1x4x256xf32, #tpu.memory_space<any>> -> memref<4x256xf32, #tpu.memory_space<any>>
      tpu.enqueue_dma source(%64 : memref<4x256xf32, #tpu.memory_space<any>>) target(%arg11 : memref<4x256xf32, #tpu.memory_space<vmem>>) target_semaphore(%arg14 : memref<!tpu.dma_semaphore, #tpu.memory_space<semaphore_mem>>)
      %c0_i32_31 = arith.constant 0 : i32
      %c0_i32_32 = arith.constant 0 : i32
      %65 = tpu.memref_slice %arg2[%arg0, %c0_i32_31, %c0_i32_32] : memref<2x4x256xf32, #tpu.memory_space<any>> -> memref<1x4x256xf32, #tpu.memory_space<any>>
      %66 = tpu.memref_squeeze %65 : memref<1x4x256xf32, #tpu.memory_space<any>> -> memref<4x256xf32, #tpu.memory_space<any>>
      tpu.wait_dma2 semaphore(%arg14 : memref<!tpu.dma_semaphore, #tpu.memory_space<semaphore_mem>>) src(%66 : memref<4x256xf32, #tpu.memory_space<any>>) dst(%arg11 : memref<4x256xf32, #tpu.memory_space<vmem>>)
      %c0_33 = arith.constant 0 : index
      %c0_34 = arith.constant 0 : index
      %67 = vector.load %arg11[%c0_33, %c0_34] : memref<4x256xf32, #tpu.memory_space<vmem>>, vector<4x256xf32>
      %c0_35 = arith.constant 0 : index
      %c0_36 = arith.constant 0 : index
      %68 = vector.load %arg5[%c0_35, %c0_36] : memref<4x4xf32, #tpu.memory_space<vmem>>, vector<4x4xf32>
      %cst_37 = arith.constant dense<0.000000e+00> : vector<4x256xf32>
      %69 = tpu.matmul %68, %67, %cst_37 {dimension_numbers = #tpu.dot_dimension_numbers<[1], [0], [0], [1], [0, 0, 1, 1], [], []>} : vector<4x4xf32>, vector<4x256xf32>, vector<4x256xf32> -> vector<4x256xf32>
      %c0_38 = arith.constant 0 : index
      %c0_39 = arith.constant 0 : index
      %70 = vector.load %arg6[%c0_38, %c0_39] : memref<4x1xf32, #tpu.memory_space<vmem>>, vector<4x1xf32>
      %71 = vector.broadcast %70 : vector<4x1xf32> to vector<4x256xf32>
      %72 = arith.addf %69, %71 : vector<4x256xf32>
      %c0_40 = arith.constant 0 : index
      %c0_41 = arith.constant 0 : index
      %73 = vector.load %arg12[%c0_40, %c0_41] : memref<4x256xf32, #tpu.memory_space<vmem>>, vector<4x256xf32>
      tpu.vector_store %arg12[%c0_40, %c0_41], %72 {strides = array<i32>} : memref<4x256xf32, #tpu.memory_space<vmem>>, vector<4x256xf32>,
      %c0_42 = arith.constant 0 : index
      %c0_43 = arith.constant 0 : index
      %74 = vector.load %arg7[%c0_42, %c0_43] : memref<4x4xf32, #tpu.memory_space<vmem>>, vector<4x4xf32>
      %cst_44 = arith.constant dense<0.000000e+00> : vector<4x256xf32>
      %75 = tpu.matmul %74, %67, %cst_44 {dimension_numbers = #tpu.dot_dimension_numbers<[1], [0], [0], [1], [0, 0, 1, 1], [], []>} : vector<4x4xf32>, vector<4x256xf32>, vector<4x256xf32> -> vector<4x256xf32>
      %c0_45 = arith.constant 0 : index
      %c0_46 = arith.constant 0 : index
      %76 = vector.load %arg8[%c0_45, %c0_46] : memref<4x1xf32, #tpu.memory_space<vmem>>, vector<4x1xf32>
      %77 = vector.broadcast %76 : vector<4x1xf32> to vector<4x256xf32>
      %78 = arith.addf %75, %77 : vector<4x256xf32>
      %79 = tpu.transpose %78, [1, 0] : vector<4x256xf32> -> vector<256x4xf32>
      %c0_47 = arith.constant 0 : index
      %c0_48 = arith.constant 0 : index
      %80 = vector.load %arg13[%c0_47, %c0_48] : memref<256x4xf32, #tpu.memory_space<vmem>>, vector<256x4xf32>
      tpu.vector_store %arg13[%c0_47, %c0_48], %79 {strides = array<i32>} : memref<256x4xf32, #tpu.memory_space<vmem>>, vector<256x4xf32>,
    } else {
    }
    %c128_i32 = arith.constant 128 : i32
    %3 = arith.muli %arg1, %c128_i32 : i32
    %4 = tpu.assume_multiple %3, 128 : i32
    %c0 = arith.constant 0 : index
    %5 = arith.index_cast %4 : i32 to index
    %6 = vector.load %arg11[%c0, %5] : memref<4x256xf32, #tpu.memory_space<vmem>>, vector<4x128xf32>
    %c0_1 = arith.constant 0 : index
    %c0_2 = arith.constant 0 : index
    %7 = vector.load %arg3[%c0_1, %c0_2] : memref<4x4xf32, #tpu.memory_space<vmem>>, vector<4x4xf32>
    %cst = arith.constant dense<0.000000e+00> : vector<4x128xf32>
    %8 = tpu.matmul %7, %6, %cst {dimension_numbers = #tpu.dot_dimension_numbers<[1], [0], [0], [1], [0, 0, 1, 1], [], []>} : vector<4x4xf32>, vector<4x128xf32>, vector<4x128xf32> -> vector<4x128xf32>
    %c0_3 = arith.constant 0 : index
    %c0_4 = arith.constant 0 : index
    %9 = vector.load %arg4[%c0_3, %c0_4] : memref<4x1xf32, #tpu.memory_space<vmem>>, vector<4x1xf32>
    %10 = vector.broadcast %9 : vector<4x1xf32> to vector<4x128xf32>
    %11 = arith.addf %8, %10 : vector<4x128xf32>
    %c0_5 = arith.constant 0 : index
    %c0_6 = arith.constant 0 : index
    %12 = vector.load %arg12[%c0_5, %c0_6] : memref<4x256xf32, #tpu.memory_space<vmem>>, vector<4x256xf32>
    %cst_7 = arith.constant dense<0.000000e+00> : vector<128x256xf32>
    %13 = tpu.matmul %11, %12, %cst_7 {dimension_numbers = #tpu.dot_dimension_numbers<[0], [0], [1], [1], [0, 1, 1, 1], [], []>} : vector<4x128xf32>, vector<4x256xf32>, vector<128x256xf32> -> vector<128x256xf32>
    %14 = tpu.bitcast %13 : vector<128x256xf32> -> vector<128x256xi32>
    %c0_i32_8 = arith.constant 0 : i32
    %15 = vector.broadcast %c0_i32_8 : i32 to vector<128x256xi32>
    %16 = arith.cmpi slt, %14, %15 : vector<128x256xi32>
    %c-2147483648_i32 = arith.constant -2147483648 : i32
    %17 = vector.broadcast %c-2147483648_i32 : i32 to vector<128x256xi32>
    %18 = arith.subi %17, %14 : vector<128x256xi32>
    %19 = arith.select %16, %18, %14 : vector<128x256xi1>, vector<128x256xi32>
    %cst_9 = arith.constant dense<2147483647> : vector<128xi32>
    %20 = vector.multi_reduction <minsi>, %19, %cst_9 [1] : vector<128x256xi32> to vector<128xi32>
    %21 = vector.shape_cast %20 : vector<128xi32> to vector<128x1xi32>
    %cst_10 = arith.constant dense<-2147483648> : vector<128xi32>
    %22 = vector.multi_reduction <maxsi>, %19, %cst_10 [1] : vector<128x256xi32> to vector<128xi32>
    %23 = vector.shape_cast %22 : vector<128xi32> to vector<128x1xi32>
    %c1_i32 = arith.constant 1 : i32
    %24 = vector.broadcast %c1_i32 : i32 to vector<128x1xi32>
    %25 = arith.addi %23, %24 : vector<128x1xi32>
    %cst_11 = arith.constant 1.000000e+00 : f32
    %26 = vector.broadcast %cst_11 : f32 to vector<256x1xf32>
    %cst_12 = arith.constant 2.500000e+01 : f32
    %c0_i32_13 = arith.constant 0 : i32
    %c32_i32 = arith.constant 32 : i32
    %27 = arith.addi %c0_i32_13, %c32_i32 : i32
    %c1_i32_14 = arith.constant 1 : i32
    %28:2 = scf.for %arg15 = %c0_i32_13 to %27 step %c1_i32_14 iter_args(%arg16 = %21, %arg17 = %25) -> (vector<128x1xi32>, vector<128x1xi32>)  : i32 {
      %63 = arith.andi %arg16, %arg17 : vector<128x1xi32>
      %64 = arith.xori %arg16, %arg17 : vector<128x1xi32>
      %c1_i32_29 = arith.constant 1 : i32
      %65 = vector.broadcast %c1_i32_29 : i32 to vector<128x1xi32>
      %66 = arith.shrsi %64, %65 : vector<128x1xi32>
      %67 = arith.addi %63, %66 : vector<128x1xi32>
      %68 = vector.broadcast %67 : vector<128x1xi32> to vector<128x256xi32>
      %69 = arith.cmpi sge, %19, %68 : vector<128x256xi32>
      %cst_30 = arith.constant 1.000000e+00 : f32
      %cst_31 = arith.constant 0.000000e+00 : f32
      %70 = vector.broadcast %cst_30 : f32 to vector<128x256xf32>
      %71 = vector.broadcast %cst_31 : f32 to vector<128x256xf32>
      %72 = arith.select %69, %70, %71 : vector<128x256xi1>, vector<128x256xf32>
      %cst_32 = arith.constant dense<0.000000e+00> : vector<128x1xf32>
      %73 = tpu.matmul %72, %26, %cst_32 {dimension_numbers = #tpu.dot_dimension_numbers<[1], [0], [0], [1], [0, 0, 1, 1], [], []>} : vector<128x256xf32>, vector<256x1xf32>, vector<128x1xf32> -> vector<128x1xf32>
      %74 = vector.broadcast %cst_12 : f32 to vector<128x1xf32>
      %75 = arith.cmpf oge, %73, %74 : vector<128x1xf32>
      %76 = arith.select %75, %67, %arg16 : vector<128x1xi1>, vector<128x1xi32>
      %77 = arith.select %75, %arg17, %67 : vector<128x1xi1>, vector<128x1xi32>
      scf.yield %76, %77 : vector<128x1xi32>, vector<128x1xi32>
    }
    %c1_i32_15 = arith.constant 1 : i32
    %29 = vector.broadcast %c1_i32_15 : i32 to vector<128x1xi32>
    %30 = arith.subi %25, %29 : vector<128x1xi32>
    %c0_i32_16 = arith.constant 0 : i32
    %31 = vector.broadcast %c0_i32_16 : i32 to vector<128x1xi32>
    %32 = arith.cmpi sge, %30, %31 : vector<128x1xi32>
    %c-2147483648_i32_17 = arith.constant -2147483648 : i32
    %33 = vector.broadcast %c-2147483648_i32_17 : i32 to vector<128x1xi32>
    %34 = arith.subi %33, %30 : vector<128x1xi32>
    %35 = arith.select %32, %30, %34 : vector<128x1xi1>, vector<128x1xi32>
    %36 = tpu.bitcast %35 : vector<128x1xi32> -> vector<128x1xf32>
    %37 = vector.broadcast %28#0 : vector<128x1xi32> to vector<128x256xi32>
    %38 = arith.cmpi sge, %19, %37 : vector<128x256xi32>
    %39 = vector.broadcast %36 : vector<128x1xf32> to vector<128x256xf32>
    %40 = arith.subf %13, %39 : vector<128x256xf32>
    %41 = math.exp %40 : vector<128x256xf32>
    %cst_18 = arith.constant 0.000000e+00 : f32
    %42 = vector.broadcast %cst_18 : f32 to vector<128x256xf32>
    %43 = arith.select %38, %41, %42 : vector<128x256xi1>, vector<128x256xf32>
    %cst_19 = arith.constant dense<0.000000e+00> : vector<128xf32>
    %44 = vector.multi_reduction <add>, %43, %cst_19 [1] : vector<128x256xf32> to vector<128xf32>
    %45 = vector.shape_cast %44 : vector<128xf32> to vector<128x1xf32>
    %46 = tpu.reciprocal %45 {approx = true} : vector<128x1xf32> -> vector<128x1xf32>
    %47 = arith.mulf %45, %46 : vector<128x1xf32>
    %cst_20 = arith.constant 2.000000e+00 : f32
    %48 = vector.broadcast %cst_20 : f32 to vector<128x1xf32>
    %49 = arith.subf %48, %47 : vector<128x1xf32>
    %50 = arith.mulf %46, %49 : vector<128x1xf32>
    %51 = vector.broadcast %50 : vector<128x1xf32> to vector<128x256xf32>
    %52 = arith.mulf %43, %51 : vector<128x256xf32>
    %c0_21 = arith.constant 0 : index
    %c0_22 = arith.constant 0 : index
    %53 = vector.load %arg13[%c0_21, %c0_22] : memref<256x4xf32, #tpu.memory_space<vmem>>, vector<256x4xf32>
    %cst_23 = arith.constant dense<0.000000e+00> : vector<128x4xf32>
    %54 = tpu.matmul %52, %53, %cst_23 {dimension_numbers = #tpu.dot_dimension_numbers<[1], [0], [0], [1], [0, 0, 1, 1], [], []>} : vector<128x256xf32>, vector<256x4xf32>, vector<128x4xf32> -> vector<128x4xf32>
    %55 = tpu.transpose %54, [1, 0] : vector<128x4xf32> -> vector<4x128xf32>
    %c0_24 = arith.constant 0 : index
    %c0_25 = arith.constant 0 : index
    %56 = memref.load %arg9[%c0_24, %c0_25] : memref<1x1xf32, #tpu.memory_space<smem>>
    %57 = vector.broadcast %56 : f32 to vector<4x128xf32>
    %58 = arith.mulf %57, %55 : vector<4x128xf32>
    %59 = arith.addf %58, %6 : vector<4x128xf32>
    %c0_26 = arith.constant 0 : index
    %c0_27 = arith.constant 0 : index
    %c0_28 = arith.constant 0 : index
    %60 = vector.load %arg10[%c0_26, %c0_27, %c0_28] : memref<1x4x128xf32, #tpu.memory_space<vmem>>, vector<1x4x128xf32>
    %61 = vector.shape_cast %60 : vector<1x4x128xf32> to vector<4x128xf32>
    %62 = vector.shape_cast %59 : vector<4x128xf32> to vector<1x4x128xf32>
    tpu.vector_store %arg10[%c0_26, %c0_27, %c0_28], %62 {strides = array<i32>} : memref<1x4x128xf32, #tpu.memory_space<vmem>>, vector<1x4x128xf32>,
    return
  }
  func.func @transform_1(%arg0: i32, %arg1: i32) -> (i32, i32) {
    %c0_i32 = arith.constant 0 : i32
    %c0_i32_0 = arith.constant 0 : i32
    %c0_i32_1 = arith.constant 0 : i32
    return %c0_i32, %c0_i32_0 : i32, i32
  }
  func.func @transform_2(%arg0: i32, %arg1: i32) -> (i32, i32) {
    %c0_i32 = arith.constant 0 : i32
    %c0_i32_0 = arith.constant 0 : i32
    %c0_i32_1 = arith.constant 0 : i32
    return %c0_i32, %c0_i32_0 : i32, i32
  }
  func.func @transform_3(%arg0: i32, %arg1: i32) -> (i32, i32) {
    %c0_i32 = arith.constant 0 : i32
    %c0_i32_0 = arith.constant 0 : i32
    %c0_i32_1 = arith.constant 0 : i32
    return %c0_i32, %c0_i32_0 : i32, i32
  }
  func.func @transform_4(%arg0: i32, %arg1: i32) -> (i32, i32) {
    %c0_i32 = arith.constant 0 : i32
    %c0_i32_0 = arith.constant 0 : i32
    %c0_i32_1 = arith.constant 0 : i32
    return %c0_i32, %c0_i32_0 : i32, i32
  }
  func.func @transform_5(%arg0: i32, %arg1: i32) -> (i32, i32) {
    %c0_i32 = arith.constant 0 : i32
    %c0_i32_0 = arith.constant 0 : i32
    %c0_i32_1 = arith.constant 0 : i32
    return %c0_i32, %c0_i32_0 : i32, i32
  }
  func.func @transform_6(%arg0: i32, %arg1: i32) -> (i32, i32) {
    %c0_i32 = arith.constant 0 : i32
    %c0_i32_0 = arith.constant 0 : i32
    %c0_i32_1 = arith.constant 0 : i32
    return %c0_i32, %c0_i32_0 : i32, i32
  }
  func.func @transform_7(%arg0: i32, %arg1: i32) -> (i32, i32) {
    %c0_i32 = arith.constant 0 : i32
    %c0_i32_0 = arith.constant 0 : i32
    %c0_i32_1 = arith.constant 0 : i32
    return %c0_i32, %c0_i32_0 : i32, i32
  }
  func.func @transform_8(%arg0: i32, %arg1: i32) -> (i32, i32, i32) {
    %c0_i32 = arith.constant 0 : i32
    %c0_i32_0 = arith.constant 0 : i32
    return %arg0, %c0_i32, %arg1 : i32, i32, i32
  }
}

</mosaic_0001>

<bundles_post_ra>
// kernel: tpu_custom_call.1
= control target key start
LH: loop header
LB: loop body
LE: loop exit
PB: predicated region body
PF: predicated region fallthrough
CT: control target
= control target key end

     0   :  { %s5980_s0 = inlined_call_operand.hbm [shape: f32[2,4,256], index: 0, kind: input, shape index: {}]   ;;  %s5981_s1 = inlined_call_operand.vmem [shape: f32[4,4], index: 1, kind: input, shape index: {}]   ;;  %s5982_s2 = inlined_call_operand.vmem [shape: f32[4,1], index: 2, kind: input, shape index: {}]   ;;  %s5983_s3 = inlined_call_operand.vmem [shape: f32[4,4], index: 3, kind: input, shape index: {}]   ;;  %s5984_s4 = inlined_call_operand.vmem [shape: f32[4,1], index: 4, kind: input, shape index: {}]   ;;  %s5985_s5 = inlined_call_operand.vmem [shape: f32[4,4], index: 5, kind: input, shape index: {}]   ;;  %s5986_s6 = inlined_call_operand.vmem [shape: f32[4,1], index: 6, kind: input, shape index: {}]   ;;  %s5987_s7 = inlined_call_operand.<no memory space> [shape: f32[1,1], index: 7, kind: input, shape index: {}]   ;;  %s5988_s8 = inlined_call_operand.hbm [shape: f32[2,4,256], index: 8, kind: output, shape index: {}]  }
   0x1   :  { %13 = sst [smem:[#allocation6]] %s5987_s7 }
   0x2   :  { %14 = vsyncpa [#allocation8], 0 }
   0x3   :  { %16 = vsyncpa [#allocation8 + $0x1], 0  ;;  %s4002_s29 = smov 0   ;;  %s4004_s30 = smov 0  }
   0x4   :  { %s4006_s9 = smov 0   ;;  %s4008_s10 = smov 0  }
   0x5   :  { %s4010_s11 = smov 0   ;;  %s4012_s12 = smov 0  }
   0x6   :  { %s4014_s13 = smov 0   ;;  %s4016_s14 = smov 0  }
   0x7 LB: > { %6106 = sst [smem:[#allocation15_spill]] %s3806_s13  ;;  %s2786_s7 = sadd.s32 4294967295, %s3810_s14   ;;  %s3810_s14 = sphi %s4016_s14, %s22_s14   ;;  %s3806_s13 = sphi %s4014_s13, %s6358_s13   ;;  %s3802_s12 = sphi %s4012_s12, %s6363_s12   ;;  %s3798_s11 = sphi %s4010_s11, %s6356_s11   ;;  %s3794_s10 = sphi %s4008_s10, %s6362_s10   ;;  %s3790_s9 = sphi %s4006_s9, %s6361_s9   ;;  %s3786_s30 = sphi %s4004_s30, %s6360_s30   ;;  %s3782_s29 = sphi %s4002_s29, %s6359_s29  }
   0x8   : > { %s2787_s15 = sadd.s32 4294967294, %s3810_s14   ;;  %s31_s16 = sadd.s32 1, %s3802_s12 }
   0x9   : > { %p32_p0 = scmp.ge.s32.totalorder %s31_s16, 2  ;;  %s34_s17 = sadd.s32 1, %s3806_s13 }
   0xa   : > { %p200_p1 = scmp.ne.s32.totalorder %s3790_s9, %s3786_s30  ;;  %p201_p2 = scmp.eq.s32.totalorder %s2786_s7, 3 }
   0xb   : > { %s6365_s16 = smov (%p32_p0, %s31_s16), 0  ;;  %s6367_s17 = smov (!%p32_p0, %s34_s17), %s3806_s13 }
   0xc   : > { %6107 = sst [smem:[#allocation16_spill]] %s6365_s16  ;;  %s186_s18 = ssub.s32 %s3802_s12, %s6365_s16 }
   0xd   : > { %p4053_p3 = por %p201_p2, %p200_p1  ;;  %p36_p4 = scmp.ge.s32.totalorder %s6367_s17, 2 }
   0xe   : > { %p206_p5 = scmp.ne.s32.totalorder %s3786_s30, %s3782_s29  ;;  %p207_p6 = scmp.eq.s32.totalorder %s2787_s15, 3 }
   0xf   : > { %p2789_p7 = scmp.ge.s32.totalorder %s3810_s14, 1  ;;  %s6369_s17 = smov (%p36_p4, %s6367_s17), 0 }
  0x10   : > { %6109 = sst [smem:[#allocation17_spill]] %s6369_s17  ;;  %p4062_p8 = por %p207_p6, %p206_p5 }
  0x11   : > { %p246_p9 = scmp.lt.s32.totalorder %s3810_s14, 5  ;;  %s185_s21 = ssub.s32 %s3806_s13, %s6369_s17 }
  0x12   : > { %s190_s22 = sadd.s32 1, %s3790_s9  ;;  %s187_s23 = sor.u32 %s186_s18, %s185_s21 }
  0x13   : > { %p247_p10 = pnand %p2789_p7, %p246_p9  ;;  %p188_p11 = scmp.eq.s32.totalorder %s187_s23, 0 }
  0x15   : > { %s4071_s24 = scalar_select %p188_p11, %s3790_s9, %s190_s22  }
  0x16   : > { %250 = sbr.rel (%p247_p10) target bundleno = 2548 (0x9f4), region = 48 }
  0x1d   : > { %s5991_s25 = sand.u32 1, %s3786_s30   ;;  %p2791_p12 = scmp.ne.s32.totalorder %s3794_s10, 0 }
  0x1e   : > { %s4076_s26 = sshll.u32 %s5991_s25, 2  ;;  %s2860_s28 = sshll.u32 (!%p2791_p12), %s3798_s11, 7 }
  0x1f   : > { %276 = sbr.rel (%p2791_p12) target bundleno = 528 (0x210), region = 52  ;;  %s279_s18 = scalar_lea.hbm (!%p2791_p12), %s5980_s0, %s2860_s28 }
  0x20   : > { %s3944_s21 = smov (!%p2791_p12), [#allocation2]   ;;  %s3558_s23 = scalar_lea.hbm (!%p2791_p12), %s279_s18, 128 }
  0x21   : > { %s287_s22 = sshll.u32 (!%p2791_p12), %s3944_s21, 4  ;;  %p3559_p13 = scmp.ne.s32.totalorder (!%p2791_p12), %s279_s18, %s3558_s23  ;;  %s288_s22 = int_to_ptr.vmem [resolvable:$true] %s287_s22 }
  0x22   : > { %s3560_s25 = scalar_lea.hbm (!%p2791_p12), %s5980_s0, 256  ;;  %p3561_p0 = scmp.lt.u32.totalorder (!%p2791_p12), %s279_s18, %s5980_s0 }
  0x23   : > { %p3562_p1 = scmp.lt.u32.totalorder (!%p2791_p12), %s3560_s25, %s3558_s23  ;;  %p3564_p4 = scmp.lt.u32.totalorder (!%p2791_p12), %s3558_s23, %s279_s18 }
  0x25   : > { %p3563_p2 = por (!%p2791_p12), %p3562_p1, %p3561_p0 }
  0x27   : > { %p3565_p5 = por %p3564_p4, %p3563_p2 }
  0x29   : > { %p3566_p6 = pnand %p3565_p5, %p3559_p13 }
  0x2b   : > { %3569 = shalt.err (!%p3566_p6)  }
  0x2c   : > { %s3570_s28 = scalar_lea.vmem %s288_s22, 128  ;;  %p3575_p9 = scmp.lt.s32.totalorder %s288_s22, %s288_s22 }
  0x2d   : > { %p3571_p7 = scmp.ne.s32.totalorder %s288_s22, %s3570_s28  ;;  %p3576_p10 = scmp.lt.s32.totalorder %s3570_s28, %s3570_s28 }
  0x2f   : > { %p3577_p11 = por %p3576_p10, %p3575_p9 }
  0x31   : > { %p3578_p12 = pnand %p3577_p11, %p3571_p7 }
  0x33   : > { %3581 = shalt.err (!%p3578_p12)  }
  0x34   : > { %290 = dma.hbm_to_vmem [thread:$0]  %s279_s18, 128, %s288_s22, [#allocation5] }
  0x35   : > { %3774 = dma.done.wait [#allocation5], 128 }
  0x36   : > { %3775 = vsyncadd [#allocation5], 4294967168  ;;  %v3945_v0 = vmov 0.0   ;;  %v3946_v1 = vmov 0   ;;  %v295_v2 = vld [vmem:[#allocation2] sm:$0xff]  ;;  %vm309_vm0 = vcmask 1043456  }
  0x37   : > { %378 = vmatprep.mubr.f32.mxu0 %v3945_v0  ;;  %464 = vmatprep.mubr.f32.mxu1 %v3945_v0  ;;  %v304_v3 = vcombine.high %v295_v2, %v295_v2  ;;  %v391_v4 = vld [vmem:[%s5986_s6] sm:$0xf]  ;;  %vm305_vm1 = vcmask 31744  }
  0x38   : > { %3454 = vset.pattern.permute.xlu0 %v3946_v1  ;;  %v296_v5 = vld [vmem:[%s5983_s3] sm:$0xf] }
  0x39   : > { %v390_v6 = vld [vmem:[%s5985_s5] sm:$0xf]  ;;  %394 = vperm.xlu0 %3454, %v391_v4   ;;  %2794 = vmatprep.subr.msk.mxu0 %vm309_vm0, %v304_v3 }
  0x3a   : > { %2797 = vmatprep.subr.msk.mxu1 %vm309_vm0, %v304_v3  ;;  %v297_v7 = vld [vmem:[%s5984_s4] sm:$0xf]  ;;  %2795 = vmatpush1.msk.msra.mxu0 %vm309_vm0, %v295_v2 }
  0x3b   : > { %2798 = vmatpush1.msk.msra.mxu1 %vm309_vm0, %v295_v2  ;;  %2796 = vmatmul.mubr.msk.f32.vlgmr.msra.gmra.mrb[0].mxu0 %vm305_vm1, %v296_v5 }
  0x3c   : > { %2799 = vmatmul.mubr.msk.f32.vlgmr.msra.gmra.mrb[0].mxu1 %vm305_vm1, %v390_v6 }
  0x3d   : > { %300 = vperm.xlu0 %3454, %v297_v7  }
  0xb8   : > { %v395_v8 = vpop.permute.xlu0 %394 }
  0xbc   : > { %v301_v9 = vpop.permute.xlu0 %300 }
 0x10e   : > { %v380_v10 = vpop.f32.mrb[0].mxu0 }
 0x10f   : > { %v466_v11 = vpop.f32.mrb[0].mxu1  ;;  %v381_v12 = vadd.f32 %v380_v10, %v301_v9  ;;  %v382_v13 = vpop.f32.mrb[1].mxu0 }
 0x110   : > { %v468_v14 = vpop.f32.mrb[1].mxu1  ;;  %v467_v15 = vadd.f32 %v466_v11, %v395_v8  ;;  %v383_v16 = vadd.f32 %v382_v13, %v301_v9 }
 0x111   : > { %v469_v17 = vadd.f32 %v468_v14, %v395_v8 }
 0x112   : > { %471 = vxpose.xlu1.b32.start.end [1/1] (short) %v467_v15, 128  ;;  %v387_v18 = vcombine.low %v381_v12, %v383_v16 }
 0x114   : > { %389 = vst [vmem:[#allocation3] sm:$0xff] %v387_v18 }
 0x14f   : > { %503 = vxpose.xlu1.b32.start.end [1/1] (short) %v469_v17, 128 }
 0x192   : > { %v487_v19 = vpop.trf.xlu1 }
 0x193   : > { %535 = vst.msk [vmem:[#allocation4] sm:$0xff] %vm305_vm1, %v487_v19 }
 0x196   : > { %v488_v20 = vpop.trf.xlu1 }
 0x197   : > { %536 = vst.msk [vmem:[#allocation4 + $0x8] sm:$0xff] %vm305_vm1, %v488_v20 }
 0x19a   : > { %v489_v21 = vpop.trf.xlu1 }
 0x19b   : > { %537 = vst.msk [vmem:[#allocation4 + $0x10] sm:$0xff] %vm305_vm1, %v489_v21 }
 0x19e   : > { %v490_v22 = vpop.trf.xlu1 }
 0x19f   : > { %538 = vst.msk [vmem:[#allocation4 + $0x18] sm:$0xff] %vm305_vm1, %v490_v22 }
 0x1a2   : > { %v491_v23 = vpop.trf.xlu1 }
 0x1a3   : > { %539 = vst.msk [vmem:[#allocation4 + $0x20] sm:$0xff] %vm305_vm1, %v491_v23 }
 0x1a6   : > { %v492_v24 = vpop.trf.xlu1 }
 0x1a7   : > { %540 = vst.msk [vmem:[#allocation4 + $0x28] sm:$0xff] %vm305_vm1, %v492_v24 }
 0x1aa   : > { %v493_v25 = vpop.trf.xlu1 }
 0x1ab   : > { %541 = vst.msk [vmem:[#allocation4 + $0x30] sm:$0xff] %vm305_vm1, %v493_v25 }
 0x1ae   : > { %v494_v26 = vpop.trf.xlu1 }
 0x1af   : > { %542 = vst.msk [vmem:[#allocation4 + $0x38] sm:$0xff] %vm305_vm1, %v494_v26 }
 0x1b2   : > { %v495_v27 = vpop.trf.xlu1 }
 0x1b3   : > { %543 = vst.msk [vmem:[#allocation4 + $0x40] sm:$0xff] %vm305_vm1, %v495_v27 }
 0x1b6   : > { %v496_v28 = vpop.trf.xlu1 }
 0x1b7   : > { %544 = vst.msk [vmem:[#allocation4 + $0x48] sm:$0xff] %vm305_vm1, %v496_v28 }
 0x1ba   : > { %v497_v29 = vpop.trf.xlu1 }
 0x1bb   : > { %545 = vst.msk [vmem:[#allocation4 + $0x50] sm:$0xff] %vm305_vm1, %v497_v29 }
 0x1be   : > { %v498_v30 = vpop.trf.xlu1 }
 0x1bf   : > { %546 = vst.msk [vmem:[#allocation4 + $0x58] sm:$0xff] %vm305_vm1, %v498_v30 }
 0x1c2   : > { %v499_v31 = vpop.trf.xlu1 }
 0x1c3   : > { %547 = vst.msk [vmem:[#allocation4 + $0x60] sm:$0xff] %vm305_vm1, %v499_v31 }
 0x1c6   : > { %v500_v32 = vpop.trf.xlu1 }
 0x1c7   : > { %548 = vst.msk [vmem:[#allocation4 + $0x68] sm:$0xff] %vm305_vm1, %v500_v32 }
 0x1ca   : > { %v501_v33 = vpop.trf.xlu1 }
 0x1cb   : > { %549 = vst.msk [vmem:[#allocation4 + $0x70] sm:$0xff] %vm305_vm1, %v501_v33 }
 0x1ce   : > { %v502_v34 = vpop.trf.xlu1 }
 0x1cf   : > { %550 = vst.msk [vmem:[#allocation4 + $0x78] sm:$0xff] %vm305_vm1, %v502_v34 }
 0x1d2   : > { %v519_v35 = vpop.trf.xlu1 }
 0x1d3   : > { %551 = vst.msk [vmem:[#allocation4 + $0x80] sm:$0xff] %vm305_vm1, %v519_v35 }
 0x1d6   : > { %v520_v36 = vpop.trf.xlu1 }
 0x1d7   : > { %552 = vst.msk [vmem:[#allocation4 + $0x88] sm:$0xff] %vm305_vm1, %v520_v36 }
 0x1da   : > { %v521_v37 = vpop.trf.xlu1 }
 0x1db   : > { %553 = vst.msk [vmem:[#allocation4 + $0x90] sm:$0xff] %vm305_vm1, %v521_v37 }
 0x1de   : > { %v522_v38 = vpop.trf.xlu1 }
 0x1df   : > { %554 = vst.msk [vmem:[#allocation4 + $0x98] sm:$0xff] %vm305_vm1, %v522_v38 }
 0x1e2   : > { %v523_v39 = vpop.trf.xlu1 }
 0x1e3   : > { %555 = vst.msk [vmem:[#allocation4 + $0xa0] sm:$0xff] %vm305_vm1, %v523_v39 }
 0x1e6   : > { %v524_v40 = vpop.trf.xlu1 }
 0x1e7   : > { %556 = vst.msk [vmem:[#allocation4 + $0xa8] sm:$0xff] %vm305_vm1, %v524_v40 }
 0x1ea   : > { %v525_v41 = vpop.trf.xlu1 }
 0x1eb   : > { %557 = vst.msk [vmem:[#allocation4 + $0xb0] sm:$0xff] %vm305_vm1, %v525_v41 }
 0x1ee   : > { %v526_v42 = vpop.trf.xlu1 }
 0x1ef   : > { %558 = vst.msk [vmem:[#allocation4 + $0xb8] sm:$0xff] %vm305_vm1, %v526_v42 }
 0x1f2   : > { %v527_v43 = vpop.trf.xlu1 }
 0x1f3   : > { %559 = vst.msk [vmem:[#allocation4 + $0xc0] sm:$0xff] %vm305_vm1, %v527_v43 }
 0x1f6   : > { %v528_v44 = vpop.trf.xlu1 }
 0x1f7   : > { %560 = vst.msk [vmem:[#allocation4 + $0xc8] sm:$0xff] %vm305_vm1, %v528_v44 }
 0x1fa   : > { %v529_v45 = vpop.trf.xlu1 }
 0x1fb   : > { %561 = vst.msk [vmem:[#allocation4 + $0xd0] sm:$0xff] %vm305_vm1, %v529_v45 }
 0x1fe   : > { %v530_v46 = vpop.trf.xlu1 }
 0x1ff   : > { %562 = vst.msk [vmem:[#allocation4 + $0xd8] sm:$0xff] %vm305_vm1, %v530_v46 }
 0x202   : > { %v531_v47 = vpop.trf.xlu1 }
 0x203   : > { %563 = vst.msk [vmem:[#allocation4 + $0xe0] sm:$0xff] %vm305_vm1, %v531_v47 }
 0x206   : > { %v532_v48 = vpop.trf.xlu1 }
 0x207   : > { %564 = vst.msk [vmem:[#allocation4 + $0xe8] sm:$0xff] %vm305_vm1, %v532_v48 }
 0x20a   : > { %v533_v49 = vpop.trf.xlu1 }
 0x20b   : > { %565 = vst.msk [vmem:[#allocation4 + $0xf0] sm:$0xff] %vm305_vm1, %v533_v49 }
 0x20e   : > { %v534_v50 = vpop.trf.xlu1 }
 0x20f   : > { %566 = vst.msk [vmem:[#allocation4 + $0xf8] sm:$0xff] %vm305_vm1, %v534_v50 }
 0x210 PF: > { %s2800_s21 = sshll.u32 %s3794_s10, 7  ;;  %v3947_v51 = vmov 0.0   ;;  %vm3948_vm2 = vmmov 0   ;;  %v574_v52 = vld [vmem:[%s5982_s2] sm:$0xf]  ;;  %vm584_vm3 = vcmask 1043456  }
 0x211   : > { %3023 = vmatprep.subr.mxu0 %v3947_v51  ;;  %s568_s22 = sshra.s32 %s2800_s21, 7  ;;  %3025 = vmatprep.mubr.msk.f32.mxu0 %vm3948_vm2, %v3947_v51  ;;  %v5993_v53 = vmov 0   ;;  %v573_v54 = vld [vmem:[%s5981_s1] sm:$0xf]  ;;  %vm580_vm4 = vcmask 31744   ;;  %v658_v56 = vld [vmem:[#allocation3] sm:$0xff] }
 0x212   : > { %s2801_s13 = sshll.u32 %s568_s22, 2  ;;  %3456 = vset.pattern.permute.xlu0 %v5993_v53  ;;  %851 = vmatprep.mubr.f32.mxu1 %v3947_v51  ;;  %v692_v57 = vcombine.high %v658_v56, %v658_v56  ;;  %s5101_s27 = smov 0  }
 0x213   : > { %577 = vperm.xlu0 %3456, %v574_v52   ;;  %s571_s25 = scalar_lea.vmem [#allocation2], %s2801_s13 }
 0x214   : > { %v4147_v55 = vld [vmem:[%s571_s25] sm:$0xf]  ;;  %3076 = vmatprep.subr.msk.mxu1 %vm584_vm3, %v692_v57 }
 0x215   : > { %6111 = vst [vmem:[#allocation18_spill] sm:$0xff] %v4147_v55  ;;  %3024 = vmatpush3.msk.msra.mxu0 %vm584_vm3, %v4147_v55  ;;  %3077 = vmatpush1.msk.msra.mxu1 %vm584_vm3, %v658_v56 }
 0x216   : > { %3026 = vmatmul.mubr.msk.f32.vlgmr.msra.gmra.mrb[0].mxu0 %vm580_vm4, %v573_v54  ;;  %2804 = vmatprep.subr.msk.mxu0 %vm584_vm3, %v692_v57 }
 0x217   : > { %809 = vmatprep.mubr.f32.mxu0 %v3947_v51  ;;  %2805 = vmatpush1.msk.msra.mxu0 %vm584_vm3, %v658_v56 }
 0x292   : > { %v578_v58 = vpop.permute.xlu0 %577 }
 0x2e9   : > { %v654_v59 = vpop.f32.mrb[0].mxu0 }
 0x2ea   : > { %v655_v60 = vadd.f32 %v654_v59, %v578_v58  ;;  %v3027_v61 = vpop.f32.mrb[1].mxu0 }
 0x2ec   : > { %659 = vxpose.xlu0.b32.start.end [1/1] (short) %v655_v60, 128 }
 0x36c   : > { %v675_v62 = vpop.trf.xlu0 }
 0x36d   : > { %2806 = vmatmul.mubr.msk.f32.vlgmr.msra.gmra.mrb[2].mxu0 %vm580_vm4, %v675_v62 }
 0x36e   : > { %815 = vmatprep.mubr.f32.mxu0 %v3947_v51 }
 0x370   : > { %v676_v63 = vpop.trf.xlu0 }
 0x371   : > { %2807 = vmatmul.mubr.msk.f32.gmra.mrb[4].mxu0 %vm580_vm4, %v676_v63 }
 0x372   : > { %821 = vmatprep.mubr.f32.mxu0 %v3947_v51 }
 0x374   : > { %v677_v0 = vpop.trf.xlu0 }
 0x375   : > { %2808 = vmatmul.mubr.msk.f32.gmra.mrb[6].mxu0 %vm580_vm4, %v677_v0 }
 0x376   : > { %827 = vmatprep.mubr.f32.mxu0 %v3947_v51 }
 0x378   : > { %v678_v1 = vpop.trf.xlu0 }
 0x379   : > { %2809 = vmatmul.mubr.msk.f32.gmra.mrb[8].mxu0 %vm580_vm4, %v678_v1 }
 0x37a   : > { %833 = vmatprep.mubr.f32.mxu0 %v3947_v51 }
 0x37c   : > { %v679_v2 = vpop.trf.xlu0 }
 0x37d   : > { %2810 = vmatmul.mubr.msk.f32.gmra.mrb[10].mxu0 %vm580_vm4, %v679_v2 }
 0x37e   : > { %839 = vmatprep.mubr.f32.mxu0 %v3947_v51 }
 0x380   : > { %v680_v3 = vpop.trf.xlu0 }
 0x381   : > { %2811 = vmatmul.mubr.msk.f32.gmra.mrb[12].mxu0 %vm580_vm4, %v680_v3 }
 0x382   : > { %845 = vmatprep.mubr.f32.mxu0 %v3947_v51 }
 0x384   : > { %v681_v4 = vpop.trf.xlu0 }
 0x385   : > { %2812 = vmatmul.mubr.msk.f32.gmra.mrb[14].mxu0 %vm580_vm4, %v681_v4 }
 0x388   : > { %v682_v5 = vpop.trf.xlu0 }
 0x389   : > { %2813 = vmatmul.mubr.msk.f32.vlgmr.msra.gmra.mrb[0].mxu1 %vm580_vm4, %v682_v5 }
 0x38a   : > { %857 = vmatprep.mubr.f32.mxu1 %v3947_v51 }
 0x38c   : > { %v683_v6 = vpop.trf.xlu0 }
 0x38d   : > { %2814 = vmatmul.mubr.msk.f32.gmra.mrb[2].mxu1 %vm580_vm4, %v683_v6 }
 0x38e   : > { %863 = vmatprep.mubr.f32.mxu1 %v3947_v51 }
 0x390   : > { %v684_v7 = vpop.trf.xlu0 }
 0x391   : > { %2815 = vmatmul.mubr.msk.f32.gmra.mrb[4].mxu1 %vm580_vm4, %v684_v7 }
 0x392   : > { %869 = vmatprep.mubr.f32.mxu1 %v3947_v51 }
 0x394   : > { %v685_v8 = vpop.trf.xlu0 }
 0x395   : > { %2816 = vmatmul.mubr.msk.f32.gmra.mrb[6].mxu1 %vm580_vm4, %v685_v8 }
 0x396   : > { %875 = vmatprep.mubr.f32.mxu1 %v3947_v51 }
 0x398   : > { %v686_v9 = vpop.trf.xlu0 }
 0x399   : > { %2817 = vmatmul.mubr.msk.f32.gmra.mrb[8].mxu1 %vm580_vm4, %v686_v9 }
 0x39a   : > { %881 = vmatprep.mubr.f32.mxu1 %v3947_v51 }
 0x39c   : > { %v687_v10 = vpop.trf.xlu0 }
 0x39d   : > { %2818 = vmatmul.mubr.msk.f32.gmra.mrb[10].mxu1 %vm580_vm4, %v687_v10 }
 0x39e   : > { %887 = vmatprep.mubr.f32.mxu1 %v3947_v51 }
 0x3a0   : > { %v688_v11 = vpop.trf.xlu0 }
 0x3a1   : > { %2819 = vmatmul.mubr.msk.f32.gmra.mrb[12].mxu1 %vm580_vm4, %v688_v11 }
 0x3a2   : > { %893 = vmatprep.mubr.f32.mxu1 %v3947_v51 }
 0x3a4   : > { %v689_v12 = vpop.trf.xlu0 }
 0x3a5   : > { %2820 = vmatmul.mubr.msk.f32.gmra.mrb[14].mxu1 %vm580_vm4, %v689_v12 }
 0x3a6   : > { %899 = vmatprep.mubr.f32.mxu1 %v3947_v51 }
 0x3a8   : > { %v690_v13 = vpop.trf.xlu0 }
 0x3a9   : > { %2821 = vmatmul.mubr.msk.f32.gmra.mrb[16].mxu1 %vm580_vm4, %v690_v13 }
 0x440   : > { %v4187_v14 = vpop.f32.mrb[2].mxu0 }
 0x441   : > { %6112 = vst [vmem:[#allocation19_spill] sm:$0xff] %v4187_v14  ;;  %vm938_vm5 = vcmp.lt.s32.totalorder %v4187_v14, 0  ;;  %v970_v15 = vsub.s32 2147483648, %v4187_v14  ;;  %v4191_v16 = vpop.f32.mrb[3].mxu0 }
 0x442   : > { %6113 = vst [vmem:[#allocation20_spill] sm:$0xff] %v4191_v16  ;;  %vm939_vm6 = vcmp.lt.s32.totalorder %v4191_v16, 0  ;;  %v971_v17 = vsub.s32 2147483648, %v4191_v16 }
 0x443   : > { %v4196_v18 = vsel %vm938_vm5, %v970_v15, %v4187_v14 }
 0x444   : > { %6114 = vst [vmem:[#allocation21_spill] sm:$0xff] %v4196_v18  ;;  %v4199_v19 = vsel %vm939_vm6, %v971_v17, %v4191_v16  ;;  %v4201_v20 = vpop.f32.mrb[4].mxu0 }
 0x445   : > { %6115 = vst [vmem:[#allocation22_spill] sm:$0xff] %v4199_v19  ;;  %6116 = vst [vmem:[#allocation23_spill] sm:$0xff] %v4201_v20  ;;  %vm940_vm7 = vcmp.lt.s32.totalorder %v4201_v20, 0  ;;  %v972_v21 = vsub.s32 2147483648, %v4201_v20  ;;  %v4205_v22 = vpop.f32.mrb[5].mxu0  ;;  %vm1034_vm8 = vcmp.lt.s32.totalorder %v4196_v18, %v4199_v19  ;;  %vm1290_vm9 = vcmp.gt.s32.totalorder %v4196_v18, %v4199_v19 }
 0x446   : > { %6117 = vst [vmem:[#allocation24_spill] sm:$0xff] %v4205_v22  ;;  %vm941_vm10 = vcmp.lt.s32.totalorder %v4205_v22, 0  ;;  %v973_v23 = vsub.s32 2147483648, %v4205_v22  ;;  %v4215_v24 = vsel %vm1034_vm8, %v4196_v18, %v4199_v19  ;;  %v4219_v25 = vsel %vm1290_vm9, %v4196_v18, %v4199_v19 }
 0x447   : > { %v4222_v26 = vsel %vm940_vm7, %v972_v21, %v4201_v20  ;;  %v1037_v27 = vshra.s32 %v4215_v24, 16  ;;  %v1293_v30 = vshra.s32 %v4219_v25, 16 }
 0x448   : > { %6118 = vst [vmem:[#allocation25_spill] sm:$0xff] %v4222_v26  ;;  %v4226_v28 = vsel %vm941_vm10, %v973_v23, %v4205_v22  ;;  %v4228_v29 = vpop.f32.mrb[6].mxu0 }
 0x449   : > { %6119 = vst [vmem:[#allocation26_spill] sm:$0xff] %v4226_v28  ;;  %6120 = vst [vmem:[#allocation27_spill] sm:$0xff] %v4228_v29  ;;  %vm942_vm11 = vcmp.lt.s32.totalorder %v4228_v29, 0  ;;  %v974_v31 = vsub.s32 2147483648, %v4228_v29  ;;  %v4233_v32 = vpop.f32.mrb[7].mxu0  ;;  %v4235_v33 = vcvt.s32.f32 %v1037_v27  ;;  %vm1306_vm13 = vcmp.gt.s32.totalorder %v4222_v26, %v4226_v28 }
 0x44a   : > { %6121 = vst [vmem:[#allocation28_spill] sm:$0xff] %v4233_v32  ;;  %vm943_vm12 = vcmp.lt.s32.totalorder %v4233_v32, 0  ;;  %v975_v34 = vsub.s32 2147483648, %v4233_v32  ;;  %vm1050_vm14 = vcmp.lt.s32.totalorder %v4222_v26, %v4226_v28  ;;  %v4249_v36 = vsel %vm1306_vm13, %v4222_v26, %v4226_v28 }
 0x44b   : > { %v4244_v35 = vsel %vm942_vm11, %v974_v31, %v4228_v29  ;;  %1040 = vmin.xlane.f32.xlu1 %v4235_v33  ;;  %v4253_v37 = vsel %vm1050_vm14, %v4222_v26, %v4226_v28  ;;  %v4260_v40 = vcvt.s32.f32 %v1293_v30  ;;  %v1309_v41 = vshra.s32 %v4249_v36, 16 }
 0x44c   : > { %6122 = vst [vmem:[#allocation29_spill] sm:$0xff] %v4244_v35  ;;  %v4256_v38 = vsel %vm943_vm12, %v975_v34, %v4233_v32  ;;  %v4258_v39 = vpop.f32.mrb[8].mxu0 }
 0x44d   : > { %6123 = vst [vmem:[#allocation30_spill] sm:$0xff] %v4256_v38  ;;  %6124 = vst [vmem:[#allocation31_spill] sm:$0xff] %v4258_v39  ;;  %vm944_vm15 = vcmp.lt.s32.totalorder %v4258_v39, 0  ;;  %v976_v42 = vsub.s32 2147483648, %v4258_v39  ;;  %v4265_v43 = vpop.f32.mrb[9].mxu0  ;;  %vm1322_vm0 = vcmp.gt.s32.totalorder %v4244_v35, %v4256_v38  ;;  %vm1066_vm1 = vcmp.lt.s32.totalorder %v4244_v35, %v4256_v38 }
 0x44e   : > { %6125 = vst [vmem:[#allocation32_spill] sm:$0xff] %v4265_v43  ;;  %vm945_vm2 = vcmp.lt.s32.totalorder %v4265_v43, 0  ;;  %v977_v44 = vsub.s32 2147483648, %v4265_v43  ;;  %v4275_v45 = vsel %vm1322_vm0, %v4244_v35, %v4256_v38  ;;  %v4283_v47 = vsel %vm1066_vm1, %v4244_v35, %v4256_v38 }
 0x44f   : > { %v4278_v46 = vsel %vm944_vm15, %v976_v42, %v4258_v39  ;;  %1296 = vmax.xlane.f32.xlu1 %v4260_v40  ;;  %v1325_v50 = vshra.s32 %v4275_v45, 16  ;;  %v4295_v54 = vcvt.s32.f32 %v1309_v41 }
 0x450   : > { %6126 = vst [vmem:[#allocation33_spill] sm:$0xff] %v4278_v46  ;;  %v4286_v48 = vsel %vm945_vm2, %v977_v44, %v4265_v43  ;;  %v4288_v49 = vpop.f32.mrb[10].mxu0 }
 0x451   : > { %6127 = vst [vmem:[#allocation34_spill] sm:$0xff] %v4286_v48  ;;  %6128 = vst [vmem:[#allocation35_spill] sm:$0xff] %v4288_v49  ;;  %vm946_vm3 = vcmp.lt.s32.totalorder %v4288_v49, 0  ;;  %v978_v51 = vsub.s32 2147483648, %v4288_v49  ;;  %v4293_v52 = vpop.f32.mrb[11].mxu0  ;;  %vm1338_vm4 = vcmp.gt.s32.totalorder %v4278_v46, %v4286_v48  ;;  %vm1082_vm6 = vcmp.lt.s32.totalorder %v4278_v46, %v4286_v48 }
 0x452   : > { %6129 = vst [vmem:[#allocation36_spill] sm:$0xff] %v4293_v52  ;;  %vm947_vm5 = vcmp.lt.s32.totalorder %v4293_v52, 0  ;;  %v979_v56 = vsub.s32 2147483648, %v4293_v52  ;;  %v4303_v57 = vsel %vm1338_vm4, %v4278_v46, %v4286_v48  ;;  %v4316_v61 = vcvt.s32.f32 %v1325_v50 }
 0x453   : > { %v4306_v58 = vsel %vm946_vm3, %v978_v51, %v4288_v49  ;;  %1312 = vmax.xlane.f32.xlu1 %v4295_v54  ;;  %v4320_v62 = vsel %vm1082_vm6, %v4278_v46, %v4286_v48  ;;  %v1341_v1 = vshra.s32 %v4303_v57, 16  ;;  %v1069_v49 = vshra.s32 %v4283_v47, 16 }
 0x454   : > { %6130 = vst [vmem:[#allocation37_spill] sm:$0xff] %v4306_v58  ;;  %v4312_v59 = vsel %vm947_vm5, %v979_v56, %v4293_v52  ;;  %v4314_v60 = vpop.f32.mrb[12].mxu0  ;;  %v1085_v16 = vshra.s32 %v4320_v62, 16 }
 0x455   : > { %6131 = vst [vmem:[#allocation38_spill] sm:$0xff] %v4312_v59  ;;  %6132 = vst [vmem:[#allocation39_spill] sm:$0xff] %v4314_v60  ;;  %vm948_vm7 = vcmp.lt.s32.totalorder %v4314_v60, 0  ;;  %v980_v63 = vsub.s32 2147483648, %v4314_v60  ;;  %v4324_v0 = vpop.f32.mrb[13].mxu0  ;;  %vm1354_vm8 = vcmp.gt.s32.totalorder %v4306_v58, %v4312_v59  ;;  %vm1098_vm10 = vcmp.lt.s32.totalorder %v4306_v58, %v4312_v59 }
 0x456   : > { %6133 = vst [vmem:[#allocation40_spill] sm:$0xff] %v4324_v0  ;;  %vm949_vm9 = vcmp.lt.s32.totalorder %v4324_v0, 0  ;;  %v981_v2 = vsub.s32 2147483648, %v4324_v0  ;;  %v4333_v3 = vsel %vm1354_vm8, %v4306_v58, %v4312_v59  ;;  %v4349_v8 = vsel %vm1098_vm10, %v4306_v58, %v4312_v59 }
 0x457   : > { %v4336_v4 = vsel %vm948_vm7, %v980_v63, %v4314_v60  ;;  %1328 = vmax.xlane.f32.xlu1 %v4316_v61  ;;  %v1357_v7 = vshra.s32 %v4333_v3, 16  ;;  %v4355_v11 = vcvt.s32.f32 %v1341_v1  ;;  %v4529_v20 = vcvt.s32.f32 %v1069_v49 }
 0x458   : > { %6134 = vst [vmem:[#allocation41_spill] sm:$0xff] %v4336_v4  ;;  %v4342_v5 = vsel %vm949_vm9, %v981_v2, %v4324_v0  ;;  %v4344_v6 = vpop.f32.mrb[14].mxu0 }
 0x459   : > { %6135 = vst [vmem:[#allocation42_spill] sm:$0xff] %v4342_v5  ;;  %6136 = vst [vmem:[#allocation43_spill] sm:$0xff] %v4344_v6  ;;  %vm950_vm11 = vcmp.lt.s32.totalorder %v4344_v6, 0  ;;  %v982_v9 = vsub.s32 2147483648, %v4344_v6  ;;  %v4353_v10 = vpop.f32.mrb[15].mxu0  ;;  %vm1370_vm12 = vcmp.gt.s32.totalorder %v4336_v4, %v4342_v5  ;;  %vm1114_vm14 = vcmp.lt.s32.totalorder %v4336_v4, %v4342_v5 }
 0x45a   : > { %6137 = vst [vmem:[#allocation44_spill] sm:$0xff] %v4353_v10  ;;  %vm951_vm13 = vcmp.lt.s32.totalorder %v4353_v10, 0  ;;  %v983_v12 = vsub.s32 2147483648, %v4353_v10  ;;  %v4363_v13 = vsel %vm1370_vm12, %v4336_v4, %v4342_v5  ;;  %v4376_v23 = vcvt.s32.f32 %v1357_v7 }
 0x45b   : > { %v4366_v15 = vsel %vm950_vm11, %v982_v9, %v4344_v6  ;;  %1344 = vmax.xlane.f32.xlu1 %v4355_v11  ;;  %v4380_v27 = vsel %vm1114_vm14, %v4336_v4, %v4342_v5  ;;  %v1373_v34 = vshra.s32 %v4363_v13, 16 }
 0x45c   : > { %6138 = vst [vmem:[#allocation45_spill] sm:$0xff] %v4366_v15  ;;  %v4372_v17 = vsel %vm951_vm13, %v983_v12, %v4353_v10  ;;  %v4374_v21 = vpop.f32.mrb[0].mxu1  ;;  %v1117_v58 = vshra.s32 %v4380_v27, 16 }
 0x45d   : > { %6139 = vst [vmem:[#allocation46_spill] sm:$0xff] %v4372_v17  ;;  %6140 = vst [vmem:[#allocation47_spill] sm:$0xff] %v4374_v21  ;;  %vm952_vm15 = vcmp.lt.s32.totalorder %v4374_v21, 0  ;;  %v984_v30 = vsub.s32 2147483648, %v4374_v21  ;;  %v4384_v31 = vpop.f32.mrb[1].mxu1  ;;  %vm1386_vm0 = vcmp.gt.s32.totalorder %v4366_v15, %v4372_v17  ;;  %vm1130_vm2 = vcmp.lt.s32.totalorder %v4366_v15, %v4372_v17 }
 0x45e   : > { %6141 = vst [vmem:[#allocation48_spill] sm:$0xff] %v4384_v31  ;;  %vm953_vm1 = vcmp.lt.s32.totalorder %v4384_v31, 0  ;;  %v985_v41 = vsub.s32 2147483648, %v4384_v31  ;;  %v4393_v42 = vsel %vm1386_vm0, %v4366_v15, %v4372_v17  ;;  %v4409_v63 = vsel %vm1130_vm2, %v4366_v15, %v4372_v17 }
 0x45f   : > { %v4396_v44 = vsel %vm952_vm15, %v984_v30, %v4374_v21  ;;  %1360 = vmax.xlane.f32.xlu1 %v4376_v23  ;;  %v1389_v56 = vshra.s32 %v4393_v42, 16  ;;  %v4415_v7 = vcvt.s32.f32 %v1373_v34  ;;  %v4559_v17 = vcvt.s32.f32 %v1085_v16 }
 0x460   : > { %6142 = vst [vmem:[#allocation49_spill] sm:$0xff] %v4396_v44  ;;  %v4402_v50 = vsel %vm953_vm1, %v985_v41, %v4384_v31  ;;  %v4404_v51 = vpop.f32.mrb[2].mxu1  ;;  %v1101_v15 = vshra.s32 %v4349_v8, 16  ;;  %v1133_v48 = vshra.s32 %v4409_v63, 16 }
 0x461   : > { %6143 = vst [vmem:[#allocation50_spill] sm:$0xff] %v4402_v50  ;;  %6144 = vst [vmem:[#allocation51_spill] sm:$0xff] %v4404_v51  ;;  %vm954_vm3 = vcmp.lt.s32.totalorder %v4404_v51, 0  ;;  %v986_v1 = vsub.s32 2147483648, %v4404_v51  ;;  %v4413_v2 = vpop.f32.mrb[3].mxu1  ;;  %vm1402_vm4 = vcmp.gt.s32.totalorder %v4396_v44, %v4402_v50  ;;  %vm1146_vm6 = vcmp.lt.s32.totalorder %v4396_v44, %v4402_v50 }
 0x462   : > { %6145 = vst [vmem:[#allocation52_spill] sm:$0xff] %v4413_v2  ;;  %vm955_vm5 = vcmp.lt.s32.totalorder %v4413_v2, 0  ;;  %v987_v9 = vsub.s32 2147483648, %v4413_v2  ;;  %v4423_v12 = vsel %vm1402_vm4, %v4396_v44, %v4402_v50  ;;  %v4434_v41 = vcvt.s32.f32 %v1389_v56 }
 0x463   : > { %v4426_v30 = vsel %vm954_vm3, %v986_v1, %v4404_v51  ;;  %1376 = vmax.xlane.f32.xlu1 %v4415_v7  ;;  %v4440_v55 = vsel %vm1146_vm6, %v4396_v44, %v4402_v50  ;;  %v1405_v1 = vshra.s32 %v4423_v12, 16  ;;  %v4589_v59 = vcvt.s32.f32 %v1101_v15 }
 0x464   : > { %6146 = vst [vmem:[#allocation53_spill] sm:$0xff] %v4426_v30  ;;  %v4432_v34 = vsel %vm955_vm5, %v987_v9, %v4413_v2  ;;  %v4436_v53 = vpop.f32.mrb[4].mxu1  ;;  %v1053_v2 = vshra.s32 %v4253_v37, 16  ;;  %v1149_v38 = vshra.s32 %v4440_v55, 16 }
 0x465   : > { %6147 = vst [vmem:[#allocation54_spill] sm:$0xff] %v4432_v34  ;;  %6148 = vst [vmem:[#allocation55_spill] sm:$0xff] %v4436_v53  ;;  %vm1418_vm7 = vcmp.gt.s32.totalorder %v4426_v30, %v4432_v34  ;;  %vm956_vm8 = vcmp.lt.s32.totalorder %v4436_v53, 0  ;;  %v988_v31 = vsub.s32 2147483648, %v4436_v53  ;;  %v4447_v21 = vpop.f32.mrb[5].mxu1  ;;  %vm1162_vm10 = vcmp.lt.s32.totalorder %v4426_v30, %v4432_v34 }
 0x466   : > { %6149 = vst [vmem:[#allocation56_spill] sm:$0xff] %v4447_v21  ;;  %v4451_v56 = vsel %vm1418_vm7, %v4426_v30, %v4432_v34  ;;  %vm957_vm9 = vcmp.lt.s32.totalorder %v4447_v21, 0  ;;  %v989_v9 = vsub.s32 2147483648, %v4447_v21  ;;  %v4470_v60 = vsel %vm1162_vm10, %v4426_v30, %v4432_v34 }
 0x467   : > { %1392 = vmax.xlane.f32.xlu1 %v4434_v41  ;;  %v1421_v10 = vshra.s32 %v4451_v56, 16  ;;  %v4458_v6 = vsel %vm956_vm8, %v988_v31, %v4436_v53  ;;  %v4474_v39 = vcvt.s32.f32 %v1405_v1  ;;  %v4499_v52 = vcvt.s32.f32 %v1053_v2 }
 0x468   : > { %6150 = vst [vmem:[#allocation57_spill] sm:$0xff] %v4458_v6  ;;  %v4464_v51 = vsel %vm957_vm9, %v989_v9, %v4447_v21  ;;  %v4466_v0 = vpop.f32.mrb[6].mxu1 }
 0x469   : > { %6151 = vst [vmem:[#allocation58_spill] sm:$0xff] %v4464_v51  ;;  %6152 = vst [vmem:[#allocation59_spill] sm:$0xff] %v4466_v0  ;;  %v4472_v43 = vcvt.s32.f32 %v1421_v10  ;;  %vm958_vm11 = vcmp.lt.s32.totalorder %v4466_v0, 0  ;;  %v990_v31 = vsub.s32 2147483648, %v4466_v0  ;;  %v4478_v53 = vpop.f32.mrb[7].mxu1  ;;  %vm1434_vm13 = vcmp.gt.s32.totalorder %v4458_v6, %v4464_v51 }
 0x46a   : > { %6153 = vst [vmem:[#allocation60_spill] sm:$0xff] %v4478_v53  ;;  %vm959_vm12 = vcmp.lt.s32.totalorder %v4478_v53, 0  ;;  %v991_v9 = vsub.s32 2147483648, %v4478_v53  ;;  %vm1178_vm14 = vcmp.lt.s32.totalorder %v4458_v6, %v4464_v51  ;;  %v4493_v1 = vsel %vm1434_vm13, %v4458_v6, %v4464_v51 }
 0x46b   : > { %1424 = vmax.xlane.f32.xlu0 %v4472_v43  ;;  %1408 = vmax.xlane.f32.xlu1 %v4474_v39  ;;  %v4489_v10 = vsel %vm958_vm11, %v990_v31, %v4466_v0  ;;  %v4497_v21 = vsel %vm1178_vm14, %v4458_v6, %v4464_v51  ;;  %v4652_v6 = vcvt.s32.f32 %v1133_v48  ;;  %v4668_v48 = vcvt.s32.f32 %v1149_v38 }
 0x46c   : > { %6154 = vst [vmem:[#allocation61_spill] sm:$0xff] %v4489_v10  ;;  %v4503_v32 = vsel %vm959_vm12, %v991_v9, %v4478_v53  ;;  %v4505_v29 = vpop.f32.mrb[8].mxu1  ;;  %v1181_v35 = vshra.s32 %v4497_v21, 16 }
 0x46d   : > { %6155 = vst [vmem:[#allocation62_spill] sm:$0xff] %v4503_v32  ;;  %6156 = vst [vmem:[#allocation63_spill] sm:$0xff] %v4505_v29  ;;  %vm960_vm15 = vcmp.lt.s32.totalorder %v4505_v29, 0  ;;  %v992_v31 = vsub.s32 2147483648, %v4505_v29  ;;  %v4509_v0 = vpop.f32.mrb[9].mxu1  ;;  %vm1450_vm0 = vcmp.gt.s32.totalorder %v4489_v10, %v4503_v32  ;;  %vm1194_vm1 = vcmp.lt.s32.totalorder %v4489_v10, %v4503_v32 }
 0x46e   : > { %6157 = vst [vmem:[#allocation64_spill] sm:$0xff] %v4509_v0  ;;  %vm961_vm2 = vcmp.lt.s32.totalorder %v4509_v0, 0  ;;  %v993_v2 = vsub.s32 2147483648, %v4509_v0  ;;  %v4523_v53 = vsel %vm1450_vm0, %v4489_v10, %v4503_v32  ;;  %v4527_v22 = vsel %vm1194_vm1, %v4489_v10, %v4503_v32 }
 0x46f   : > { %1056 = vmin.xlane.f32.xlu1 %v4499_v52  ;;  %v4519_v9 = vsel %vm960_vm15, %v992_v31, %v4505_v29  ;;  %v1453_v38 = vshra.s32 %v4523_v53, 16 }
 0x470   : > { %6158 = vst [vmem:[#allocation65_spill] sm:$0xff] %v4519_v9  ;;  %v4533_v14 = vsel %vm961_vm2, %v993_v2, %v4509_v0  ;;  %v4535_v50 = vpop.f32.mrb[10].mxu1 }
 0x471   : > { %6159 = vst [vmem:[#allocation66_spill] sm:$0xff] %v4533_v14  ;;  %6160 = vst [vmem:[#allocation67_spill] sm:$0xff] %v4535_v50  ;;  %vm962_vm3 = vcmp.lt.s32.totalorder %v4535_v50, 0  ;;  %v994_v31 = vsub.s32 2147483648, %v4535_v50  ;;  %v4539_v29 = vpop.f32.mrb[11].mxu1  ;;  %vm1466_vm4 = vcmp.gt.s32.totalorder %v4519_v9, %v4533_v14  ;;  %vm1210_vm5 = vcmp.lt.s32.totalorder %v4519_v9, %v4533_v14 }
 0x472   : > { %6161 = vst [vmem:[#allocation68_spill] sm:$0xff] %v4539_v29  ;;  %vm963_vm6 = vcmp.lt.s32.totalorder %v4539_v29, 0  ;;  %v995_v49 = vsub.s32 2147483648, %v4539_v29  ;;  %v4553_v0 = vsel %vm1466_vm4, %v4519_v9, %v4533_v14  ;;  %v4557_v44 = vsel %vm1210_vm5, %v4519_v9, %v4533_v14 }
 0x473   : > { %1072 = vmin.xlane.f32.xlu1 %v4529_v20  ;;  %v4549_v2 = vsel %vm962_vm3, %v994_v31, %v4535_v50 }
 0x474   : > { %6162 = vst [vmem:[#allocation69_spill] sm:$0xff] %v4549_v2  ;;  %v4563_v5 = vsel %vm963_vm6, %v995_v49, %v4539_v29  ;;  %v4565_v4 = vpop.f32.mrb[12].mxu1 }
 0x475   : > { %6163 = vst [vmem:[#allocation70_spill] sm:$0xff] %v4563_v5  ;;  %6164 = vst [vmem:[#allocation71_spill] sm:$0xff] %v4565_v4  ;;  %vm964_vm7 = vcmp.lt.s32.totalorder %v4565_v4, 0  ;;  %v996_v31 = vsub.s32 2147483648, %v4565_v4  ;;  %v4569_v50 = vpop.f32.mrb[13].mxu1  ;;  %vm1482_vm8 = vcmp.gt.s32.totalorder %v4549_v2, %v4563_v5  ;;  %vm1226_vm9 = vcmp.lt.s32.totalorder %v4549_v2, %v4563_v5 }
 0x476   : > { %6165 = vst [vmem:[#allocation72_spill] sm:$0xff] %v4569_v50  ;;  %vm965_vm10 = vcmp.lt.s32.totalorder %v4569_v50, 0  ;;  %v997_v16 = vsub.s32 2147483648, %v4569_v50  ;;  %v4583_v29 = vsel %vm1482_vm8, %v4549_v2, %v4563_v5  ;;  %v4587_v9 = vsel %vm1226_vm9, %v4549_v2, %v4563_v5 }
 0x477   : > { %1088 = vmin.xlane.f32.xlu1 %v4559_v17  ;;  %v4579_v49 = vsel %vm964_vm7, %v996_v31, %v4565_v4  ;;  %6167 = vst [vmem:[#allocation74_spill] sm:$0xff] %v4587_v9  ;;  %v4619_v5 = vcvt.s32.f32 %v1117_v58 }
 0x478   : > { %6166 = vst [vmem:[#allocation73_spill] sm:$0xff] %v4579_v49  ;;  %v4593_v14 = vsel %vm965_vm10, %v997_v16, %v4569_v50  ;;  %v4595_v10 = vpop.f32.mrb[14].mxu1 }
 0x479   : > { %6168 = vst [vmem:[#allocation75_spill] sm:$0xff] %v4593_v14  ;;  %6169 = vst [vmem:[#allocation76_spill] sm:$0xff] %v4595_v10  ;;  %vm966_vm11 = vcmp.lt.s32.totalorder %v4595_v10, 0  ;;  %v998_v31 = vsub.s32 2147483648, %v4595_v10  ;;  %v4599_v4 = vpop.f32.mrb[15].mxu1  ;;  %vm1498_vm12 = vcmp.gt.s32.totalorder %v4579_v49, %v4593_v14  ;;  %vm1242_vm13 = vcmp.lt.s32.totalorder %v4579_v49, %v4593_v14 }
 0x47a   : > { %6170 = vst [vmem:[#allocation77_spill] sm:$0xff] %v4599_v4  ;;  %vm967_vm14 = vcmp.lt.s32.totalorder %v4599_v4, 0  ;;  %v999_v15 = vsub.s32 2147483648, %v4599_v4  ;;  %v4613_v50 = vsel %vm1498_vm12, %v4579_v49, %v4593_v14  ;;  %v4617_v2 = vsel %vm1242_vm13, %v4579_v49, %v4593_v14 }
 0x47b   : > { %1104 = vmin.xlane.f32.xlu1 %v4589_v59  ;;  %v4609_v16 = vsel %vm966_vm11, %v998_v31, %v4595_v10  ;;  %6172 = vst [vmem:[#allocation79_spill] sm:$0xff] %v4613_v50  ;;  %6173 = vst [vmem:[#allocation80_spill] sm:$0xff] %v4617_v2 }
 0x47c   : > { %6171 = vst [vmem:[#allocation78_spill] sm:$0xff] %v4609_v16  ;;  %v4623_v46 = vsel %vm967_vm14, %v999_v15, %v4599_v4  ;;  %v4625_v32 = vpop.f32.mrb[16].mxu1 }
 0x47d   : > { %6174 = vst [vmem:[#allocation81_spill] sm:$0xff] %v4623_v46  ;;  %6175 = vst [vmem:[#allocation82_spill] sm:$0xff] %v4625_v32  ;;  %vm968_vm15 = vcmp.lt.s32.totalorder %v4625_v32, 0  ;;  %v1000_v31 = vsub.s32 2147483648, %v4625_v32  ;;  %v4629_v10 = vpop.f32.mrb[17].mxu1  ;;  %vm1514_vm0 = vcmp.gt.s32.totalorder %v4609_v16, %v4623_v46  ;;  %vm1258_vm1 = vcmp.lt.s32.totalorder %v4609_v16, %v4623_v46 }
 0x47e   : > { %6176 = vst [vmem:[#allocation83_spill] sm:$0xff] %v4629_v10  ;;  %vm969_vm2 = vcmp.lt.s32.totalorder %v4629_v10, 0  ;;  %v1001_v58 = vsub.s32 2147483648, %v4629_v10  ;;  %v4643_v4 = vsel %vm1514_vm0, %v4609_v16, %v4623_v46  ;;  %v4647_v49 = vsel %vm1258_vm1, %v4609_v16, %v4623_v46 }
 0x47f   : > { %1120 = vmin.xlane.f32.xlu1 %v4619_v5  ;;  %v4639_v15 = vsel %vm968_vm15, %v1000_v31, %v4625_v32  ;;  %6178 = vst [vmem:[#allocation85_spill] sm:$0xff] %v4643_v4  ;;  %6179 = vst [vmem:[#allocation86_spill] sm:$0xff] %v4647_v49  ;;  %v1437_v16 = vshra.s32 %v4493_v1, 16 }
 0x480   : > { %6177 = vst [vmem:[#allocation84_spill] sm:$0xff] %v4639_v15  ;;  %v4650_v14 = vsel %vm969_vm2, %v1001_v58, %v4629_v10  ;;  %v1165_v58 = vshra.s32 %v4470_v60, 16 }
 0x481   : > { %6180 = vst [vmem:[#allocation87_spill] sm:$0xff] %v4650_v14  ;;  %vm1530_vm3 = vcmp.gt.s32.totalorder %v4639_v15, %v4650_v14  ;;  %vm1274_vm4 = vcmp.lt.s32.totalorder %v4639_v15, %v4650_v14  ;;  %v4676_v46 = vcvt.s32.f32 %v1437_v16  ;;  %v1469_v16 = vshra.s32 %v4553_v0, 16 }
 0x482   : > { %v4661_v31 = vsel %vm1530_vm3, %v4639_v15, %v4650_v14  ;;  %v4665_v32 = vsel %vm1274_vm4, %v4639_v15, %v4650_v14  ;;  %v4672_v10 = vcvt.s32.f32 %v1165_v58  ;;  %v4680_v15 = vcvt.s32.f32 %v1181_v35 }
 0x483   : > { %6181 = vst [vmem:[#allocation88_spill] sm:$0xff] %v4665_v32  ;;  %1136 = vmin.xlane.f32.xlu1 %v4652_v6  ;;  %v4684_v14 = vcvt.s32.f32 %v1453_v38  ;;  %v1197_v58 = vshra.s32 %v4527_v22, 16  ;;  %v4692_v34 = vcvt.s32.f32 %v1469_v16  ;;  %v1213_v35 = vshra.s32 %v4557_v44, 16 }
 0x484   : > { %v1485_v38 = vshra.s32 %v4583_v29, 16  ;;  %v1501_v16 = vshra.s32 %v4613_v50, 16 }
 0x485   : > { %v4688_v51 = vcvt.s32.f32 %v1197_v58  ;;  %v4696_v30 = vcvt.s32.f32 %v1213_v35  ;;  %v1229_v58 = vshra.s32 %v4587_v9, 16  ;;  %v1245_v35 = vshra.s32 %v4617_v2, 16 }
 0x486   : > { %v4700_v26 = vcvt.s32.f32 %v1485_v38  ;;  %v4708_v19 = vcvt.s32.f32 %v1501_v16  ;;  %v1517_v38 = vshra.s32 %v4643_v4, 16  ;;  %v1533_v16 = vshra.s32 %v4661_v31, 16 }
 0x487   : > { %1152 = vmin.xlane.f32.xlu1 %v4668_v48  ;;  %v4704_v28 = vcvt.s32.f32 %v1229_v58  ;;  %v4712_v18 = vcvt.s32.f32 %v1245_v35  ;;  %v1261_v58 = vshra.s32 %v4647_v49, 16  ;;  %v1277_v35 = vshra.s32 %v4665_v32, 16 }
 0x488   : > { %v4716_v9 = vcvt.s32.f32 %v1517_v38  ;;  %v4724_v2 = vcvt.s32.f32 %v1533_v16  ;;  %v1036_v38 = vand.u32 65535, %v4215_v24 }
 0x489   : > { %v4720_v50 = vcvt.s32.f32 %v1261_v58  ;;  %v4728_v4 = vcvt.s32.f32 %v1277_v35  ;;  %v1308_v35 = vand.u32 65535, %v4249_v36 }
 0x48a   : > { %6182 = vst [vmem:[#allocation89_spill] sm:$0xff] %v4716_v9  ;;  %v1038_v58 = vcvt.s32.f32 %v1036_v38 }
 0x48b   : > { %1168 = vmin.xlane.f32.xlu1 %v4672_v10  ;;  %6183 = vst [vmem:[#allocation90_spill] sm:$0xff] %v4720_v50  ;;  %6184 = vst [vmem:[#allocation91_spill] sm:$0xff] %v4728_v4  ;;  %v1310_v38 = vcvt.s32.f32 %v1308_v35 }
 0x48f   : > { %1440 = vmax.xlane.f32.xlu1 %v4676_v46 }
 0x493   : > { %1184 = vmin.xlane.f32.xlu1 %v4680_v15 }
 0x497   : > { %1456 = vmax.xlane.f32.xlu1 %v4684_v14 }
 0x49b   : > { %1200 = vmin.xlane.f32.xlu1 %v4688_v51 }
 0x49f   : > { %1472 = vmax.xlane.f32.xlu1 %v4692_v34 }
 0x4a3   : > { %1216 = vmin.xlane.f32.xlu1 %v4696_v30 }
 0x4a7   : > { %1488 = vmax.xlane.f32.xlu1 %v4700_v26 }
 0x4ab   : > { %1232 = vmin.xlane.f32.xlu1 %v4704_v28 }
 0x4af   : > { %1504 = vmax.xlane.f32.xlu1 %v4708_v19 }
 0x4b3   : > { %1248 = vmin.xlane.f32.xlu1 %v4712_v18 }
 0x4b7   : > { %1520 = vmax.xlane.f32.xlu1 %v4716_v9  ;;  %v1292_v9 = vand.u32 65535, %v4219_v25 }
 0x4b9   : > { %v1294_v32 = vcvt.s32.f32 %v1292_v9 }
 0x4bb   : > { %1264 = vmin.xlane.f32.xlu1 %v4720_v50 }
 0x4bf   : > { %1536 = vmax.xlane.f32.xlu1 %v4724_v2 }
 0x4c3   : > { %1280 = vmin.xlane.f32.xlu1 %v4728_v4 }
 0x4d8   : > { %v4732_v49 = vpop.xlane.xlu1 %1040 }
 0x4d9   : > { %6185 = vst [vmem:[#allocation92_spill] sm:$0xff] %v4732_v49  ;;  %vm1042_vm5 = vcmp.eq.f32.partialorder %v4235_v33, %v4732_v49 }
 0x4da   : > { %v1043_v16 = vsel %vm1042_vm5, %v1038_v58, inf }
 0x4db   : > { %1044 = vmin.xlane.f32.xlu0 %v1043_v16 }
 0x4dc   : > { %v4737_v50 = vpop.xlane.xlu1 %1296 }
 0x4dd   : > { %6186 = vst [vmem:[#allocation93_spill] sm:$0xff] %v4737_v50  ;;  %vm1298_vm6 = vcmp.eq.f32.partialorder %v4260_v40, %v4737_v50  ;;  %v1052_v40 = vand.u32 65535, %v4253_v37  ;;  %v1356_v37 = vand.u32 65535, %v4333_v3  ;;  %v1100_v3 = vand.u32 65535, %v4349_v8 }
 0x4de   : > { %v1299_v4 = vsel %vm1298_vm6, %v1294_v32, -inf }
 0x4df   : > { %1300 = vmax.xlane.f32.xlu1 %v1299_v4  ;;  %v1054_v35 = vcvt.s32.f32 %v1052_v40  ;;  %v1340_v40 = vand.u32 65535, %v4303_v57  ;;  %v1084_v57 = vand.u32 65535, %v4320_v62 }
 0x4e0   : > { %v4742_v24 = vpop.xlane.xlu1 %1312 }
 0x4e1   : > { %6187 = vst [vmem:[#allocation94_spill] sm:$0xff] %v4742_v24  ;;  %vm1314_vm7 = vcmp.eq.f32.partialorder %v4295_v54, %v4742_v24  ;;  %v1068_v54 = vand.u32 65535, %v4283_v47 }
 0x4e2   : > { %v1315_v25 = vsel %vm1314_vm7, %v1310_v38, -inf  ;;  %v1324_v38 = vand.u32 65535, %v4275_v45 }
 0x4e3   : > { %1316 = vmax.xlane.f32.xlu1 %v1315_v25  ;;  %v1070_v50 = vcvt.s32.f32 %v1068_v54 }
 0x4e4   : > { %v4746_v33 = vpop.xlane.xlu1 %1328  ;;  %v1326_v49 = vcvt.s32.f32 %v1324_v38  ;;  %v1372_v38 = vand.u32 65535, %v4363_v13  ;;  %v1132_v13 = vand.u32 65535, %v4409_v63 }
 0x4e5   : > { %vm1330_vm9 = vcmp.eq.f32.partialorder %v4316_v61, %v4746_v33  ;;  %v1358_v61 = vcvt.s32.f32 %v1356_v37 }
 0x4e6   : > { %v1331_v47 = vsel %vm1330_vm9, %v1326_v49, -inf  ;;  %v1086_v49 = vcvt.s32.f32 %v1084_v57  ;;  %v1374_v37 = vcvt.s32.f32 %v1372_v38  ;;  %v1180_v38 = vand.u32 65535, %v4497_v21 }
 0x4e7   : > { %v1196_v21 = vand.u32 65535, %v4527_v22  ;;  %v1212_v22 = vand.u32 65535, %v4557_v44 }
 0x4e8   : > { %v4748_v58 = vpop.xlane.xlu1 %1344 }
 0x4e9   : > { %vm1346_vm12 = vcmp.eq.f32.partialorder %v4355_v11, %v4748_v58  ;;  %v1388_v11 = vand.u32 65535, %v4393_v42  ;;  %v1116_v42 = vand.u32 65535, %v4380_v27 }
 0x4ec   : > { %v4750_v9 = vpop.xlane.xlu1 %1360 }
 0x4ed   : > { %vm1362_vm11 = vcmp.eq.f32.partialorder %v4376_v23, %v4750_v9  ;;  %v1102_v23 = vcvt.s32.f32 %v1100_v3 }
 0x4ee   : > { %v1363_v54 = vsel %vm1362_vm11, %v1358_v61, -inf  ;;  %v1404_v61 = vand.u32 65535, %v4423_v12  ;;  %v1148_v12 = vand.u32 65535, %v4440_v55 }
 0x4f0   : > { %v4752_v36 = vpop.xlane.xlu1 %1376  ;;  %v1406_v3 = vcvt.s32.f32 %v1404_v61 }
 0x4f1   : > { %vm1378_vm0 = vcmp.eq.f32.partialorder %v4415_v7, %v4752_v36  ;;  %v1118_v7 = vcvt.s32.f32 %v1116_v42 }
 0x4f4   : > { %v4754_v16 = vpop.xlane.xlu1 %1392 }
 0x4f5   : > { %vm1394_vm15 = vcmp.eq.f32.partialorder %v4434_v41, %v4754_v16 }
 0x4f8   : > { %v4756_v32 = vpop.xlane.xlu1 %1408 }
 0x4f9   : > { %vm1410_vm3 = vcmp.eq.f32.partialorder %v4474_v39, %v4756_v32  ;;  %v1150_v39 = vcvt.s32.f32 %v1148_v12 }
 0x4fc   : > { %v4759_v4 = vpop.xlane.xlu1 %1056 }
 0x4fd   : > { %vm1058_vm8 = vcmp.eq.f32.partialorder %v4499_v52, %v4759_v4 }
 0x4fe   : > { %v1059_v25 = vsel %vm1058_vm8, %v1054_v35, inf  ;;  %v1342_v35 = vcvt.s32.f32 %v1340_v40 }
 0x4ff   : > { %1060 = vmin.xlane.f32.xlu1 %v1059_v25  ;;  %v1390_v25 = vcvt.s32.f32 %v1388_v11 }
 0x500   : > { %v4767_v24 = vpop.xlane.xlu1 %1072 }
 0x501   : > { %vm1074_vm10 = vcmp.eq.f32.partialorder %v4529_v20, %v4767_v24  ;;  %v1347_v20 = vsel %vm1346_vm12, %v1342_v35, -inf  ;;  %v1395_v40 = vsel %vm1394_vm15, %v1390_v25, -inf  ;;  %v1420_v35 = vand.u32 65535, %v4451_v56 }
 0x502   : > { %v1075_v45 = vsel %vm1074_vm10, %v1070_v50, inf  ;;  %v1164_v56 = vand.u32 65535, %v4470_v60 }
 0x503   : > { %1076 = vmin.xlane.f32.xlu0 %v1075_v45  ;;  %1332 = vmax.xlane.f32.xlu1 %v1331_v47  ;;  %v4799_v45 = vpop.xlane.xlu0 %1424  ;;  %v1134_v47 = vcvt.s32.f32 %v1132_v13  ;;  %v1422_v57 = vcvt.s32.f32 %v1420_v35  ;;  %v1198_v13 = vcvt.s32.f32 %v1196_v21  ;;  %v6194_v21 = vld [vmem:[#allocation90_spill] sm:$0xff] }
 0x504   : > { %v4777_v52 = vpop.xlane.xlu1 %1088  ;;  %vm1426_vm4 = vcmp.eq.f32.partialorder %v4472_v43, %v4799_v45  ;;  %v1436_v43 = vand.u32 65535, %v4493_v1  ;;  %v1182_v1 = vcvt.s32.f32 %v1180_v38  ;;  %v6192_v38 = vld [vmem:[#allocation86_spill] sm:$0xff] }
 0x505   : > { %vm1090_vm13 = vcmp.eq.f32.partialorder %v4559_v17, %v4777_v52 }
 0x506   : > { %v1091_v62 = vsel %vm1090_vm13, %v1086_v49, inf  ;;  %v1438_v11 = vcvt.s32.f32 %v1436_v43  ;;  %v6191_v43 = vld [vmem:[#allocation85_spill] sm:$0xff] }
 0x507   : > { %1364 = vmax.xlane.f32.xlu0 %v1363_v54  ;;  %1348 = vmax.xlane.f32.xlu1 %v1347_v20  ;;  %v1411_v54 = vsel %vm1410_vm3, %v1406_v3, -inf }
 0x508   : > { %v4783_v50 = vpop.xlane.xlu1 %1104 }
 0x509   : > { %vm1106_vm14 = vcmp.eq.f32.partialorder %v4589_v59, %v4783_v50  ;;  %v1379_v59 = vsel %vm1378_vm0, %v1374_v37, -inf }
 0x50a   : > { %v1107_v8 = vsel %vm1106_vm14, %v1102_v23, inf  ;;  %v1166_v23 = vcvt.s32.f32 %v1164_v56 }
 0x50b   : > { %1108 = vmin.xlane.f32.xlu0 %v1107_v8  ;;  %1092 = vmin.xlane.f32.xlu1 %v1091_v62  ;;  %v1452_v62 = vand.u32 65535, %v4523_v53  ;;  %v1468_v53 = vand.u32 65535, %v4553_v0  ;;  %v1484_v0 = vand.u32 65535, %v4583_v29 }
 0x50c   : > { %v4793_v17 = vpop.xlane.xlu1 %1120 }
 0x50d   : > { %vm1122_vm1 = vcmp.eq.f32.partialorder %v4619_v5, %v4793_v17  ;;  %v1454_v37 = vcvt.s32.f32 %v1452_v62  ;;  %v1486_v35 = vcvt.s32.f32 %v1484_v0  ;;  %v6197_v0 = vld [vmem:[#allocation92_spill] sm:$0xff] }
 0x50e   : > { %v1123_v27 = vsel %vm1122_vm1, %v1118_v7, inf }
 0x50f   : > { %1396 = vmax.xlane.f32.xlu0 %v1395_v40  ;;  %1380 = vmax.xlane.f32.xlu1 %v1379_v59  ;;  %v1470_v59 = vcvt.s32.f32 %v1468_v53  ;;  %v6195_v53 = vld [vmem:[#allocation88_spill] sm:$0xff] }
 0x510   : > { %v4801_v41 = vpop.xlane.xlu1 %1136 }
 0x511   : > { %vm1138_vm2 = vcmp.eq.f32.partialorder %v4652_v6, %v4801_v41  ;;  %v1427_v6 = vsel %vm1426_vm4, %v1422_v57, -inf  ;;  %v6189_v57 = vld [vmem:[#allocation79_spill] sm:$0xff] }
 0x512   : > { %v1139_v63 = vsel %vm1138_vm2, %v1134_v47, inf  ;;  %v1214_v47 = vcvt.s32.f32 %v1212_v22  ;;  %v1500_v29 = vand.u32 65535, %v6189_v57 }
 0x513   : > { %1124 = vmin.xlane.f32.xlu1 %v1123_v27  ;;  %1140 = vmin.xlane.f32.xlu0 %v1139_v63  ;;  %v6188_v27 = vld [vmem:[#allocation74_spill] sm:$0xff] }
 0x514   : > { %v4811_v5 = vpop.xlane.xlu1 %1152  ;;  %v1228_v44 = vand.u32 65535, %v6188_v27  ;;  %v1502_v56 = vcvt.s32.f32 %v1500_v29 }
 0x515   : > { %vm1154_vm5 = vcmp.eq.f32.partialorder %v4668_v48, %v4811_v5 }
 0x516   : > { %v1155_v49 = vsel %vm1154_vm5, %v1150_v39, inf  ;;  %v1230_v3 = vcvt.s32.f32 %v1228_v44  ;;  %v6198_v44 = vld [vmem:[#allocation93_spill] sm:$0xff] }
 0x517   : > { %1412 = vmax.xlane.f32.xlu1 %v1411_v54  ;;  %1428 = vmax.xlane.f32.xlu0 %v1427_v6  ;;  %v6190_v54 = vld [vmem:[#allocation80_spill] sm:$0xff] }
 0x518   : > { %v4817_v20 = vpop.xlane.xlu1 %1168  ;;  %v1244_v6 = vand.u32 65535, %v6190_v54 }
 0x519   : > { %vm1170_vm6 = vcmp.eq.f32.partialorder %v4672_v10, %v4817_v20 }
 0x51a   : > { %v1171_v55 = vsel %vm1170_vm6, %v1166_v23, inf  ;;  %v1246_v23 = vcvt.s32.f32 %v1244_v6 }
 0x51b   : > { %1156 = vmin.xlane.f32.xlu1 %v1155_v49  ;;  %1172 = vmin.xlane.f32.xlu0 %v1171_v55  ;;  %v1516_v49 = vand.u32 65535, %v6191_v43 }
 0x51c   : > { %v4822_v60 = vpop.xlane.xlu1 %1440 }
 0x51d   : > { %vm1442_vm7 = vcmp.eq.f32.partialorder %v4676_v46, %v4822_v60 }
 0x51e   : > { %v1443_v48 = vsel %vm1442_vm7, %v1438_v11, -inf  ;;  %v1518_v11 = vcvt.s32.f32 %v1516_v49 }
 0x51f   : > { %1444 = vmax.xlane.f32.xlu1 %v1443_v48  ;;  %v1260_v48 = vand.u32 65535, %v6192_v38  ;;  %v1063_v38 = vcvt.f32.s32 %v4759_v4 }
 0x520   : > { %v4827_v8 = vpop.xlane.xlu1 %1184 }
 0x521   : > { %vm1186_vm8 = vcmp.eq.f32.partialorder %v4680_v15, %v4827_v8 }
 0x522   : > { %v1187_v10 = vsel %vm1186_vm8, %v1182_v1, inf  ;;  %v6193_v1 = vld [vmem:[#allocation89_spill] sm:$0xff] }
 0x523   : > { %1188 = vmin.xlane.f32.xlu1 %v1187_v10  ;;  %v1262_v10 = vcvt.s32.f32 %v1260_v48  ;;  %v1335_v48 = vcvt.f32.s32 %v4746_v33 }
 0x524   : > { %v4832_v25 = vpop.xlane.xlu1 %1456 }
 0x525   : > { %vm1458_vm9 = vcmp.eq.f32.partialorder %v4684_v14, %v4832_v25 }
 0x526   : > { %v1459_v46 = vsel %vm1458_vm9, %v1454_v37, -inf  ;;  %v1532_v37 = vand.u32 65535, %v4661_v31  ;;  %v6196_v31 = vld [vmem:[#allocation91_spill] sm:$0xff] }
 0x527   : > { %1460 = vmax.xlane.f32.xlu0 %v1459_v46 }
 0x528   : > { %v4837_v42 = vpop.xlane.xlu1 %1200 }
 0x529   : > { %vm1202_vm10 = vcmp.eq.f32.partialorder %v4688_v51, %v4837_v42 }
 0x52a   : > { %v1203_v15 = vsel %vm1202_vm10, %v1198_v13, inf  ;;  %v1534_v13 = vcvt.s32.f32 %v1532_v37 }
 0x52b   : > { %1204 = vmin.xlane.f32.xlu0 %v1203_v15  ;;  %v1276_v15 = vand.u32 65535, %v6195_v53 }
 0x52c   : > { %v4842_v40 = vpop.xlane.xlu1 %1472 }
 0x52d   : > { %vm1474_vm11 = vcmp.eq.f32.partialorder %v4692_v34, %v4842_v40 }
 0x52e   : > { %v1475_v14 = vsel %vm1474_vm11, %v1470_v59, -inf }
 0x52f   : > { %1476 = vmax.xlane.f32.xlu1 %v1475_v14  ;;  %v1278_v14 = vcvt.s32.f32 %v1276_v15 }
 0x530   : > { %v4847_v7 = vpop.xlane.xlu1 %1216 }
 0x531   : > { %vm1218_vm12 = vcmp.eq.f32.partialorder %v4696_v30, %v4847_v7 }
 0x532   : > { %v1219_v51 = vsel %vm1218_vm12, %v1214_v47, inf }
 0x533   : > { %1220 = vmin.xlane.f32.xlu1 %v1219_v51  ;;  %v1047_v51 = vcvt.f32.s32 %v6197_v0 }
 0x534   : > { %v4852_v61 = vpop.xlane.xlu1 %1488 }
 0x535   : > { %vm1490_vm13 = vcmp.eq.f32.partialorder %v4700_v26, %v4852_v61  ;;  %v1048_v27 = vshll.u32 %v1047_v51, 16  ;;  %v1111_v51 = vcvt.f32.s32 %v4783_v50 }
 0x536   : > { %v1491_v34 = vsel %vm1490_vm13, %v1486_v35, -inf }
 0x537   : > { %1492 = vmax.xlane.f32.xlu0 %v1491_v34  ;;  %v1303_v34 = vcvt.f32.s32 %v6198_v44 }
 0x538   : > { %v4857_v63 = vpop.xlane.xlu1 %1232 }
 0x539   : > { %vm1234_vm14 = vcmp.eq.f32.partialorder %v4704_v28, %v4857_v63  ;;  %v1304_v29 = vshll.u32 %v1303_v34, 16 }
 0x53a   : > { %v1235_v30 = vsel %vm1234_vm14, %v1230_v3, inf }
 0x53b   : > { %1236 = vmin.xlane.f32.xlu0 %v1235_v30  ;;  %v6199_v30 = vld [vmem:[#allocation94_spill] sm:$0xff] }
 0x53c   : > { %v4862_v12 = vpop.xlane.xlu1 %1504 }
 0x53d   : > { %vm1506_vm15 = vcmp.eq.f32.partialorder %v4708_v19, %v4862_v12 }
 0x53e   : > { %v1507_v26 = vsel %vm1506_vm15, %v1502_v56, -inf  ;;  %v1319_v56 = vcvt.f32.s32 %v6199_v30  ;;  %v1399_v30 = vcvt.f32.s32 %v4754_v16  ;;  %v1143_v16 = vcvt.f32.s32 %v4801_v41 }
 0x53f   : > { %1508 = vmax.xlane.f32.xlu1 %v1507_v26 }
 0x540   : > { %v4867_v39 = vpop.xlane.xlu1 %1248 }
 0x541   : > { %vm1250_vm0 = vcmp.eq.f32.partialorder %v4712_v18, %v4867_v39 }
 0x542   : > { %v1251_v28 = vsel %vm1250_vm0, %v1246_v23, inf  ;;  %v1320_v23 = vshll.u32 %v1319_v56, 16 }
 0x543   : > { %1252 = vmin.xlane.f32.xlu1 %v1251_v28 }
 0x544   : > { %v4872_v55 = vpop.xlane.xlu1 %1520 }
 0x545   : > { %vm1522_vm1 = vcmp.eq.f32.partialorder %v6193_v1, %v4872_v55 }
 0x546   : > { %v1523_v19 = vsel %vm1522_vm1, %v1518_v11, -inf }
 0x547   : > { %1524 = vmax.xlane.f32.xlu0 %v1523_v19  ;;  %v1064_v19 = vshll.u32 %v1063_v38, 16 }
 0x548   : > { %v4877_v62 = vpop.xlane.xlu1 %1264 }
 0x549   : > { %vm1266_vm2 = vcmp.eq.f32.partialorder %v6194_v21, %v4877_v62 }
 0x54a   : > { %v1267_v18 = vsel %vm1266_vm2, %v1262_v10, inf  ;;  %v1079_v10 = vcvt.f32.s32 %v4767_v24  ;;  %v1095_v24 = vcvt.f32.s32 %v4777_v52  ;;  %v1112_v52 = vshll.u32 %v1111_v51, 16 }
 0x54b   : > { %1268 = vmin.xlane.f32.xlu0 %v1267_v18  ;;  %v1336_v18 = vshll.u32 %v1335_v48, 16 }
 0x54c   : > { %v4882_v46 = vpop.xlane.xlu1 %1536  ;;  %v1096_v56 = vshll.u32 %v1095_v24, 16 }
 0x54d   : > { %vm1538_vm3 = vcmp.eq.f32.partialorder %v4724_v2, %v4882_v46 }
 0x54e   : > { %v1539_v59 = vsel %vm1538_vm3, %v1534_v13, -inf  ;;  %v1351_v13 = vcvt.f32.s32 %v4748_v58 }
 0x54f   : > { %1540 = vmax.xlane.f32.xlu1 %v1539_v59  ;;  %v1367_v59 = vcvt.f32.s32 %v4750_v9 }
 0x550   : > { %v4887_v22 = vpop.xlane.xlu1 %1280  ;;  %v1352_v0 = vshll.u32 %v1351_v13, 16 }
 0x551   : > { %vm1282_vm4 = vcmp.eq.f32.partialorder %v6196_v31, %v4887_v22  ;;  %v1368_v44 = vshll.u32 %v1367_v59, 16 }
 0x552   : > { %v1283_v47 = vsel %vm1282_vm4, %v1278_v14, inf  ;;  %v1080_v14 = vshll.u32 %v1079_v10, 16 }
 0x553   : > { %1284 = vmin.xlane.f32.xlu1 %v1283_v47 }
 0x568   : > { %v1045_v35 = vpop.xlane.xlu0 %1044 }
 0x569   : > { %v1046_v3 = vcvt.f32.s32 %v1045_v35 }
 0x56b   : > { %v4893_v57 = vadd.s32 %v1048_v27, %v1046_v3  }
 0x56c   : > { %v1301_v2 = vpop.xlane.xlu1 %1300 }
 0x56d   : > { %v1302_v54 = vcvt.f32.s32 %v1301_v2 }
 0x56f   : > { %v4896_v6 = vadd.s32 %v1304_v29, %v1302_v54  ;;  %v1383_v29 = vcvt.f32.s32 %v4752_v36  ;;  %v1127_v36 = vcvt.f32.s32 %v4793_v17 }
 0x570   : > { %v1317_v26 = vpop.xlane.xlu1 %1316 }
 0x571   : > { %v4899_v43 = vadd.s32 1, %v4896_v6   ;;  %v1318_v49 = vcvt.f32.s32 %v1317_v26 }
 0x573   : > { %v4901_v28 = vadd.s32 %v1320_v23, %v1318_v49 }
 0x575   : > { %v4904_v11 = vadd.s32 1, %v4901_v28  }
 0x58c   : > { %v1061_v1 = vpop.xlane.xlu1 %1060 }
 0x58d   : > { %v1062_v37 = vcvt.f32.s32 %v1061_v1 }
 0x58f   : > { %v4909_v21 = vadd.s32 %v1064_v19, %v1062_v37   ;;  %v1384_v37 = vshll.u32 %v1383_v29, 16 }
 0x590   : > { %v1077_v53 = vpop.xlane.xlu0 %1076  ;;  %v1333_v15 = vpop.xlane.xlu1 %1332 }
 0x591   : > { %v1078_v31 = vcvt.f32.s32 %v1077_v53  ;;  %v1334_v47 = vcvt.f32.s32 %v1333_v15 }
 0x593   : > { %v4913_v4 = vadd.s32 %v1080_v14, %v1078_v31   ;;  %v4915_v33 = vadd.s32 %v1336_v18, %v1334_v47  ;;  %v1400_v18 = vshll.u32 %v1399_v30, 16  ;;  %v1431_v14 = vcvt.f32.s32 %v4799_v45 }
 0x594   : > { %v1365_v35 = vpop.xlane.xlu0 %1364  ;;  %v1349_v27 = vpop.xlane.xlu1 %1348  ;;  %v1415_v31 = vcvt.f32.s32 %v4756_v32  ;;  %v1128_v47 = vshll.u32 %v1127_v36, 16  ;;  %v1159_v45 = vcvt.f32.s32 %v4811_v5  ;;  %v1175_v32 = vcvt.f32.s32 %v4817_v20 }
 0x595   : > { %v4920_v58 = vadd.s32 1, %v4915_v33   ;;  %v1366_v34 = vcvt.f32.s32 %v1365_v35  ;;  %v1350_v9 = vcvt.f32.s32 %v1349_v27  ;;  %v1432_v30 = vshll.u32 %v1431_v14, 16 }
 0x596   : > { %v1176_v36 = vshll.u32 %v1175_v32, 16 }
 0x597   : > { %v4922_v3 = vadd.s32 %v1368_v44, %v1366_v34  ;;  %v4924_v2 = vadd.s32 %v1352_v0, %v1350_v9  ;;  %v1144_v0 = vshll.u32 %v1143_v16, 16  ;;  %v1447_v16 = vcvt.f32.s32 %v4822_v60 }
 0x598   : > { %v1109_v54 = vpop.xlane.xlu0 %1108  ;;  %v1093_v50 = vpop.xlane.xlu1 %1092 }
 0x599   : > { %6200 = vst [vmem:[#allocation74_spill] sm:$0xff] %v4924_v2  ;;  %v4929_v26 = vadd.s32 1, %v4922_v3   ;;  %v4932_v23 = vadd.s32 1, %v4924_v2   ;;  %v1110_v49 = vcvt.f32.s32 %v1109_v54  ;;  %v1094_v38 = vcvt.f32.s32 %v1093_v50 }
 0x59b   : > { %v4934_v48 = vadd.s32 %v1112_v52, %v1110_v49   ;;  %v4936_v1 = vadd.s32 %v1096_v56, %v1094_v38   ;;  %v1416_v56 = vshll.u32 %v1415_v31, 16  ;;  %v1160_v38 = vshll.u32 %v1159_v45, 16 }
 0x59c   : > { %v1397_v19 = vpop.xlane.xlu0 %1396  ;;  %v1381_v10 = vpop.xlane.xlu1 %1380  ;;  %v1448_v31 = vshll.u32 %v1447_v16, 16 }
 0x59d   : > { %v1398_v13 = vcvt.f32.s32 %v1397_v19  ;;  %v1382_v53 = vcvt.f32.s32 %v1381_v10 }
 0x59f   : > { %v4940_v15 = vadd.s32 %v1400_v18, %v1398_v13  ;;  %v4942_v59 = vadd.s32 %v1384_v37, %v1382_v53 }
 0x5a0   : > { %v1125_v24 = vpop.xlane.xlu1 %1124  ;;  %v1141_v17 = vpop.xlane.xlu0 %1140 }
 0x5a1   : > { %6201 = vst [vmem:[#allocation79_spill] sm:$0xff] %v4940_v15  ;;  %6202 = vst [vmem:[#allocation80_spill] sm:$0xff] %v4942_v59  ;;  %v4947_v41 = vadd.s32 1, %v4940_v15   ;;  %v4950_v51 = vadd.s32 1, %v4942_v59   ;;  %v1126_v35 = vcvt.f32.s32 %v1125_v24  ;;  %v1142_v27 = vcvt.f32.s32 %v1141_v17 }
 0x5a3   : > { %v4952_v44 = vadd.s32 %v1128_v47, %v1126_v35   ;;  %v4954_v34 = vadd.s32 %v1144_v0, %v1142_v27   ;;  %v1191_v47 = vcvt.f32.s32 %v4827_v8  ;;  %v1463_v35 = vcvt.f32.s32 %v4832_v25 }
 0x5a4   : > { %v1413_v9 = vpop.xlane.xlu1 %1412  ;;  %v1429_v29 = vpop.xlane.xlu0 %1428 }
 0x5a5   : > { %v1414_v52 = vcvt.f32.s32 %v1413_v9  ;;  %v1430_v54 = vcvt.f32.s32 %v1429_v29  ;;  %v1192_v17 = vshll.u32 %v1191_v47, 16  ;;  %v1464_v29 = vshll.u32 %v1463_v35, 16 }
 0x5a6   : > { %v1495_v47 = vcvt.f32.s32 %v4852_v61 }
 0x5a7   : > { %v4958_v50 = vadd.s32 %v1416_v56, %v1414_v52  ;;  %v4960_v49 = vadd.s32 %v1432_v30, %v1430_v54  ;;  %v1207_v30 = vcvt.f32.s32 %v4837_v42 }
 0x5a8   : > { %v1157_v19 = vpop.xlane.xlu1 %1156  ;;  %v1173_v10 = vpop.xlane.xlu0 %1172  ;;  %v1496_v35 = vshll.u32 %v1495_v47, 16 }
 0x5a9   : > { %6203 = vst [vmem:[#allocation85_spill] sm:$0xff] %v4958_v50  ;;  %6204 = vst [vmem:[#allocation86_spill] sm:$0xff] %v4960_v49  ;;  %v4964_v5 = vadd.s32 1, %v4958_v50   ;;  %v4967_v20 = vadd.s32 1, %v4960_v49   ;;  %v1158_v37 = vcvt.f32.s32 %v1157_v19  ;;  %v1174_v18 = vcvt.f32.s32 %v1173_v10 }
 0x5aa   : > { %v1208_v54 = vshll.u32 %v1207_v30, 16 }
 0x5ab   : > { %v4969_v13 = vadd.s32 %v1160_v38, %v1158_v37   ;;  %v4971_v53 = vadd.s32 %v1176_v36, %v1174_v18   ;;  %v1479_v38 = vcvt.f32.s32 %v4842_v40  ;;  %v1223_v37 = vcvt.f32.s32 %v4847_v7 }
 0x5ac   : > { %v1445_v14 = vpop.xlane.xlu1 %1444 }
 0x5ad   : > { %v1446_v0 = vcvt.f32.s32 %v1445_v14  ;;  %v1480_v10 = vshll.u32 %v1479_v38, 16 }
 0x5af   : > { %v4974_v60 = vadd.s32 %v1448_v31, %v1446_v0  ;;  %v1224_v31 = vshll.u32 %v1223_v37, 16 }
 0x5b0   : > { %v1189_v24 = vpop.xlane.xlu1 %1188 }
 0x5b1   : > { %6205 = vst [vmem:[#allocation89_spill] sm:$0xff] %v4974_v60  ;;  %v4978_v27 = vadd.s32 1, %v4974_v60   ;;  %v1190_v45 = vcvt.f32.s32 %v1189_v24 }
 0x5b3   : > { %v4980_v32 = vadd.s32 %v1192_v17, %v1190_v45   ;;  %v1239_v45 = vcvt.f32.s32 %v4857_v63 }
 0x5b4   : > { %v1461_v9 = vpop.xlane.xlu0 %1460 }
 0x5b5   : > { %v1462_v56 = vcvt.f32.s32 %v1461_v9  ;;  %v1240_v30 = vshll.u32 %v1239_v45, 16 }
 0x5b7   : > { %v4983_v52 = vadd.s32 %v1464_v29, %v1462_v56  ;;  %v1511_v56 = vcvt.f32.s32 %v4862_v12 }
 0x5b8   : > { %v1205_v8 = vpop.xlane.xlu0 %1204 }
 0x5b9   : > { %6206 = vst [vmem:[#allocation90_spill] sm:$0xff] %v4983_v52  ;;  %v1556_v36 = vadd.s32 1, %v4983_v52   ;;  %v1206_v25 = vcvt.f32.s32 %v1205_v8 }
 0x5bb   : > { %v4987_v16 = vadd.s32 %v1208_v54, %v1206_v25   ;;  %v1512_v25 = vshll.u32 %v1511_v56, 16 }
 0x5bc   : > { %v1477_v19 = vpop.xlane.xlu1 %1476 }
 0x5bd   : > { %v1478_v18 = vcvt.f32.s32 %v1477_v19  ;;  %v1255_v19 = vcvt.f32.s32 %v4867_v39 }
 0x5bf   : > { %v4990_v14 = vadd.s32 %v1480_v10, %v1478_v18  ;;  %v1256_v63 = vshll.u32 %v1255_v19, 16  ;;  %v1287_v19 = vcvt.f32.s32 %v4887_v22 }
 0x5c0   : > { %v1221_v42 = vpop.xlane.xlu1 %1220 }
 0x5c1   : > { %6207 = vst [vmem:[#allocation88_spill] sm:$0xff] %v4990_v14  ;;  %v1557_v0 = vadd.s32 1, %v4990_v14   ;;  %v1222_v24 = vcvt.f32.s32 %v1221_v42  ;;  %v1527_v42 = vcvt.f32.s32 %v4872_v55 }
 0x5c3   : > { %v4994_v40 = vadd.s32 %v1224_v31, %v1222_v24  }
 0x5c4   : > { %v1493_v17 = vpop.xlane.xlu0 %1492 }
 0x5c5   : > { %v1494_v9 = vcvt.f32.s32 %v1493_v17  ;;  %v1528_v17 = vshll.u32 %v1527_v42, 16 }
 0x5c7   : > { %v4997_v29 = vadd.s32 %v1496_v35, %v1494_v9  ;;  %v1271_v35 = vcvt.f32.s32 %v4877_v62  ;;  %v1288_v62 = vshll.u32 %v1287_v19, 16 }
 0x5c8   : > { %v1237_v7 = vpop.xlane.xlu0 %1236 }
 0x5c9   : > { %6208 = vst [vmem:[#allocation91_spill] sm:$0xff] %v4997_v29  ;;  %v1558_v8 = vadd.s32 1, %v4997_v29   ;;  %v1238_v54 = vcvt.f32.s32 %v1237_v7  ;;  %v1272_v39 = vshll.u32 %v1271_v35, 16 }
 0x5cb   : > { %v1241_v61 = vadd.s32 %v1240_v30, %v1238_v54   ;;  %v1543_v30 = vcvt.f32.s32 %v4882_v46 }
 0x5cc   : > { %v1509_v38 = vpop.xlane.xlu1 %1508 }
 0x5cd   : > { %v1510_v10 = vcvt.f32.s32 %v1509_v38 }
 0x5cf   : > { %v5002_v37 = vadd.s32 %v1512_v25, %v1510_v10  ;;  %v1544_v25 = vshll.u32 %v1543_v30, 16 }
 0x5d0   : > { %v1253_v18 = vpop.xlane.xlu1 %1252 }
 0x5d1   : > { %6209 = vst [vmem:[#allocation92_spill] sm:$0xff] %v5002_v37  ;;  %v1559_v31 = vadd.s32 1, %v5002_v37   ;;  %v1254_v47 = vcvt.f32.s32 %v1253_v18 }
 0x5d3   : > { %v1257_v24 = vadd.s32 %v1256_v63, %v1254_v47  }
 0x5d4   : > { %v1525_v12 = vpop.xlane.xlu0 %1524 }
 0x5d5   : > { %v1526_v45 = vcvt.f32.s32 %v1525_v12 }
 0x5d7   : > { %v5007_v9 = vadd.s32 %v1528_v17, %v1526_v45 }
 0x5d8   : > { %v1269_v7 = vpop.xlane.xlu0 %1268 }
 0x5d9   : > { %6210 = vst [vmem:[#allocation93_spill] sm:$0xff] %v5007_v9  ;;  %v1560_v56 = vadd.s32 1, %v5007_v9   ;;  %v1270_v54 = vcvt.f32.s32 %v1269_v7 }
 0x5db   : > { %v1273_v38 = vadd.s32 %v1272_v39, %v1270_v54  }
 0x5dc   : > { %v1541_v55 = vpop.xlane.xlu1 %1540 }
 0x5dd   : > { %v1542_v10 = vcvt.f32.s32 %v1541_v55 }
 0x5df   : > { %v5012_v18 = vadd.s32 %v1544_v25, %v1542_v10 }
 0x5e0   : > { %v1285_v63 = vpop.xlane.xlu1 %1284 }
 0x5e1   : > { %6211 = vst [vmem:[#allocation94_spill] sm:$0xff] %v5012_v18  ;;  %v1561_v42 = vadd.s32 1, %v5012_v18   ;;  %v1286_v47 = vcvt.f32.s32 %v1285_v63 }
 0x5e3   : > { %v1289_v12 = vadd.s32 %v1288_v62, %v1286_v47  }
 0x5e4 LB: >> { %v3950_v46 = vmov 0   ;;  %v1600_v22 = vand.u32 %v3874_v43, %v3938_v57  ;;  %v1616_v17 = vxor.u32 %v3874_v43, %v3938_v57  ;;  %v1601_v35 = vand.u32 %v3870_v11, %v3934_v21  ;;  %v6216_v49 = vld [vmem:[#allocation53_spill] sm:$0xff]  ;;  %v6217_v59 = vld [vmem:[#allocation54_spill] sm:$0xff]  ;;  %s1567_s7 = sadd.s32 1, %s3942_s27   ;;  %s3942_s27 = sphi %s5101_s27, %s6274_s27   ;;  %v3938_v57 = vphi %v4893_v57, %v6273_v57   ;;  %v3934_v21 = vphi %v4909_v21, %v6272_v21   ;;  %v3930_v4 = vphi %v4913_v4, %v6271_v4   ;;  %v3926_v1 = vphi %v4936_v1, %v6270_v1   ;;  %v3922_v48 = vphi %v4934_v48, %v6269_v48   ;;  %v3918_v44 = vphi %v4952_v44, %v6268_v44   ;;  %v3914_v34 = vphi %v4954_v34, %v6267_v34   ;;  %v3910_v13 = vphi %v4969_v13, %v6266_v13   ;;  %v3906_v53 = vphi %v4971_v53, %v6265_v53   ;;  %v3902_v32 = vphi %v4980_v32, %v6264_v32   ;;  %v3898_v16 = vphi %v4987_v16, %v6263_v16   ;;  %v3894_v40 = vphi %v4994_v40, %v6262_v40   ;;  %v3890_v61 = vphi %v1241_v61, %v6261_v61   ;;  %v3886_v24 = vphi %v1257_v24, %v6260_v24   ;;  %v3882_v38 = vphi %v1273_v38, %v6259_v38   ;;  %v3878_v12 = vphi %v1289_v12, %v6258_v12   ;;  %v3874_v43 = vphi %v4899_v43, %v5384_v43   ;;  %v3870_v11 = vphi %v4904_v11, %v5392_v11   ;;  %v3866_v58 = vphi %v4920_v58, %v5408_v58   ;;  %v3862_v23 = vphi %v4932_v23, %v5424_v23   ;;  %v3858_v26 = vphi %v4929_v26, %v1957_v26   ;;  %v3854_v51 = vphi %v4950_v51, %v1958_v51   ;;  %v3850_v41 = vphi %v4947_v41, %v1959_v41   ;;  %v3846_v5 = vphi %v4964_v5, %v1960_v5   ;;  %v3842_v20 = vphi %v4967_v20, %v5400_v20   ;;  %v3838_v27 = vphi %v4978_v27, %v5416_v27   ;;  %v3834_v36 = vphi %v1556_v36, %v1963_v36   ;;  %v3830_v0 = vphi %v1557_v0, %v1964_v0   ;;  %v3826_v8 = vphi %v1558_v8, %v1965_v8   ;;  %v3822_v31 = vphi %v1559_v31, %v1966_v31   ;;  %v3818_v56 = vphi %v1560_v56, %v1967_v56   ;;  %v3814_v42 = vphi %v1561_v42, %v1968_v42  }
 0x5e5   : >> { %3459 = vset.pattern.permute.xlu1 %v3950_v46  ;;  %3458 = vset.pattern.permute.xlu0 %v3950_v46  ;;  %v1617_v45 = vxor.u32 %v3870_v11, %v3934_v21  ;;  %v1608_v30 = vand.u32 %v3842_v20, %v3906_v53  ;;  %v1624_v54 = vxor.u32 %v3842_v20, %v3906_v53  ;;  %v3951_v15 = vmov 1.0|1.0   ;;  %p5483_p13 = scmp.ge.s32.totalorder %s1567_s7, 32   ;;  %s6274_s27 = smov %s1567_s7 }
 0x5e6   : >> { %v1632_v7 = vshra.s32 %v1616_v17, 1  ;;  %v1609_v10 = vand.u32 %v3838_v27, %v3902_v32  ;;  %v1625_v63 = vxor.u32 %v3838_v27, %v3902_v32  ;;  %v1602_v46 = vand.u32 %v3866_v58, %v3930_v4  ;;  %3028 = vmatprep.subr.bf16.mxu0 %v3951_v15  ;;  %3078 = vmatprep.subr.bf16.mxu1 %v3951_v15  ;;  %s2594_s18 = sld [smem:[#allocation6]] (%p5483_p13)  ;;  %s2855_s21 = sshll.u32 (%p5483_p13), %s3798_s11, 1 }
 0x5e7   : >> { %v1633_v39 = vshra.s32 %v1617_v45, 1  ;;  %v1640_v19 = vshra.s32 %v1624_v54, 1  ;;  %v1610_v45 = vand.u32 %v3834_v36, %v3898_v16  ;;  %v1603_v54 = vand.u32 %v3862_v23, %v3926_v1  ;;  %3029 = vmatpush3.bf16.msra.mxu0 %v3951_v15  ;;  %3086 = vmatpush3.bf16.msra.mxu1 %v3951_v15  ;;  %s2611_s22 = sadd.s32 (%p5483_p13), %s3794_s10, %s2855_s21  ;;  %s6352_s28 = scalar_lea.vmem (%p5483_p13), [#allocation7], %s4076_s26 }
 0x5e8   : >> { %v5214_v55 = vadd.s32 %v1632_v7, %v1600_v22  ;;  %v1641_v47 = vshra.s32 %v1625_v63, 1  ;;  %v1618_v22 = vxor.u32 %v3866_v58, %v3930_v4  ;;  %v1626_v7 = vxor.u32 %v3834_v36, %v3898_v16  ;;  %3030 = vmatprep.subr.bf16.mxu0 %v3951_v15  ;;  %3079 = vmatprep.subr.bf16.mxu1 %v3951_v15  ;;  %s2856_s23 = sshll.u32 (%p5483_p13), %s2611_s22, 6  ;;  %s2615_s13 = sshll.u32 (%p5483_p13), %s6352_s28, 4  ;;  %s5925_s13 = int_to_ptr.vmem [resolvable:$true] %s2615_s13 }
 0x5e9   : >> { %v5216_v25 = vadd.s32 %v1633_v39, %v1601_v35  ;;  %v5224_v62 = vadd.s32 %v1640_v19, %v1608_v30  ;;  %v1619_v19 = vxor.u32 %v3862_v23, %v3926_v1  ;;  %v1612_v18 = vand.u32 %v3826_v8, %v3890_v61  ;;  %s5923_s25 = scalar_lea.hbm (%p5483_p13), %s5988_s8, %s2856_s23  ;;  %s6354_s27 = smov (%p5483_p13), %s6352_s28 }
 0x5ea   : >> { %1665 = vperm.xlu0 %3458, %v5214_v55   ;;  %v5230_v17 = vadd.s32 %v1641_v47, %v1609_v10  ;;  %v1634_v35 = vshra.s32 %v1618_v22, 1  ;;  %v1642_v30 = vshra.s32 %v1626_v7, 1  ;;  %v1611_v47 = vand.u32 %v3830_v0, %v3894_v40  ;;  %s6355_s10 = sand.u32 (%p5483_p13), 1, %s3786_s30   ;;  %s3582_s7 = scalar_lea.vmem (%p5483_p13), %s5925_s13, 64 }
 0x5eb   : >> { %1668 = vperm.xlu1 %3459, %v5216_v25   ;;  %v1635_v63 = vshra.s32 %v1619_v19, 1  ;;  %v1627_v22 = vxor.u32 %v3830_v0, %v3894_v40  ;;  %v1604_v7 = vand.u32 %v3858_v26, %v3922_v48  ;;  %v1628_v37 = vxor.u32 %v3826_v8, %v3890_v61  ;;  %3031 = vmatpush3.bf16.msra.mxu0 %v3951_v15  ;;  %s2600_s11 = scalar_lea.sflag (%p5483_p13), [#allocation8], %s6355_s10  ;;  %p3583_p0 = scmp.ne.s32.totalorder (%p5483_p13), %s5925_s13, %s3582_s7 }
 0x5ec   : >> { %v5238_v39 = vadd.s32 %v1634_v35, %v1602_v46  ;;  %v5244_v10 = vadd.s32 %v1642_v30, %v1610_v45  ;;  %v1620_v45 = vxor.u32 %v3858_v26, %v3922_v48  ;;  %v1613_v9 = vand.u32 %v3822_v31, %v3886_v24  ;;  %3032 = vmatprep.subr.bf16.mxu0 %v3951_v15  ;;  %s3953_s15 = smov (%p5483_p13), [#allocation7]  }
 0x5ed   : >> { %v5252_v46 = vadd.s32 %v1635_v63, %v1603_v54  ;;  %v1643_v35 = vshra.s32 %v1627_v22, 1  ;;  %v1644_v63 = vshra.s32 %v1628_v37, 1  ;;  %v1605_v22 = vand.u32 %v3854_v51, %v3918_v44  ;;  %3087 = vmatpush3.bf16.msra.mxu1 %v3951_v15  ;;  %p3584_p1 = pnand (%p5483_p13), %p3583_p0, %p4053_p3 }
 0x5ee   : >> { %1689 = vperm.xlu0 %3458, %v5224_v62   ;;  %v1636_v19 = vshra.s32 %v1620_v45, 1  ;;  %v1629_v14 = vxor.u32 %v3822_v31, %v3886_v24  ;;  %v1614_v29 = vand.u32 %v3818_v56, %v3882_v38  ;;  %v1630_v52 = vxor.u32 %v3818_v56, %v3882_v38  ;;  %3080 = vmatprep.subr.bf16.mxu1 %v3951_v15 }
 0x5ef   : >> { %1692 = vperm.xlu1 %3459, %v5230_v17   ;;  %v5258_v30 = vadd.s32 %v1643_v35, %v1611_v47  ;;  %v1621_v47 = vxor.u32 %v3854_v51, %v3918_v44  ;;  %v5272_v35 = vadd.s32 %v1644_v63, %v1612_v18  ;;  %v1622_v18 = vxor.u32 %v3850_v41, %v3914_v34  ;;  %p3585_p2 = pneg (%p5483_p13), %p3584_p1 }
 0x5f0   : >> { %v5266_v54 = vadd.s32 %v1636_v19, %v1604_v7  ;;  %v1645_v7 = vshra.s32 %v1629_v14, 1  ;;  %v1606_v19 = vand.u32 %v3850_v41, %v3914_v34  ;;  %v1615_v50 = vand.u32 %v3814_v42, %v3878_v12  ;;  %3033 = vmatpush3.bf16.msra.mxu0 %v3951_v15 }
 0x5f1   : >> { %v1637_v45 = vshra.s32 %v1621_v47, 1  ;;  %v1638_v47 = vshra.s32 %v1622_v18, 1  ;;  %v1631_v60 = vxor.u32 %v3814_v42, %v3878_v12  ;;  %3034 = vmatprep.subr.bf16.mxu0 %v3951_v15  ;;  %3088 = vmatpush3.bf16.msra.mxu1 %v3951_v15 }
 0x5f2   : >> { %1671 = vperm.xlu0 %3458, %v5238_v39   ;;  %v5286_v63 = vadd.s32 %v1645_v7, %v1613_v9  ;;  %v1623_v9 = vxor.u32 %v3846_v5, %v3910_v13  ;;  %3081 = vmatprep.subr.bf16.mxu1 %v3951_v15 }
 0x5f3   : >> { %1695 = vperm.xlu1 %3459, %v5244_v10   ;;  %v5280_v37 = vadd.s32 %v1637_v45, %v1605_v22  ;;  %v5294_v14 = vadd.s32 %v1638_v47, %v1606_v19  ;;  %v1646_v22 = vshra.s32 %v1630_v52, 1  ;;  %v1607_v45 = vand.u32 %v3846_v5, %v3910_v13 }
 0x5f4   : >> { %v1639_v18 = vshra.s32 %v1623_v9, 1  ;;  %v1647_v19 = vshra.s32 %v1631_v60, 1  ;;  %3035 = vmatpush3.bf16.msra.mxu0 %v3951_v15  ;;  %v6212_v60 = vld [vmem:[#allocation21_spill] sm:$0xff]  ;;  %v3952_v9 = vmov 1.0  }
 0x5f5   : >> { %v5300_v7 = vadd.s32 %v1646_v22, %v1614_v29  ;;  %3036 = vmatprep.subr.bf16.mxu0 %v3951_v15  ;;  %3089 = vmatpush3.bf16.msra.mxu1 %v3951_v15  ;;  %v6213_v22 = vld [vmem:[#allocation22_spill] sm:$0xff] }
 0x5f6   : >> { %1674 = vperm.xlu0 %3458, %v5252_v46   ;;  %v5308_v52 = vadd.s32 %v1639_v18, %v1607_v45  ;;  %v5310_v29 = vadd.s32 %v1647_v19, %v1615_v50  ;;  %3082 = vmatprep.subr.bf16.mxu1 %v3951_v15  ;;  %v6214_v45 = vld [vmem:[#allocation26_spill] sm:$0xff]  ;;  %v6215_v18 = vld [vmem:[#allocation25_spill] sm:$0xff] }
 0x5f7   : >> { %1698 = vperm.xlu1 %3459, %v5258_v30  }
 0x5f8   : >> { %3037 = vmatpush3.bf16.msra.mxu0 %v3951_v15 }
 0x5f9   : >> { %3038 = vmatprep.subr.bf16.mxu0 %v3951_v15  ;;  %3090 = vmatpush3.bf16.msra.mxu1 %v3951_v15 }
 0x5fa   : >> { %1677 = vperm.xlu0 %3458, %v5266_v54   ;;  %3083 = vmatprep.subr.bf16.mxu1 %v3951_v15 }
 0x5fb   : >> { %1701 = vperm.xlu1 %3459, %v5272_v35  }
 0x5fc   : >> { %3039 = vmatpush3.bf16.msra.mxu0 %v3951_v15 }
 0x5fd   : >> { %3040 = vmatprep.subr.bf16.mxu0 %v3951_v15  ;;  %3091 = vmatpush3.bf16.msra.mxu1 %v3951_v15 }
 0x5fe   : >> { %1680 = vperm.xlu0 %3458, %v5280_v37   ;;  %3084 = vmatprep.subr.bf16.mxu1 %v3951_v15 }
 0x5ff   : >> { %1704 = vperm.xlu1 %3459, %v5286_v63  }
 0x600   : >> { %3041 = vmatpush3.bf16.msra.mxu0 %v3951_v15 }
 0x601   : >> { %3042 = vmatprep.subr.bf16.mxu0 %v3951_v15  ;;  %3092 = vmatpush3.bf16.msra.mxu1 %v3951_v15 }
 0x602   : >> { %1683 = vperm.xlu0 %3458, %v5294_v14   ;;  %3085 = vmatprep.subr.bf16.mxu1 %v3951_v15 }
 0x603   : >> { %1707 = vperm.xlu1 %3459, %v5300_v7  }
 0x604   : >> { %3043 = vmatpush3.bf16.msra.mxu0 %v3951_v15 }
 0x605   : >> { %3093 = vmatpush3.bf16.msra.mxu1 %v3951_v15 }
 0x606   : >> { %1686 = vperm.xlu0 %3458, %v5308_v52  }
 0x607   : >> { %1710 = vperm.xlu1 %3459, %v5310_v29  }
 0x669   : >> { %v1666_v50 = vpop.permute.xlu0 %1665 }
 0x66a   : >> { %vm1712_vm5 = vcmp.ge.s32.totalorder %v6212_v60, %v1666_v50  ;;  %v1669_v47 = vpop.permute.xlu1 %1668  ;;  %vm1713_vm6 = vcmp.ge.s32.totalorder %v6213_v22, %v1666_v50  ;;  %v6218_v50 = vld [vmem:[#allocation58_spill] sm:$0xff] }
 0x66b   : >> { %vm1715_vm7 = vcmp.ge.s32.totalorder %v6214_v45, %v1669_v47  ;;  %2822 = vmatprep.mubr.msk.f32.mxu0 %vm1713_vm6, %v3952_v9  ;;  %vm1714_vm8 = vcmp.ge.s32.totalorder %v6215_v18, %v1669_v47  ;;  %v6219_v47 = vld [vmem:[#allocation29_spill] sm:$0xff]  ;;  %v6220_v22 = vld [vmem:[#allocation30_spill] sm:$0xff] }
 0x66c   : >> { %2823 = vmatmul.mubr.msk.f32.vlgmr.msra.gmra.mrb[0].mxu0 %vm1712_vm5, %v3952_v9 }
 0x66d   : >> { %v1690_v19 = vpop.permute.xlu0 %1689  ;;  %2824 = vmatprep.mubr.msk.f32.mxu0 %vm1715_vm7, %v3952_v9 }
 0x66e   : >> { %vm1728_vm9 = vcmp.ge.s32.totalorder %v6216_v49, %v1690_v19  ;;  %v1693_v15 = vpop.permute.xlu1 %1692  ;;  %vm1729_vm10 = vcmp.ge.s32.totalorder %v6217_v59, %v1690_v19  ;;  %v6221_v49 = vld [vmem:[#allocation57_spill] sm:$0xff]  ;;  %v6222_v59 = vld [vmem:[#allocation62_spill] sm:$0xff] }
 0x66f   : >> { %2838 = vmatprep.mubr.msk.f32.mxu1 %vm1729_vm10, %v3952_v9  ;;  %vm1731_vm11 = vcmp.ge.s32.totalorder %v6218_v50, %v1693_v15  ;;  %vm1730_vm14 = vcmp.ge.s32.totalorder %v6221_v49, %v1693_v15  ;;  %v6223_v19 = vld [vmem:[#allocation33_spill] sm:$0xff]  ;;  %v6224_v50 = vld [vmem:[#allocation34_spill] sm:$0xff] }
 0x670   : >> { %2825 = vmatmul.mubr.msk.f32.gmra.mrb[2].mxu0 %vm1714_vm8, %v3952_v9  ;;  %2839 = vmatmul.mubr.msk.f32.vlgmr.msra.gmra.mrb[0].mxu1 %vm1728_vm9, %v3952_v9  ;;  %v6226_v15 = vld [vmem:[#allocation66_spill] sm:$0xff]  ;;  %v6227_v49 = vld [vmem:[#allocation37_spill] sm:$0xff] }
 0x671   : >> { %v1672_v60 = vpop.permute.xlu0 %1671  ;;  %2840 = vmatprep.mubr.msk.f32.mxu1 %vm1731_vm11, %v3952_v9 }
 0x672   : >> { %vm1716_vm12 = vcmp.ge.s32.totalorder %v6219_v47, %v1672_v60  ;;  %vm1717_vm13 = vcmp.ge.s32.totalorder %v6220_v22, %v1672_v60  ;;  %v1696_v45 = vpop.permute.xlu1 %1695  ;;  %v6225_v60 = vld [vmem:[#allocation61_spill] sm:$0xff] }
 0x673   : >> { %2826 = vmatprep.mubr.msk.f32.mxu0 %vm1717_vm13, %v3952_v9  ;;  %vm1733_vm15 = vcmp.ge.s32.totalorder %v6222_v59, %v1696_v45  ;;  %vm1732_vm2 = vcmp.ge.s32.totalorder %v6225_v60, %v1696_v45  ;;  %v6228_v59 = vld [vmem:[#allocation38_spill] sm:$0xff]  ;;  %v6231_v60 = vld [vmem:[#allocation41_spill] sm:$0xff] }
 0x674   : >> { %2827 = vmatmul.mubr.msk.f32.gmra.mrb[4].mxu0 %vm1716_vm12, %v3952_v9  ;;  %2841 = vmatmul.mubr.msk.f32.gmra.mrb[2].mxu1 %vm1730_vm14, %v3952_v9  ;;  %v6230_v45 = vld [vmem:[#allocation70_spill] sm:$0xff] }
 0x675   : >> { %v1675_v18 = vpop.permute.xlu0 %1674  ;;  %2842 = vmatprep.mubr.msk.f32.mxu1 %vm1733_vm15, %v3952_v9 }
 0x676   : >> { %vm1718_vm0 = vcmp.ge.s32.totalorder %v6223_v19, %v1675_v18  ;;  %vm1719_vm1 = vcmp.ge.s32.totalorder %v6224_v50, %v1675_v18  ;;  %v1699_v47 = vpop.permute.xlu1 %1698  ;;  %v6229_v18 = vld [vmem:[#allocation65_spill] sm:$0xff] }
 0x677   : >> { %2828 = vmatprep.mubr.msk.f32.mxu0 %vm1719_vm1, %v3952_v9  ;;  %vm1735_vm3 = vcmp.ge.s32.totalorder %v6226_v15, %v1699_v47  ;;  %vm1734_vm6 = vcmp.ge.s32.totalorder %v6229_v18, %v1699_v47  ;;  %v6232_v15 = vld [vmem:[#allocation42_spill] sm:$0xff]  ;;  %v6234_v47 = vld [vmem:[#allocation75_spill] sm:$0xff]  ;;  %v6235_v18 = vld [vmem:[#allocation45_spill] sm:$0xff] }
 0x678   : >> { %2829 = vmatmul.mubr.msk.f32.gmra.mrb[6].mxu0 %vm1718_vm0, %v3952_v9  ;;  %2843 = vmatmul.mubr.msk.f32.gmra.mrb[4].mxu1 %vm1732_vm2, %v3952_v9 }
 0x679   : >> { %v1678_v22 = vpop.permute.xlu0 %1677  ;;  %2844 = vmatprep.mubr.msk.f32.mxu1 %vm1735_vm3, %v3952_v9 }
 0x67a   : >> { %vm1720_vm4 = vcmp.ge.s32.totalorder %v6227_v49, %v1678_v22  ;;  %vm1721_vm5 = vcmp.ge.s32.totalorder %v6228_v59, %v1678_v22  ;;  %v1702_v19 = vpop.permute.xlu1 %1701  ;;  %v6233_v22 = vld [vmem:[#allocation69_spill] sm:$0xff] }
 0x67b   : >> { %2830 = vmatprep.mubr.msk.f32.mxu0 %vm1721_vm5, %v3952_v9  ;;  %vm1737_vm7 = vcmp.ge.s32.totalorder %v6230_v45, %v1702_v19  ;;  %vm1736_vm10 = vcmp.ge.s32.totalorder %v6233_v22, %v1702_v19  ;;  %v6236_v45 = vld [vmem:[#allocation46_spill] sm:$0xff]  ;;  %v6238_v19 = vld [vmem:[#allocation81_spill] sm:$0xff] }
 0x67c   : >> { %2831 = vmatmul.mubr.msk.f32.gmra.mrb[8].mxu0 %vm1720_vm4, %v3952_v9  ;;  %2845 = vmatmul.mubr.msk.f32.gmra.mrb[6].mxu1 %vm1734_vm6, %v3952_v9  ;;  %v6239_v22 = vld [vmem:[#allocation49_spill] sm:$0xff] }
 0x67d   : >> { %v1681_v50 = vpop.permute.xlu0 %1680  ;;  %2846 = vmatprep.mubr.msk.f32.mxu1 %vm1737_vm7, %v3952_v9 }
 0x67e   : >> { %vm1722_vm8 = vcmp.ge.s32.totalorder %v6231_v60, %v1681_v50  ;;  %vm1723_vm9 = vcmp.ge.s32.totalorder %v6232_v15, %v1681_v50  ;;  %v1705_v49 = vpop.permute.xlu1 %1704  ;;  %v6237_v50 = vld [vmem:[#allocation73_spill] sm:$0xff] }
 0x67f   : >> { %2832 = vmatprep.mubr.msk.f32.mxu0 %vm1723_vm9, %v3952_v9  ;;  %vm1739_vm11 = vcmp.ge.s32.totalorder %v6234_v47, %v1705_v49  ;;  %vm1738_vm14 = vcmp.ge.s32.totalorder %v6237_v50, %v1705_v49  ;;  %v6240_v47 = vld [vmem:[#allocation50_spill] sm:$0xff]  ;;  %v6242_v49 = vld [vmem:[#allocation87_spill] sm:$0xff] }
 0x680   : >> { %2833 = vmatmul.mubr.msk.f32.gmra.mrb[10].mxu0 %vm1722_vm8, %v3952_v9  ;;  %2847 = vmatmul.mubr.msk.f32.gmra.mrb[8].mxu1 %vm1736_vm10, %v3952_v9 }
 0x681   : >> { %v1684_v59 = vpop.permute.xlu0 %1683  ;;  %2848 = vmatprep.mubr.msk.f32.mxu1 %vm1739_vm11, %v3952_v9 }
 0x682   : >> { %vm1724_vm12 = vcmp.ge.s32.totalorder %v6235_v18, %v1684_v59  ;;  %vm1725_vm13 = vcmp.ge.s32.totalorder %v6236_v45, %v1684_v59  ;;  %v1708_v60 = vpop.permute.xlu1 %1707  ;;  %v6241_v59 = vld [vmem:[#allocation78_spill] sm:$0xff]  ;;  %v6243_v45 = vld [vmem:[#allocation84_spill] sm:$0xff] }
 0x683   : >> { %2834 = vmatprep.mubr.msk.f32.mxu0 %vm1725_vm13, %v3952_v9  ;;  %vm1741_vm15 = vcmp.ge.s32.totalorder %v6238_v19, %v1708_v60  ;;  %vm1740_vm2 = vcmp.ge.s32.totalorder %v6241_v59, %v1708_v60 }
 0x684   : >> { %2835 = vmatmul.mubr.msk.f32.gmra.mrb[12].mxu0 %vm1724_vm12, %v3952_v9  ;;  %2849 = vmatmul.mubr.msk.f32.gmra.mrb[10].mxu1 %vm1738_vm14, %v3952_v9 }
 0x685   : >> { %v1687_v15 = vpop.permute.xlu0 %1686  ;;  %2850 = vmatprep.mubr.msk.f32.mxu1 %vm1741_vm15, %v3952_v9 }
 0x686   : >> { %vm1726_vm0 = vcmp.ge.s32.totalorder %v6239_v22, %v1687_v15  ;;  %vm1727_vm1 = vcmp.ge.s32.totalorder %v6240_v47, %v1687_v15  ;;  %v1711_v18 = vpop.permute.xlu1 %1710 }
 0x687   : >> { %2836 = vmatprep.mubr.msk.f32.mxu0 %vm1727_vm1, %v3952_v9  ;;  %vm1743_vm3 = vcmp.ge.s32.totalorder %v6242_v49, %v1711_v18  ;;  %vm1742_vm4 = vcmp.ge.s32.totalorder %v6243_v45, %v1711_v18 }
 0x688   : >> { %2837 = vmatmul.mubr.msk.f32.gmra.mrb[14].mxu0 %vm1726_vm0, %v3952_v9  ;;  %2851 = vmatmul.mubr.msk.f32.gmra.mrb[12].mxu1 %vm1740_vm2, %v3952_v9 }
 0x689   : >> { %2852 = vmatprep.mubr.msk.f32.mxu1 %vm1743_vm3, %v3952_v9 }
 0x68c   : >> { %2853 = vmatmul.mubr.msk.f32.gmra.mrb[14].mxu1 %vm1742_vm4, %v3952_v9 }
 0x73f   : >> { %v2895_v50 = vpop.f32.mrb[0].mxu0 }
 0x740   : >> { %v2896_v19 = vpop.f32.mrb[1].mxu0 }
 0x741   : >> { %v2897_v15 = vadd.f32 %v2896_v19, %v2895_v50 }
 0x743   : >> { %vm1921_vm5 = vcmp.ge.f32.partialorder %v2897_v15, 25.0  ;;  %v2898_v22 = vpop.f32.mrb[2].mxu0  ;;  %v2919_v60 = vpop.f32.mrb[0].mxu1 }
 0x744   : >> { %v5380_v57 = vsel %vm1921_vm5, %v5214_v55, %v3938_v57   ;;  %v5384_v43 = vsel %vm1921_vm5, %v3874_v43, %v5214_v55   ;;  %v2899_v59 = vpop.f32.mrb[3].mxu0  ;;  %v2920_v49 = vpop.f32.mrb[1].mxu1  ;;  %vm1969_vm5 = vcmp.ge.s32.totalorder (%p5483_p13), %v4896_v6, 0 }
 0x745   : >> { %v6244_v47 = vmov %v5380_v57  ;;  %v2900_v2 = vadd.f32 %v2899_v59, %v2898_v22  ;;  %v2921_v18 = vadd.f32 %v2920_v49, %v2919_v60  ;;  %v2401_v43 = vld [vmem:[#allocation4 + $0x80] sm:$0xff] (%p5483_p13) }
 0x747   : >> { %vm1922_vm6 = vcmp.ge.f32.partialorder %v2900_v2, 25.0  ;;  %vm1929_vm7 = vcmp.ge.f32.partialorder %v2921_v18, 25.0  ;;  %v2901_v9 = vpop.f32.mrb[4].mxu0  ;;  %v2922_v45 = vpop.f32.mrb[2].mxu1 }
 0x748   : >> { %v5388_v21 = vsel %vm1922_vm6, %v5216_v25, %v3934_v21   ;;  %v5392_v11 = vsel %vm1922_vm6, %v3870_v11, %v5216_v25   ;;  %v5396_v53 = vsel %vm1929_vm7, %v5224_v62, %v3906_v53   ;;  %v5400_v20 = vsel %vm1929_vm7, %v3842_v20, %v5224_v62   ;;  %v2902_v57 = vpop.f32.mrb[5].mxu0  ;;  %v2923_v2 = vpop.f32.mrb[3].mxu1 }
 0x749   : >> { %v6245_v50 = vmov %v5388_v21  ;;  %v6246_v55 = vmov %v5396_v53  ;;  %v2903_v19 = vadd.f32 %v2902_v57, %v2901_v9  ;;  %v2924_v15 = vadd.f32 %v2923_v2, %v2922_v45  ;;  %v2402_v11 = vld [vmem:[#allocation4 + $0x88] sm:$0xff] (%p5483_p13) }
 0x74a   : > { %vm1970_vm6 = vcmp.ge.s32.totalorder (%p5483_p13), %v4901_v28, 0  ;;  %vm1971_vm7 = vcmp.ge.s32.totalorder (%p5483_p13), %v4915_v33, 0 }
 0x74b   : >> { %vm1923_vm8 = vcmp.ge.f32.partialorder %v2903_v19, 25.0  ;;  %vm1930_vm9 = vcmp.ge.f32.partialorder %v2924_v15, 25.0  ;;  %v2904_v22 = vpop.f32.mrb[6].mxu0  ;;  %v2925_v21 = vpop.f32.mrb[4].mxu1 }
 0x74c   : >> { %v5404_v4 = vsel %vm1923_vm8, %v5238_v39, %v3930_v4   ;;  %v5408_v58 = vsel %vm1923_vm8, %v3866_v58, %v5238_v39   ;;  %v5412_v32 = vsel %vm1930_vm9, %v5230_v17, %v3902_v32   ;;  %v5416_v27 = vsel %vm1930_vm9, %v3838_v27, %v5230_v17   ;;  %v2905_v53 = vpop.f32.mrb[7].mxu0  ;;  %v2926_v60 = vpop.f32.mrb[5].mxu1 }
 0x74d   : >> { %v6247_v25 = vmov %v5404_v4  ;;  %v6248_v62 = vmov %v5412_v32  ;;  %v2906_v59 = vadd.f32 %v2905_v53, %v2904_v22  ;;  %v2927_v49 = vadd.f32 %v2926_v60, %v2925_v21  ;;  %v2385_v58 = vld [vmem:[#allocation4] sm:$0xff] (%p5483_p13)  ;;  %v2388_v27 = vld [vmem:[#allocation4 + $0x18] sm:$0xff] (%p5483_p13) }
 0x74e   : > { %vm1973_vm8 = vcmp.ge.s32.totalorder (%p5483_p13), %v4922_v3, 0 }
 0x74f   : >> { %vm1924_vm10 = vcmp.ge.f32.partialorder %v2906_v59, 25.0  ;;  %vm1931_vm11 = vcmp.ge.f32.partialorder %v2927_v49, 25.0  ;;  %v2907_v18 = vpop.f32.mrb[8].mxu0  ;;  %v2928_v4 = vpop.f32.mrb[6].mxu1 }
 0x750   : >> { %v5420_v1 = vsel %vm1924_vm10, %v5252_v46, %v3926_v1   ;;  %v5424_v23 = vsel %vm1924_vm10, %v3862_v23, %v5252_v46   ;;  %v5428_v16 = vsel %vm1931_vm11, %v5244_v10, %v3898_v16   ;;  %v1963_v36 = vsel %vm1931_vm11, %v3834_v36, %v5244_v10   ;;  %v2908_v32 = vpop.f32.mrb[9].mxu0  ;;  %v2929_v9 = vpop.f32.mrb[7].mxu1 }
 0x751   : >> { %v6249_v39 = vmov %v5420_v1  ;;  %v6250_v17 = vmov %v5428_v16  ;;  %v2909_v45 = vadd.f32 %v2908_v32, %v2907_v18  ;;  %v2930_v57 = vadd.f32 %v2929_v9, %v2928_v4  ;;  %v2386_v23 = vld [vmem:[#allocation4 + $0x8] sm:$0xff] (%p5483_p13)  ;;  %v2405_v36 = vld [vmem:[#allocation4 + $0xa0] sm:$0xff] (%p5483_p13) }
 0x753   : >> { %vm1925_vm12 = vcmp.ge.f32.partialorder %v2909_v45, 25.0  ;;  %vm1932_vm13 = vcmp.ge.f32.partialorder %v2930_v57, 25.0  ;;  %v2910_v2 = vpop.f32.mrb[10].mxu0  ;;  %v2931_v19 = vpop.f32.mrb[8].mxu1  ;;  %v6273_v57 = vmov %v6244_v47 }
 0x754   : >> { %v5434_v48 = vsel %vm1925_vm12, %v5266_v54, %v3922_v48   ;;  %v1957_v26 = vsel %vm1925_vm12, %v3858_v26, %v5266_v54   ;;  %v5440_v40 = vsel %vm1932_vm13, %v5258_v30, %v3894_v40   ;;  %v1964_v0 = vsel %vm1932_vm13, %v3830_v0, %v5258_v30   ;;  %v2911_v1 = vpop.f32.mrb[11].mxu0  ;;  %v2932_v16 = vpop.f32.mrb[9].mxu1  ;;  %v6278_v57 = vld [vmem:[#allocation20_spill] sm:$0xff] (%p5483_p13) }
 0x755   : >> { %v6251_v46 = vmov %v5434_v48  ;;  %v6252_v15 = vmov %v5440_v40  ;;  %v2912_v10 = vadd.f32 %v2911_v1, %v2910_v2  ;;  %v2933_v22 = vadd.f32 %v2932_v16, %v2931_v19  ;;  %v2406_v0 = vld [vmem:[#allocation4 + $0xa8] sm:$0xff] (%p5483_p13)  ;;  %v6279_v19 = vld [vmem:[#allocation23_spill] sm:$0xff] (%p5483_p13) }
 0x756   : >> { %v6263_v16 = vmov %v6250_v17  ;;  %v6270_v1 = vmov %v6249_v39  ;;  %v3044_v26 = vpack.c.bf16 (%p5483_p13), %v2402_v11, %v2401_v43  ;;  %v6290_v11 = vld [vmem:[#allocation89_spill] sm:$0xff] (%p5483_p13) }
 0x757   : >> { %vm1926_vm14 = vcmp.ge.f32.partialorder %v2912_v10, 25.0  ;;  %vm1933_vm15 = vcmp.ge.f32.partialorder %v2933_v22, 25.0  ;;  %v2913_v21 = vpop.f32.mrb[12].mxu0  ;;  %v2934_v53 = vpop.f32.mrb[10].mxu1  ;;  %v6280_v1 = vld [vmem:[#allocation24_spill] sm:$0xff] (%p5483_p13)  ;;  %vm1978_vm13 = vcmp.ge.s32.totalorder (%p5483_p13), %v6290_v11, 0 }
 0x758   : >> { %v5446_v44 = vsel %vm1926_vm14, %v5280_v37, %v3918_v44   ;;  %v1958_v51 = vsel %vm1926_vm14, %v3854_v51, %v5280_v37   ;;  %v5452_v61 = vsel %vm1933_vm15, %v5272_v35, %v3890_v61   ;;  %v1965_v8 = vsel %vm1933_vm15, %v3826_v8, %v5272_v35   ;;  %v2914_v48 = vpop.f32.mrb[13].mxu0  ;;  %v2935_v40 = vpop.f32.mrb[11].mxu1  ;;  %3045 = vmatprep.subr.bf16.mxu0 (%p5483_p13), %v3044_v26  ;;  %v6281_v22 = vld [vmem:[#allocation80_spill] sm:$0xff] (%p5483_p13) }
 0x759   : >> { %v6253_v60 = vmov %v5446_v44  ;;  %v6254_v54 = vmov %v5452_v61  ;;  %v2915_v30 = vadd.f32 %v2914_v48, %v2913_v21  ;;  %v2936_v59 = vadd.f32 %v2935_v40, %v2934_v53  ;;  %v2404_v51 = vld [vmem:[#allocation4 + $0x98] sm:$0xff] (%p5483_p13)  ;;  %3094 = vmatprep.subr.bf16.mxu1 (%p5483_p13), %v3044_v26 }
 0x75a   : >> { %v6262_v40 = vmov %v6252_v15  ;;  %v6265_v53 = vmov %v6246_v55  ;;  %v6269_v48 = vmov %v6251_v46  ;;  %v6272_v21 = vmov %v6245_v50 }
 0x75b   : >> { %vm1927_vm0 = vcmp.ge.f32.partialorder %v2915_v30, 25.0  ;;  %vm1934_vm1 = vcmp.ge.f32.partialorder %v2936_v59, 25.0  ;;  %v2916_v49 = vpop.f32.mrb[14].mxu0  ;;  %v2937_v18 = vpop.f32.mrb[12].mxu1  ;;  %vm1974_vm10 = vcmp.ge.s32.totalorder (%p5483_p13), %v6281_v22, 0  ;;  %v1990_v21 = vsub.s32 (%p5483_p13), 2147483648, %v6281_v22 }
 0x75c   : >> { %v5458_v34 = vsel %vm1927_vm0, %v5294_v14, %v3914_v34   ;;  %v1959_v41 = vsel %vm1927_vm0, %v3850_v41, %v5294_v14   ;;  %v5464_v24 = vsel %vm1934_vm1, %v5286_v63, %v3886_v24   ;;  %v1966_v31 = vsel %vm1934_vm1, %v3822_v31, %v5286_v63   ;;  %v2917_v44 = vpop.f32.mrb[15].mxu0  ;;  %v2938_v61 = vpop.f32.mrb[13].mxu1  ;;  %v6283_v48 = vld [vmem:[#allocation28_spill] sm:$0xff] (%p5483_p13)  ;;  %v6284_v30 = vld [vmem:[#allocation35_spill] sm:$0xff] (%p5483_p13) }
 0x75d   : >> { %v6255_v9 = vmov %v5458_v34  ;;  %v6256_v37 = vmov %v5464_v24  ;;  %v2918_v35 = vadd.f32 %v2917_v44, %v2916_v49  ;;  %v2939_v4 = vadd.f32 %v2938_v61, %v2937_v18  ;;  %v2403_v41 = vld [vmem:[#allocation4 + $0x90] sm:$0xff] (%p5483_p13) }
 0x75e   : >> { %v6261_v61 = vmov %v6254_v54  ;;  %v6268_v44 = vmov %v6253_v60  ;;  %v3048_v20 = vpack.c.bf16 (%p5483_p13), %v2404_v51, %v2403_v41  ;;  %v3052_v31 = vpack.c.bf16 (%p5483_p13), %v2406_v0, %v2405_v36  ;;  %v6294_v0 = vld [vmem:[#allocation51_spill] sm:$0xff] (%p5483_p13) }
 0x75f   : >> { %vm1928_vm2 = vcmp.ge.f32.partialorder %v2918_v35, 25.0  ;;  %vm1935_vm3 = vcmp.ge.f32.partialorder %v2939_v4, 25.0  ;;  %v2940_v32 = vpop.f32.mrb[14].mxu1  ;;  %v6271_v4 = vmov %v6247_v25  ;;  %1566 = sbr.rel (!%p5483_p13) target bundleno = 1508 (0x5e4), region = 97  ;;  %v6287_v44 = vld [vmem:[#allocation31_spill] sm:$0xff] (%p5483_p13) }
 0x760   : >> { %v1944_v45 = vsel %vm1928_vm2, %v5308_v52, %v3910_v13   ;;  %v1960_v5 = vsel %vm1928_vm2, %v3846_v5, %v5308_v52   ;;  %v1951_v14 = vsel %vm1935_vm3, %v5300_v7, %v3882_v38   ;;  %v1967_v56 = vsel %vm1935_vm3, %v3818_v56, %v5300_v7   ;;  %v2941_v34 = vpop.f32.mrb[15].mxu1  ;;  %v6288_v35 = vld [vmem:[#allocation79_spill] sm:$0xff] (%p5483_p13) }
 0x761   : >> { %v2942_v24 = vadd.f32 %v2941_v34, %v2940_v32  ;;  %v6259_v38 = vmov %v1951_v14  ;;  %v6264_v32 = vmov %v6248_v62  ;;  %v6266_v13 = vmov %v1944_v45  ;;  %v2389_v56 = vld [vmem:[#allocation4 + $0x20] sm:$0xff] (%p5483_p13) }
 0x762   : >> { %v6267_v34 = vmov %v6255_v9  ;;  %v6275_v7 = vmov (%p5483_p13), 0   ;;  %v3046_v5 = vpack.c.bf16 (%p5483_p13), %v2386_v23, %v2385_v58  ;;  %v2387_v13 = vld [vmem:[#allocation4 + $0x10] sm:$0xff] (%p5483_p13)  ;;  %v2390_v38 = vld [vmem:[#allocation4 + $0x28] sm:$0xff] (%p5483_p13)  ;;  %v1986_v52 = vsub.s32 (%p5483_p13), 2147483648, %v4901_v28  ;;  %v6289_v32 = vld [vmem:[#allocation32_spill] sm:$0xff] (%p5483_p13) }
 0x763   : >> { %vm1936_vm4 = vcmp.ge.f32.partialorder %v2942_v24, 25.0  ;;  %v6260_v24 = vmov %v6256_v37  ;;  %3461 = vset.pattern.permute.xlu1 (%p5483_p13), %v6275_v7  ;;  %3460 = vset.pattern.permute.xlu0 (%p5483_p13), %v6275_v7  ;;  %v3050_v8 = vpack.c.bf16 (%p5483_p13), %v2388_v27, %v2387_v13  ;;  %v1991_v4 = vsub.s32 (%p5483_p13), 2147483648, %v6288_v35  ;;  %v6291_v23 = vld [vmem:[#allocation39_spill] sm:$0xff] (%p5483_p13)  ;;  %v6293_v27 = vld [vmem:[#allocation85_spill] sm:$0xff] (%p5483_p13) }
 0x764   : >> { %v1952_v63 = vsel %vm1936_vm4, %v5310_v29, %v3878_v12   ;;  %v1968_v42 = vsel %vm1936_vm4, %v3814_v42, %v5310_v29   ;;  %2040 = vperm.xlu1 (%p5483_p13), %3461, %v6247_v25   ;;  %2034 = vperm.xlu0 (%p5483_p13), %3460, %v6244_v47   ;;  %v1987_v47 = vsub.s32 (%p5483_p13), 2147483648, %v4915_v33  ;;  %v6276_v25 = vld [vmem:[#allocation19_spill] sm:$0xff] (%p5483_p13)  ;;  %vm1975_vm12 = vcmp.ge.s32.totalorder (%p5483_p13), %v6288_v35, 0 }
 0x765   : >> { %v6258_v12 = vmov %v1952_v63  ;;  %3047 = vmatpush3.bf16.msra.mxu0 (%p5483_p13), %v3046_v5  ;;  %3102 = vmatpush3.bf16.msra.mxu1 (%p5483_p13), %v3046_v5  ;;  %v3054_v42 = vpack.c.bf16 (%p5483_p13), %v2390_v38, %v2389_v56  ;;  %v1994_v58 = vsub.s32 (%p5483_p13), 2147483648, %v6290_v11  ;;  %v2007_v51 = vsel (%p5483_p13), %vm1975_vm12, %v6288_v35, %v1991_v4  ;;  %v6296_v38 = vld [vmem:[#allocation43_spill] sm:$0xff] (%p5483_p13) }
 0x766   : > { %3049 = vmatprep.subr.bf16.mxu0 %v3048_v20  ;;  %3095 = vmatprep.subr.bf16.mxu1 %v3048_v20  ;;  %v1985_v12 = vsub.s32 2147483648, %v4896_v6  ;;  %v6292_v20 = vld [vmem:[#allocation40_spill] sm:$0xff]  ;;  %v1992_v36 = vsub.s32 2147483648, %v6293_v27  ;;  %vm1976_vm14 = vcmp.ge.s32.totalorder %v6293_v27, 0 }
 0x768   : > { %2043 = vperm.xlu1 %3461, %v6249_v39   ;;  %2037 = vperm.xlu0 %3460, %v6245_v50   ;;  %v2001_v29 = vsel %vm1969_vm5, %v4896_v6, %v1985_v12  ;;  %v1989_v50 = vsub.s32 2147483648, %v4922_v3  ;;  %v6277_v39 = vld [vmem:[#allocation74_spill] sm:$0xff]  ;;  %v2010_v12 = vsel %vm1978_vm13, %v6290_v11, %v1994_v58  ;;  %v6308_v11 = vld [vmem:[#allocation67_spill] sm:$0xff] }
 0x769   : > { %3051 = vmatpush3.bf16.msra.mxu0 %v3050_v8  ;;  %3103 = vmatpush3.bf16.msra.mxu1 %v3050_v8  ;;  %v2114_v2 = vsub.f32 %v6278_v57, %v2001_v29  ;;  %vm1972_vm9 = vcmp.ge.s32.totalorder %v6277_v39, 0  ;;  %v6299_v57 = vld [vmem:[#allocation55_spill] sm:$0xff] }
 0x76a   : > { %3053 = vmatprep.subr.bf16.mxu0 %v3052_v31  ;;  %3096 = vmatprep.subr.bf16.mxu1 %v3052_v31  ;;  %v6295_v31 = vld [vmem:[#allocation52_spill] sm:$0xff] }
 0x76b   : > { %v2147_v53 = vmul.f32 1.442695, %v2114_v2  ;;  %v2131_v2 = vsub.f32 %v6299_v57, %v2010_v12  ;;  %v6317_v57 = vld [vmem:[#allocation22_spill] sm:$0xff] }
 0x76c   : > { %2058 = vperm.xlu1 %3461, %v6246_v55   ;;  %2046 = vperm.xlu0 %3460, %v6251_v46   ;;  %v2002_v55 = vsel %vm1970_vm6, %v4901_v28, %v1986_v52  ;;  %v2003_v46 = vsel %vm1971_vm7, %v4915_v33, %v1987_v47  ;;  %v6285_v33 = vld [vmem:[#allocation36_spill] sm:$0xff]  ;;  %v6297_v52 = vld [vmem:[#allocation90_spill] sm:$0xff] }
 0x76d   : > { %3055 = vmatpush3.bf16.msra.mxu0 %v3054_v42  ;;  %3104 = vmatpush3.bf16.msra.mxu1 %v3054_v42  ;;  %v2115_v6 = vsub.f32 %v6279_v19, %v2002_v55  ;;  %v2116_v28 = vsub.f32 %v6280_v1, %v2002_v55  ;;  %v2118_v40 = vsub.f32 %v6283_v48, %v2003_v46  ;;  %vm1979_vm15 = vcmp.ge.s32.totalorder %v6297_v52, 0 }
 0x76e   : > { %v2125_v42 = vsub.f32 %v6296_v38, %v2007_v51 }
 0x76f   : > { %v2149_v49 = vmul.f32 1.442695, %v2115_v6  ;;  %v2155_v24 = vmul.f32 1.442695, %v2118_v40  ;;  %v6304_v40 = vld [vmem:[#allocation88_spill] sm:$0xff] }
 0x770   : > { %2061 = vperm.xlu1 %3461, %v6248_v62   ;;  %2049 = vperm.xlu0 %3460, %v6253_v60   ;;  %v2113_v62 = vsub.f32 %v6276_v25, %v2001_v29  ;;  %v6282_v60 = vld [vmem:[#allocation27_spill] sm:$0xff]  ;;  %v1995_v29 = vsub.s32 2147483648, %v6297_v52  ;;  %v2169_v6 = vmul.f32 1.442695, %v2125_v42  ;;  %vm1980_vm1 = vcmp.ge.s32.totalorder %v6304_v40, 0 }
 0x772   : > { %v2145_v16 = vmul.f32 1.442695, %v2113_v62  ;;  %v2008_v62 = vsel %vm1976_vm14, %v6293_v27, %v1992_v36  ;;  %v2011_v1 = vsel %vm1979_vm15, %v6297_v52, %v1995_v29 }
 0x774   : > { %2064 = vperm.xlu1 %3461, %v6250_v17   ;;  %2052 = vperm.xlu0 %3460, %v6255_v9   ;;  %v1988_v17 = vsub.s32 2147483648, %v6277_v39  ;;  %3462 = vpow2.f32 %v2145_v16 }
 0x775   : > { %3464 = vpow2.f32 %v2147_v53 }
 0x776   : > { %v2004_v10 = vsel %vm1972_vm9, %v6277_v39, %v1988_v17  ;;  %3466 = vpow2.f32 %v2149_v49  ;;  %v6305_v49 = vld [vmem:[#allocation59_spill] sm:$0xff] }
 0x777   : > { %v2119_v61 = vsub.f32 %v6287_v44, %v2004_v10 }
 0x778   : > { %2067 = vperm.xlu1 %3461, %v6252_v15   ;;  %2055 = vperm.xlu0 %3460, %v1944_v45   ;;  %v2005_v15 = vsel %vm1973_vm8, %v4922_v3, %v1989_v50  ;;  %v6286_v3 = vld [vmem:[#allocation86_spill] sm:$0xff]  ;;  %v2120_v45 = vsub.f32 %v6289_v32, %v2004_v10  ;;  %v6298_v50 = vld [vmem:[#allocation44_spill] sm:$0xff]  ;;  %v6301_v10 = vld [vmem:[#allocation47_spill] sm:$0xff] }
 0x779   : > { %v2121_v59 = vsub.f32 %v6284_v30, %v2005_v15  ;;  %v2122_v18 = vsub.f32 %v6285_v33, %v2005_v15  ;;  %v1993_v9 = vsub.s32 2147483648, %v6286_v3  ;;  %vm1977_vm11 = vcmp.ge.s32.totalorder %v6286_v3, 0 }
 0x77a   : > { %v2157_v26 = vmul.f32 1.442695, %v2119_v61  ;;  %v2159_v5 = vmul.f32 1.442695, %v2120_v45  ;;  %v2126_v55 = vsub.f32 %v6298_v50, %v2007_v51  ;;  %v1996_v30 = vsub.s32 2147483648, %v6304_v40  ;;  %v6310_v51 = vld [vmem:[#allocation63_spill] sm:$0xff] }
 0x77b   : > { %v2163_v7 = vmul.f32 1.442695, %v2122_v18  ;;  %v2009_v43 = vsel %vm1977_vm11, %v6286_v3, %v1993_v9  ;;  %v2133_v33 = vsub.f32 %v6305_v49, %v2011_v1  ;;  %v6306_v9 = vld [vmem:[#allocation60_spill] sm:$0xff] }
 0x77c   : > { %2073 = vperm.xlu1 %3461, %v6256_v37   ;;  %2070 = vperm.xlu0 %3460, %v6254_v54   ;;  %v2117_v54 = vsub.f32 %v6282_v60, %v2003_v46  ;;  %v2151_v37 = vmul.f32 1.442695, %v2116_v28  ;;  %v2129_v8 = vsub.f32 %v6294_v0, %v2009_v43  ;;  %v2130_v56 = vsub.f32 %v6295_v31, %v2009_v43  ;;  %v6300_v46 = vld [vmem:[#allocation56_spill] sm:$0xff] }
 0x77d   : > { %v2132_v15 = vsub.f32 %v6300_v46, %v2010_v12  ;;  %v2171_v16 = vmul.f32 1.442695, %v2126_v55  ;;  %v2012_v45 = vsel %vm1980_vm1, %v6304_v40, %v1996_v30  ;;  %v6319_v30 = vld [vmem:[#allocation94_spill] sm:$0xff] }
 0x77e   : > { %v2153_v34 = vmul.f32 1.442695, %v2117_v54  ;;  %3468 = vpow2.f32 %v2151_v37  ;;  %v2177_v39 = vmul.f32 1.442695, %v2129_v8  ;;  %v2179_v17 = vmul.f32 1.442695, %v2130_v56  ;;  %v5640_v19 = vpop.eup %3462 }
 0x77f   : > { %v5644_v28 = vpop.eup %3464  ;;  %v6303_v54 = vld [vmem:[#allocation48_spill] sm:$0xff]  ;;  %v2183_v3 = vmul.f32 1.442695, %v2132_v15  ;;  %v2134_v37 = vsub.f32 %v6306_v9, %v2011_v1  ;;  %vm1984_vm8 = vcmp.ge.s32.totalorder %v6319_v30, 0  ;;  %v6322_v9 = vld [vmem:[#allocation25_spill] sm:$0xff] }
 0x780   : > { %2079 = vperm.xlu1 %3461, %v1952_v63   ;;  %2076 = vperm.xlu0 %3460, %v1951_v14   ;;  %v2006_v14 = vsel %vm1974_vm10, %v6281_v22, %v1990_v21  ;;  %v2161_v63 = vmul.f32 1.442695, %v2121_v59  ;;  %3470 = vpow2.f32 %v2153_v34  ;;  %v2127_v22 = vsub.f32 %v6301_v10, %v2008_v62  ;;  %v6302_v21 = vld [vmem:[#allocation91_spill] sm:$0xff]  ;;  %v5648_v60 = vpop.eup %3466  ;;  %v6311_v8 = vld [vmem:[#allocation64_spill] sm:$0xff] }
 0x781   : > { %v2123_v41 = vsub.f32 %v6291_v23, %v2006_v14  ;;  %v2124_v13 = vsub.f32 %v6292_v20, %v2006_v14  ;;  %3472 = vpow2.f32 %v2155_v24  ;;  %v1997_v53 = vsub.s32 2147483648, %v6302_v21  ;;  %v6307_v14 = vld [vmem:[#allocation93_spill] sm:$0xff]  ;;  %v6309_v23 = vld [vmem:[#allocation68_spill] sm:$0xff] }
 0x782   : > { %3474 = vpow2.f32 %v2161_v63  ;;  %v2128_v48 = vsub.f32 %v6303_v54, %v2008_v62  ;;  %vm1981_vm0 = vcmp.ge.s32.totalorder %v6302_v21, 0  ;;  %v2181_v59 = vmul.f32 1.442695, %v2131_v2  ;;  %v6312_v56 = vld [vmem:[#allocation92_spill] sm:$0xff]  ;;  %v6314_v62 = vld [vmem:[#allocation29_spill] sm:$0xff] }
 0x783   : > { %v2165_v47 = vmul.f32 1.442695, %v2123_v41  ;;  %3476 = vpow2.f32 %v2163_v7  ;;  %v2167_v25 = vmul.f32 1.442695, %v2124_v13  ;;  %v2173_v61 = vmul.f32 1.442695, %v2127_v22 }
 0x784   : > { %3478 = vpow2.f32 %v2157_v26  ;;  %v2013_v35 = vsel %vm1981_vm0, %v6302_v21, %v1997_v53  ;;  %v2175_v32 = vmul.f32 1.442695, %v2128_v48  ;;  %v1999_v34 = vsub.s32 2147483648, %v6307_v14  ;;  %v6318_v21 = vld [vmem:[#allocation77_spill] sm:$0xff] }
 0x785   : > { %3480 = vpow2.f32 %v2159_v5  ;;  %v2185_v63 = vmul.f32 1.442695, %v2133_v33  ;;  %vm1983_vm2 = vcmp.ge.s32.totalorder %v6307_v14, 0  ;;  %v2187_v43 = vmul.f32 1.442695, %v2134_v37  ;;  %v6320_v33 = vld [vmem:[#allocation33_spill] sm:$0xff] }
 0x786   : > { %3482 = vpow2.f32 %v2165_v47  ;;  %v2137_v58 = vsub.f32 %v6308_v11, %v2013_v35  ;;  %v2138_v41 = vsub.f32 %v6309_v23, %v2013_v35  ;;  %v2135_v5 = vsub.f32 %v6310_v51, %v2012_v45  ;;  %v6313_v47 = vld [vmem:[#allocation76_spill] sm:$0xff]  ;;  %v6323_v37 = vld [vmem:[#allocation26_spill] sm:$0xff] }
 0x787   : > { %3484 = vpow2.f32 %v2167_v25  ;;  %v2015_v13 = vsel %vm1983_vm2, %v6307_v14, %v1999_v34  ;;  %v2136_v31 = vsub.f32 %v6311_v8, %v2012_v45  ;;  %vm1982_vm3 = vcmp.ge.s32.totalorder %v6312_v56, 0  ;;  %v6325_v23 = vld [vmem:[#allocation72_spill] sm:$0xff]  ;;  %v6329_v8 = vld [vmem:[#allocation54_spill] sm:$0xff] }
 0x788   : > { %3486 = vpow2.f32 %v2177_v39  ;;  %v5655_v18 = vpop.eup %3468  ;;  %v2193_v0 = vmul.f32 1.442695, %v2137_v58  ;;  %v2195_v52 = vmul.f32 1.442695, %v2138_v41  ;;  %v2189_v29 = vmul.f32 1.442695, %v2135_v5 }
 0x789   : > { %3488 = vpow2.f32 %v2179_v17  ;;  %v2141_v50 = vsub.f32 %v6313_v47, %v2015_v13  ;;  %v1998_v55 = vsub.s32 2147483648, %v6312_v56  ;;  %v6315_v39 = vld [vmem:[#allocation30_spill] sm:$0xff]  ;;  %v6316_v17 = vld [vmem:[#allocation21_spill] sm:$0xff]  ;;  %v2191_v22 = vmul.f32 1.442695, %v2136_v31 }
 0x78a   : > { %v3471_v44 = vpop.eup %3470  ;;  %3490 = vpow2.f32 %v2169_v6  ;;  %v2142_v53 = vsub.f32 %v6318_v21, %v2015_v13  ;;  %v6326_v5 = vld [vmem:[#allocation37_spill] sm:$0xff]  ;;  %v6335_v21 = vld [vmem:[#allocation58_spill] sm:$0xff] }
 0x78b   : > { %v3473_v4 = vpop.eup %3472  ;;  %3492 = vpow2.f32 %v2171_v16  ;;  %v2014_v40 = vsel %vm1982_vm3, %v6312_v56, %v1998_v55  ;;  %v2201_v34 = vmul.f32 1.442695, %v2141_v50 }
 0x78c   : > { %v5661_v24 = vpop.eup %3474  ;;  %3494 = vpow2.f32 %v2181_v59  ;;  %v2000_v59 = vsub.s32 2147483648, %v6319_v30 }
 0x78d   : > { %v5664_v7 = vpop.eup %3476  ;;  %3496 = vpow2.f32 %v2183_v3  ;;  %v6321_v3 = vld [vmem:[#allocation34_spill] sm:$0xff] }
 0x78e   : > { %v3479_v26 = vpop.eup %3478  ;;  %3498 = vpow2.f32 %v2173_v61  ;;  %v2016_v41 = vsel %vm1984_vm8, %v6319_v30, %v2000_v59 }
 0x78f   : > { %v3481_v20 = vpop.eup %3480  ;;  %3500 = vpow2.f32 %v2175_v32 }
 0x790   : > { %v5670_v27 = vpop.eup %3482  ;;  %3502 = vpow2.f32 %v2185_v63  ;;  %v6324_v63 = vld [vmem:[#allocation71_spill] sm:$0xff] }
 0x791   : > { %v5672_v36 = vpop.eup %3484  ;;  %3504 = vpow2.f32 %v2187_v43  ;;  %v2139_v43 = vsub.f32 %v6324_v63, %v2014_v40  ;;  %v6339_v63 = vld [vmem:[#allocation62_spill] sm:$0xff] }
 0x792   : > { %v5676_v38 = vpop.eup %3486  ;;  %3506 = vpow2.f32 %v2193_v0  ;;  %v6328_v0 = vld [vmem:[#allocation53_spill] sm:$0xff] }
 0x793   : > { %v5680_v25 = vpop.eup %3488  ;;  %3508 = vpow2.f32 %v2195_v52  ;;  %v6330_v52 = vld [vmem:[#allocation82_spill] sm:$0xff] }
 0x794   : > { %v5686_v2 = vpop.eup %3490  ;;  %3510 = vpow2.f32 %v2189_v29  ;;  %v2143_v29 = vsub.f32 %v6330_v52, %v2016_v41 }
 0x795   : > { %v5698_v16 = vpop.eup %3492  ;;  %3512 = vpow2.f32 %v2191_v22  ;;  %v6334_v22 = vld [vmem:[#allocation57_spill] sm:$0xff] }
 0x796   : > { %v5703_v54 = vpop.eup %3494  ;;  %3514 = vpow2.f32 %v2201_v34  ;;  %v6338_v34 = vld [vmem:[#allocation61_spill] sm:$0xff] }
 0x797   : > { %v5712_v49 = vpop.eup %3496 }
 0x7e3   : > { %v2041_v42 = vpop.permute.xlu1 %2040  ;;  %v2035_v12 = vpop.permute.xlu0 %2034 }
 0x7e4   : > { %vm2085_vm4 = vcmp.ge.s32.totalorder %v6314_v62, %v2041_v42  ;;  %vm2086_vm5 = vcmp.ge.s32.totalorder %v6315_v39, %v2041_v42  ;;  %vm2081_vm6 = vcmp.ge.s32.totalorder %v6316_v17, %v2035_v12  ;;  %vm2082_vm7 = vcmp.ge.s32.totalorder %v6317_v57, %v2035_v12  ;;  %v6331_v62 = vld [vmem:[#allocation83_spill] sm:$0xff]  ;;  %v6333_v57 = vld [vmem:[#allocation42_spill] sm:$0xff] }
 0x7e5   : > { %v5689_v6 = vsel %vm2081_vm6, %v5640_v19, 0.0  ;;  %v5692_v46 = vsel %vm2082_vm7, %v5644_v28, 0.0  ;;  %v5694_v15 = vsel %vm2085_vm4, %v3471_v44, 0.0  ;;  %v5696_v1 = vsel %vm2086_vm5, %v3473_v4, 0.0  ;;  %v5718_v44 = vpop.eup %3498 }
 0x7e6   : > { %v2241_v10 = vadd.f32 %v5692_v46, %v5689_v6  ;;  %v2247_v28 = vadd.f32 %v5696_v1, %v5694_v15  ;;  %v5730_v45 = vpop.eup %3500  ;;  %v2197_v12 = vmul.f32 1.442695, %v2139_v43  ;;  %v2144_v39 = vsub.f32 %v6331_v62, %v2016_v41  ;;  %v2394_v62 = vld [vmem:[#allocation4 + $0x48] sm:$0xff] }
 0x7e7   : > { %v2044_v19 = vpop.permute.xlu1 %2043  ;;  %v2038_v48 = vpop.permute.xlu0 %2037 }
 0x7e8   : > { %vm2087_vm9 = vcmp.ge.s32.totalorder %v6320_v33, %v2044_v19  ;;  %vm2088_vm10 = vcmp.ge.s32.totalorder %v6321_v3, %v2044_v19  ;;  %vm2083_vm11 = vcmp.ge.s32.totalorder %v6322_v9, %v2038_v48  ;;  %vm2084_vm12 = vcmp.ge.s32.totalorder %v6323_v37, %v2038_v48  ;;  %2242 = vadd.xlane.f32.xlu0 %v2241_v10  ;;  %v5735_v11 = vpop.eup %3502  ;;  %v6336_v33 = vld [vmem:[#allocation45_spill] sm:$0xff]  ;;  %v2407_v9 = vld [vmem:[#allocation4 + $0xb0] sm:$0xff]  ;;  %v2408_v37 = vld [vmem:[#allocation4 + $0xb8] sm:$0xff] }
 0x7e9   : > { %v5721_v61 = vsel %vm2083_vm11, %v5648_v60, 0.0  ;;  %v5724_v35 = vsel %vm2084_vm12, %v5655_v18, 0.0  ;;  %v5726_v4 = vsel %vm2087_vm9, %v3479_v26, 0.0  ;;  %v5728_v32 = vsel %vm2088_vm10, %v3481_v20, 0.0  ;;  %v5741_v51 = vpop.eup %3504  ;;  %v6327_v20 = vld [vmem:[#allocation38_spill] sm:$0xff] }
 0x7ea   : > { %v2244_v14 = vadd.f32 %v5724_v35, %v5721_v61  ;;  %v2203_v18 = vmul.f32 1.442695, %v2142_v53  ;;  %v2140_v26 = vsub.f32 %v6325_v23, %v2014_v40  ;;  %v2250_v13 = vadd.f32 %v5728_v32, %v5726_v4  ;;  %v5759_v17 = vpop.eup %3506 }
 0x7eb   : > { %v2059_v60 = vpop.permute.xlu1 %2058  ;;  %v2047_v58 = vpop.permute.xlu0 %2046  ;;  %v2205_v48 = vmul.f32 1.442695, %v2143_v29  ;;  %v2207_v30 = vmul.f32 1.442695, %v2144_v39  ;;  %v3056_v23 = vpack.c.bf16 %v2408_v37, %v2407_v9  ;;  %v6342_v29 = vld [vmem:[#allocation65_spill] sm:$0xff] }
 0x7ec   : > { %vm2089_vm13 = vcmp.ge.s32.totalorder %v6326_v5, %v2047_v58  ;;  %vm2090_vm14 = vcmp.ge.s32.totalorder %v6327_v20, %v2047_v58  ;;  %2245 = vadd.xlane.f32.xlu1 %v2244_v14  ;;  %vm2097_vm15 = vcmp.ge.s32.totalorder %v6328_v0, %v2059_v60  ;;  %vm2098_vm0 = vcmp.ge.s32.totalorder %v6329_v8, %v2059_v60  ;;  %v5785_v59 = vpop.eup %3508  ;;  %v2392_v58 = vld [vmem:[#allocation4 + $0x38] sm:$0xff] }
 0x7ed   : > { %2248 = vadd.xlane.f32.xlu0 %v2247_v28  ;;  %v5750_v31 = vsel %vm2089_vm13, %v5661_v24, 0.0  ;;  %v5753_v56 = vsel %vm2090_vm14, %v5664_v7, 0.0  ;;  %3516 = vpow2.f32 %v2203_v18  ;;  %v2199_v55 = vmul.f32 1.442695, %v2140_v26  ;;  %v6332_v24 = vld [vmem:[#allocation41_spill] sm:$0xff]  ;;  %v3511_v14 = vpop.eup %3510  ;;  %3057 = vmatprep.subr.bf16.mxu0 %v3056_v23 }
 0x7ee   : > { %v2253_v42 = vadd.f32 %v5753_v56, %v5750_v31  ;;  %v5766_v7 = vsel %vm2097_vm15, %v5676_v38, 0.0  ;;  %v5771_v10 = vsel %vm2098_vm0, %v5680_v25, 0.0  ;;  %3518 = vpow2.f32 %v2197_v12  ;;  %v3513_v18 = vpop.eup %3512  ;;  %v2410_v12 = vld [vmem:[#allocation4 + $0xc8] sm:$0xff]  ;;  %3097 = vmatprep.subr.bf16.mxu1 %v3056_v23 }
 0x7ef   : > { %v2062_v47 = vpop.permute.xlu1 %2061  ;;  %v2050_v50 = vpop.permute.xlu0 %2049  ;;  %v2265_v25 = vadd.f32 %v5771_v10, %v5766_v7  ;;  %3520 = vpow2.f32 %v2199_v55 }
 0x7f0   : > { %vm2091_vm1 = vcmp.ge.s32.totalorder %v6332_v24, %v2050_v50  ;;  %vm2092_vm2 = vcmp.ge.s32.totalorder %v6333_v57, %v2050_v50  ;;  %2254 = vadd.xlane.f32.xlu1 %v2253_v42  ;;  %vm2099_vm3 = vcmp.ge.s32.totalorder %v6334_v22, %v2062_v47  ;;  %vm2100_vm4 = vcmp.ge.s32.totalorder %v6335_v21, %v2062_v47  ;;  %v2409_v42 = vld [vmem:[#allocation4 + $0xc0] sm:$0xff]  ;;  %v6343_v47 = vld [vmem:[#allocation66_spill] sm:$0xff] }
 0x7f1   : > { %2251 = vadd.xlane.f32.xlu0 %v2250_v13  ;;  %v5776_v53 = vsel %vm2091_vm1, %v5670_v27, 0.0  ;;  %v5779_v19 = vsel %vm2092_vm2, %v5672_v36, 0.0  ;;  %v6337_v27 = vld [vmem:[#allocation46_spill] sm:$0xff]  ;;  %v5792_v36 = vsel %vm2099_vm3, %v5703_v54, 0.0  ;;  %v5797_v3 = vsel %vm2100_vm4, %v5712_v49, 0.0  ;;  %v2391_v54 = vld [vmem:[#allocation4 + $0x30] sm:$0xff] }
 0x7f2   : > { %v2256_v38 = vadd.f32 %v5779_v19, %v5776_v53  ;;  %3522 = vpow2.f32 %v2205_v48  ;;  %v3058_v26 = vpack.c.bf16 %v2392_v58, %v2391_v54  ;;  %v2268_v20 = vadd.f32 %v5797_v3, %v5792_v36  ;;  %v6340_v13 = vld [vmem:[#allocation49_spill] sm:$0xff] }
 0x7f3   : > { %v2065_v28 = vpop.permute.xlu1 %2064  ;;  %v2053_v40 = vpop.permute.xlu0 %2052  ;;  %3524 = vpow2.f32 %v2207_v30  ;;  %v3060_v39 = vpack.c.bf16 %v2410_v12, %v2409_v42  ;;  %v6350_v12 = vld [vmem:[#allocation84_spill] sm:$0xff] }
 0x7f4   : > { %vm2093_vm5 = vcmp.ge.s32.totalorder %v6336_v33, %v2053_v40  ;;  %vm2094_vm6 = vcmp.ge.s32.totalorder %v6337_v27, %v2053_v40  ;;  %2257 = vadd.xlane.f32.xlu1 %v2256_v38  ;;  %vm2101_vm7 = vcmp.ge.s32.totalorder %v6338_v34, %v2065_v28  ;;  %vm2102_vm8 = vcmp.ge.s32.totalorder %v6339_v63, %v2065_v28  ;;  %v6344_v38 = vld [vmem:[#allocation69_spill] sm:$0xff]  ;;  %v2411_v40 = vld [vmem:[#allocation4 + $0xd0] sm:$0xff]  ;;  %v2396_v34 = vld [vmem:[#allocation4 + $0x58] sm:$0xff] }
 0x7f5   : > { %2266 = vadd.xlane.f32.xlu0 %v2265_v25  ;;  %v5802_v43 = vsel %vm2093_vm5, %v5686_v2, 0.0  ;;  %v5805_v60 = vsel %vm2094_vm6, %v5698_v16, 0.0  ;;  %v3515_v2 = vpop.eup %3514  ;;  %v6341_v16 = vld [vmem:[#allocation50_spill] sm:$0xff]  ;;  %v5816_v0 = vsel %vm2101_vm7, %v5735_v11, 0.0  ;;  %v5821_v8 = vsel %vm2102_vm8, %v5741_v51, 0.0  ;;  %v2393_v11 = vld [vmem:[#allocation4 + $0x40] sm:$0xff]  ;;  %3059 = vmatpush3.bf16.msra.mxu0 %v3058_v26 }
 0x7f6   : > { %v2259_v49 = vadd.f32 %v5805_v60, %v5802_v43  ;;  %v3062_v24 = vpack.c.bf16 %v2394_v62, %v2393_v11  ;;  %v2271_v21 = vadd.f32 %v5821_v8, %v5816_v0  ;;  %v2412_v25 = vld [vmem:[#allocation4 + $0xd8] sm:$0xff]  ;;  %v6346_v33 = vld [vmem:[#allocation73_spill] sm:$0xff]  ;;  %v6347_v27 = vld [vmem:[#allocation75_spill] sm:$0xff]  ;;  %3061 = vmatprep.subr.bf16.mxu0 %v3060_v39  ;;  %3105 = vmatpush3.bf16.msra.mxu1 %v3058_v26 }
 0x7f7   : > { %v2068_v41 = vpop.permute.xlu1 %2067  ;;  %v2056_v5 = vpop.permute.xlu0 %2055  ;;  %v3064_v54 = vpack.c.bf16 %v2412_v25, %v2411_v40  ;;  %v6351_v26 = vld [vmem:[#allocation87_spill] sm:$0xff]  ;;  %v2397_v11 = vld [vmem:[#allocation4 + $0x60] sm:$0xff]  ;;  %v2398_v62 = vld [vmem:[#allocation4 + $0x68] sm:$0xff]  ;;  %3098 = vmatprep.subr.bf16.mxu1 %v3060_v39 }
 0x7f8   : > { %vm2095_vm9 = vcmp.ge.s32.totalorder %v6340_v13, %v2056_v5  ;;  %vm2096_vm10 = vcmp.ge.s32.totalorder %v6341_v16, %v2056_v5  ;;  %2260 = vadd.xlane.f32.xlu1 %v2259_v49  ;;  %v3517_v52 = vpop.eup %3516  ;;  %vm2103_vm11 = vcmp.ge.s32.totalorder %v6342_v29, %v2068_v41  ;;  %vm2104_vm12 = vcmp.ge.s32.totalorder %v6343_v47, %v2068_v41  ;;  %v6348_v41 = vld [vmem:[#allocation78_spill] sm:$0xff]  ;;  %v2413_v13 = vld [vmem:[#allocation4 + $0xe0] sm:$0xff]  ;;  %v2399_v40 = vld [vmem:[#allocation4 + $0x70] sm:$0xff] }
 0x7f9   : > { %2269 = vadd.xlane.f32.xlu0 %v2268_v20  ;;  %v5826_v50 = vsel %vm2095_vm9, %v5718_v44, 0.0  ;;  %v5829_v55 = vsel %vm2096_vm10, %v5730_v45, 0.0  ;;  %v3519_v44 = vpop.eup %3518  ;;  %v6345_v45 = vld [vmem:[#allocation70_spill] sm:$0xff]  ;;  %v5839_v48 = vsel %vm2103_vm11, %v3511_v14, 0.0  ;;  %v5843_v28 = vsel %vm2104_vm12, %v3513_v18, 0.0  ;;  %v2395_v14 = vld [vmem:[#allocation4 + $0x50] sm:$0xff]  ;;  %3063 = vmatpush3.bf16.msra.mxu0 %v3062_v24 }
 0x7fa   : > { %v2262_v51 = vadd.f32 %v5829_v55, %v5826_v50  ;;  %v3521_v30 = vpop.eup %3520  ;;  %v3066_v58 = vpack.c.bf16 %v2396_v34, %v2395_v14  ;;  %v2274_v23 = vadd.f32 %v5843_v28, %v5839_v48  ;;  %v2414_v16 = vld [vmem:[#allocation4 + $0xe8] sm:$0xff]  ;;  %3065 = vmatprep.subr.bf16.mxu0 %v3064_v54  ;;  %3106 = vmatpush3.bf16.msra.mxu1 %v3062_v24  ;;  %v2400_v25 = vld [vmem:[#allocation4 + $0x78] sm:$0xff] }
 0x7fb   : > { %v2074_v57 = vpop.permute.xlu1 %2073  ;;  %v2071_v22 = vpop.permute.xlu0 %2070  ;;  %3099 = vmatprep.subr.bf16.mxu1 %v3064_v54 }
 0x7fc   : > { %vm2105_vm13 = vcmp.ge.s32.totalorder %v6344_v38, %v2071_v22  ;;  %vm2106_vm14 = vcmp.ge.s32.totalorder %v6345_v45, %v2071_v22  ;;  %2263 = vadd.xlane.f32.xlu1 %v2262_v51  ;;  %vm2107_vm15 = vcmp.ge.s32.totalorder %v6346_v33, %v2074_v57  ;;  %vm2108_vm0 = vcmp.ge.s32.totalorder %v6347_v27, %v2074_v57  ;;  %v2416_v38 = vld [vmem:[#allocation4 + $0xf8] sm:$0xff] }
 0x7fd   : > { %2272 = vadd.xlane.f32.xlu0 %v2271_v21  ;;  %v5848_v9 = vsel %vm2105_vm13, %v5759_v17, 0.0  ;;  %v5851_v37 = vsel %vm2106_vm14, %v5785_v59, 0.0  ;;  %v3523_v17 = vpop.eup %3522  ;;  %v6349_v59 = vld [vmem:[#allocation81_spill] sm:$0xff]  ;;  %v5861_v5 = vsel %vm2107_vm15, %v3519_v44, 0.0  ;;  %v5865_v20 = vsel %vm2108_vm0, %v3521_v30, 0.0  ;;  %3067 = vmatpush3.bf16.msra.mxu0 %v3066_v58 }
 0x7fe   : > { %v2277_v63 = vadd.f32 %v5851_v37, %v5848_v9  ;;  %v3525_v42 = vpop.eup %3524  ;;  %v3068_v57 = vpack.c.bf16 %v2414_v16, %v2413_v13  ;;  %v3070_v22 = vpack.c.bf16 %v2398_v62, %v2397_v11  ;;  %v2280_v21 = vadd.f32 %v5865_v20, %v5861_v5  ;;  %3107 = vmatpush3.bf16.msra.mxu1 %v3066_v58 }
 0x7ff   : > { %v2080_v18 = vpop.permute.xlu1 %2079  ;;  %v2077_v49 = vpop.permute.xlu0 %2076  ;;  %v3074_v30 = vpack.c.bf16 %v2400_v25, %v2399_v40 }
 0x800   : > { %vm2109_vm1 = vcmp.ge.s32.totalorder %v6348_v41, %v2077_v49  ;;  %vm2110_vm2 = vcmp.ge.s32.totalorder %v6349_v59, %v2077_v49  ;;  %2278 = vadd.xlane.f32.xlu1 %v2277_v63  ;;  %vm2111_vm3 = vcmp.ge.s32.totalorder %v6350_v12, %v2080_v18  ;;  %vm2112_vm4 = vcmp.ge.s32.totalorder %v6351_v26, %v2080_v18 }
 0x801   : > { %2275 = vadd.xlane.f32.xlu0 %v2274_v23  ;;  %v5869_v29 = vsel %vm2109_vm1, %v3515_v2, 0.0  ;;  %v5871_v47 = vsel %vm2110_vm2, %v3517_v52, 0.0  ;;  %v5877_v44 = vsel %vm2111_vm3, %v3523_v17, 0.0  ;;  %v5879_v2 = vsel %vm2112_vm4, %v3525_v42, 0.0  ;;  %3069 = vmatprep.subr.bf16.mxu0 %v3068_v57  ;;  %v2415_v52 = vld [vmem:[#allocation4 + $0xf0] sm:$0xff] }
 0x802   : > { %v2283_v51 = vadd.f32 %v5871_v47, %v5869_v29  ;;  %v3072_v45 = vpack.c.bf16 %v2416_v38, %v2415_v52  ;;  %3071 = vmatpush3.bf16.msra.mxu0 %v3070_v22  ;;  %v2286_v33 = vadd.f32 %v5879_v2, %v5877_v44  ;;  %3100 = vmatprep.subr.bf16.mxu1 %v3068_v57 }
 0x803   : > { %3108 = vmatpush3.bf16.msra.mxu1 %v3070_v22 }
 0x804   : > { %2284 = vadd.xlane.f32.xlu1 %v2283_v51  ;;  %3073 = vmatprep.subr.bf16.mxu0 %v3072_v45 }
 0x805   : > { %2281 = vadd.xlane.f32.xlu0 %v2280_v21  ;;  %3101 = vmatprep.subr.bf16.mxu1 %v3072_v45 }
 0x806   : > { %3075 = vmatpush3.bf16.msra.mxu0 %v3074_v30 }
 0x807   : > { %3109 = vmatpush3.bf16.msra.mxu1 %v3074_v30 }
 0x809   : > { %2287 = vadd.xlane.f32.xlu0 %v2286_v33 }
 0x875   : > { %v2243_v39 = vpop.xlane.xlu0 %2242 }
 0x876   : > { %3526 = vrcp.f32 %v2243_v39 }
 0x879   : > { %v2246_v27 = vpop.xlane.xlu1 %2245 }
 0x87a   : > { %3528 = vrcp.f32 %v2246_v27  ;;  %v2249_v24 = vpop.xlane.xlu0 %2248 }
 0x87b   : > { %3530 = vrcp.f32 %v2249_v24 }
 0x87d   : > { %v2255_v14 = vpop.xlane.xlu1 %2254 }
 0x87e   : > { %3532 = vrcp.f32 %v2255_v14  ;;  %v2252_v34 = vpop.xlane.xlu0 %2251 }
 0x87f   : > { %3534 = vrcp.f32 %v2252_v34 }
 0x880   : > { %v3527_v63 = vpop.eup %3526 }
 0x881   : > { %v2305_v54 = vmul.f32 %v3527_v63, %v2243_v39  ;;  %v2258_v18 = vpop.xlane.xlu1 %2257 }
 0x882   : > { %3536 = vrcp.f32 %v2258_v18  ;;  %v2267_v58 = vpop.xlane.xlu0 %2266 }
 0x883   : > { %v2321_v49 = vsub.f32 2.0, %v2305_v54  ;;  %3538 = vrcp.f32 %v2267_v58 }
 0x884   : > { %v3529_v23 = vpop.eup %3528 }
 0x885   : > { %v3531_v17 = vpop.eup %3530  ;;  %v2306_v41 = vmul.f32 %v3529_v23, %v2246_v27  ;;  %v2261_v59 = vpop.xlane.xlu1 %2260  ;;  %v2337_v13 = vmul.f32 %v3527_v63, %v2321_v49 }
 0x886   : > { %v2307_v16 = vmul.f32 %v3531_v17, %v2249_v24  ;;  %3540 = vrcp.f32 %v2261_v59  ;;  %v2270_v42 = vpop.xlane.xlu0 %2269 }
 0x887   : > { %v2322_v12 = vsub.f32 2.0, %v2306_v41  ;;  %3542 = vrcp.f32 %v2270_v42  ;;  %v2354_v26 = vmul.f32 %v2337_v13, %v5692_v46  ;;  %v2353_v11 = vmul.f32 %v2337_v13, %v5689_v6 }
 0x888   : > { %v3533_v62 = vpop.eup %3532  ;;  %v2323_v51 = vsub.f32 2.0, %v2307_v16 }
 0x889   : > { %v3535_v57 = vpop.eup %3534  ;;  %v2338_v22 = vmul.f32 %v3529_v23, %v2322_v12  ;;  %v2309_v21 = vmul.f32 %v3533_v62, %v2255_v14  ;;  %v2264_v52 = vpop.xlane.xlu1 %2263  ;;  %2481 = vmatprep.mubr.f32.mxu0 %v2354_v26 }
 0x88a   : > { %v2339_v38 = vmul.f32 %v3531_v17, %v2323_v51  ;;  %v2308_v45 = vmul.f32 %v3535_v57, %v2252_v34  ;;  %3544 = vrcp.f32 %v2264_v52  ;;  %v2273_v40 = vpop.xlane.xlu0 %2272  ;;  %2482 = vmatmul.mubr.f32.vlgmr.msra.gmra.mrb[0].mxu0 %v2353_v11 }
 0x88b   : > { %3546 = vrcp.f32 %v2273_v40  ;;  %v2356_v25 = vmul.f32 %v2338_v22, %v5724_v35  ;;  %v2355_v30 = vmul.f32 %v2338_v22, %v5721_v61  ;;  %v2325_v39 = vsub.f32 2.0, %v2309_v21 }
 0x88c   : > { %v3537_v46 = vpop.eup %3536  ;;  %v2324_v33 = vsub.f32 2.0, %v2308_v45  ;;  %v2358_v14 = vmul.f32 %v2339_v38, %v5696_v1  ;;  %v2357_v61 = vmul.f32 %v2339_v38, %v5694_v15 }
 0x88d   : > { %v3539_v6 = vpop.eup %3538  ;;  %v2310_v27 = vmul.f32 %v3537_v46, %v2258_v18  ;;  %v2279_v24 = vpop.xlane.xlu1 %2278  ;;  %2486 = vmatprep.mubr.f32.mxu0 %v2356_v25  ;;  %v2341_v17 = vmul.f32 %v3533_v62, %v2325_v39 }
 0x88e   : > { %v2340_v63 = vmul.f32 %v3535_v57, %v2324_v33  ;;  %v2313_v54 = vmul.f32 %v3539_v6, %v2267_v58  ;;  %3548 = vrcp.f32 %v2279_v24  ;;  %v2276_v34 = vpop.xlane.xlu0 %2275  ;;  %2487 = vmatmul.mubr.f32.gmra.mrb[2].mxu0 %v2355_v30 }
 0x88f   : > { %3550 = vrcp.f32 %v2276_v34  ;;  %2491 = vmatprep.mubr.f32.mxu0 %v2358_v14  ;;  %v2326_v41 = vsub.f32 2.0, %v2310_v27 }
 0x890   : > { %v3541_v49 = vpop.eup %3540  ;;  %v2329_v35 = vsub.f32 2.0, %v2313_v54  ;;  %v2360_v16 = vmul.f32 %v2340_v63, %v5728_v32  ;;  %v2359_v15 = vmul.f32 %v2340_v63, %v5726_v4  ;;  %v2362_v32 = vmul.f32 %v2341_v17, %v5753_v56 }
 0x891   : > { %v3543_v23 = vpop.eup %3542  ;;  %v2311_v13 = vmul.f32 %v3541_v49, %v2261_v59  ;;  %v2285_v18 = vpop.xlane.xlu1 %2284  ;;  %v2342_v59 = vmul.f32 %v3537_v46, %v2326_v41 }
 0x892   : > { %v2314_v12 = vmul.f32 %v3543_v23, %v2270_v42  ;;  %3552 = vrcp.f32 %v2285_v18  ;;  %v2282_v1 = vpop.xlane.xlu0 %2281  ;;  %2492 = vmatmul.mubr.f32.gmra.mrb[4].mxu0 %v2357_v61  ;;  %v2345_v58 = vmul.f32 %v3539_v6, %v2329_v35 }
 0x893   : > { %3554 = vrcp.f32 %v2282_v1  ;;  %2496 = vmatprep.mubr.f32.mxu0 %v2360_v16  ;;  %v2327_v22 = vsub.f32 2.0, %v2311_v13 }
 0x894   : > { %v3545_v26 = vpop.eup %3544  ;;  %v2330_v11 = vsub.f32 2.0, %v2314_v12  ;;  %v2370_v51 = vmul.f32 %v2345_v58, %v5771_v10  ;;  %v2369_v62 = vmul.f32 %v2345_v58, %v5766_v7  ;;  %v2361_v7 = vmul.f32 %v2341_v17, %v5750_v31 }
 0x895   : > { %v3547_v57 = vpop.eup %3546  ;;  %v2312_v21 = vmul.f32 %v3545_v26, %v2264_v52  ;;  %v2343_v52 = vmul.f32 %v3541_v49, %v2327_v22  ;;  %v2363_v31 = vmul.f32 %v2342_v59, %v5776_v53 }
 0x896   : > { %v2346_v42 = vmul.f32 %v3543_v23, %v2330_v11  ;;  %v2315_v38 = vmul.f32 %v3547_v57, %v2273_v40  ;;  %2521 = vmatprep.mubr.f32.mxu1 %v2370_v51  ;;  %v2288_v45 = vpop.xlane.xlu0 %2287  ;;  %2497 = vmatmul.mubr.f32.gmra.mrb[6].mxu0 %v2359_v15  ;;  %v2364_v40 = vmul.f32 %v2342_v59, %v5779_v19 }
 0x897   : > { %3556 = vrcp.f32 %v2288_v45  ;;  %2522 = vmatmul.mubr.f32.vlgmr.msra.gmra.mrb[0].mxu1 %v2369_v62  ;;  %2501 = vmatprep.mubr.f32.mxu0 %v2362_v32  ;;  %v2328_v33 = vsub.f32 2.0, %v2312_v21  ;;  %v2366_v19 = vmul.f32 %v2343_v52, %v5805_v60 }
 0x898   : > { %v3549_v25 = vpop.eup %3548  ;;  %v2331_v10 = vsub.f32 2.0, %v2315_v38  ;;  %v2372_v4 = vmul.f32 %v2346_v42, %v5797_v3  ;;  %v2371_v30 = vmul.f32 %v2346_v42, %v5792_v36 }
 0x899   : > { %v3551_v46 = vpop.eup %3550  ;;  %v2317_v56 = vmul.f32 %v3549_v25, %v2279_v24  ;;  %v2344_v49 = vmul.f32 %v3545_v26, %v2328_v33 }
 0x89a   : > { %v2347_v6 = vmul.f32 %v3547_v57, %v2331_v10  ;;  %v2316_v39 = vmul.f32 %v3551_v46, %v2276_v34  ;;  %2526 = vmatprep.mubr.f32.mxu1 %v2372_v4  ;;  %2502 = vmatmul.mubr.f32.gmra.mrb[8].mxu0 %v2361_v7 }
 0x89b   : > { %v2333_v27 = vsub.f32 2.0, %v2317_v56  ;;  %2527 = vmatmul.mubr.f32.gmra.mrb[2].mxu1 %v2371_v30  ;;  %2506 = vmatprep.mubr.f32.mxu0 %v2364_v40  ;;  %v2368_v41 = vmul.f32 %v2344_v49, %v5829_v55  ;;  %v2367_v12 = vmul.f32 %v2344_v49, %v5826_v50 }
 0x89c   : > { %v3553_v14 = vpop.eup %3552  ;;  %v2332_v63 = vsub.f32 2.0, %v2316_v39  ;;  %v2374_v3 = vmul.f32 %v2347_v6, %v5821_v8  ;;  %v2373_v36 = vmul.f32 %v2347_v6, %v5816_v0  ;;  %v2365_v8 = vmul.f32 %v2343_v52, %v5802_v43 }
 0x89d   : > { %v3555_v54 = vpop.eup %3554  ;;  %v2349_v24 = vmul.f32 %v3549_v25, %v2333_v27  ;;  %v2319_v34 = vmul.f32 %v3553_v14, %v2285_v18 }
 0x89e   : > { %v2348_v35 = vmul.f32 %v3551_v46, %v2332_v63  ;;  %v2318_v61 = vmul.f32 %v3555_v54, %v2282_v1  ;;  %2531 = vmatprep.mubr.f32.mxu1 %v2374_v3  ;;  %2507 = vmatmul.mubr.f32.gmra.mrb[10].mxu0 %v2363_v31 }
 0x89f   : > { %2532 = vmatmul.mubr.f32.gmra.mrb[4].mxu1 %v2373_v36  ;;  %2511 = vmatprep.mubr.f32.mxu0 %v2366_v19  ;;  %v2335_v13 = vsub.f32 2.0, %v2319_v34  ;;  %v2378_v18 = vmul.f32 %v2349_v24, %v5851_v37 }
 0x8a0   : > { %v2334_v23 = vsub.f32 2.0, %v2318_v61  ;;  %v2376_v17 = vmul.f32 %v2348_v35, %v5843_v28  ;;  %v2375_v53 = vmul.f32 %v2348_v35, %v5839_v48  ;;  %v2377_v28 = vmul.f32 %v2349_v24, %v5848_v9 }
 0x8a1   : > { %v3557_v0 = vpop.eup %3556  ;;  %v2351_v43 = vmul.f32 %v3553_v14, %v2335_v13 }
 0x8a2   : > { %v2350_v16 = vmul.f32 %v3555_v54, %v2334_v23  ;;  %v2320_v60 = vmul.f32 %v3557_v0, %v2288_v45  ;;  %2536 = vmatprep.mubr.f32.mxu1 %v2376_v17  ;;  %2512 = vmatmul.mubr.f32.gmra.mrb[12].mxu0 %v2365_v8 }
 0x8a3   : > { %2537 = vmatmul.mubr.f32.gmra.mrb[6].mxu1 %v2375_v53  ;;  %2516 = vmatprep.mubr.f32.mxu0 %v2368_v41  ;;  %v2382_v26 = vmul.f32 %v2351_v43, %v5871_v47  ;;  %v2381_v37 = vmul.f32 %v2351_v43, %v5869_v29  ;;  %v2595_v41 = vstv %s2594_s18  ;;  %s3586_s18 = sshll.u32 %s3953_s15, 4  ;;  %s3587_s18 = int_to_ptr.vmem [resolvable:$false] %s3586_s18 }
 0x8a4   : > { %2541 = vmatprep.mubr.f32.mxu1 %v2378_v18  ;;  %v2336_v1 = vsub.f32 2.0, %v2320_v60  ;;  %v2380_v48 = vmul.f32 %v2350_v16, %v5865_v20  ;;  %v2379_v55 = vmul.f32 %v2350_v16, %v5861_v5  ;;  %v6353_v60 = vld [vmem:[#allocation18_spill] sm:$0xff]  ;;  %s3588_s21 = scalar_lea.vmem %s3587_s18, 128  ;;  %p3589_p4 = scmp.lt.s32.totalorder %s5925_s13, %s3587_s18 }
 0x8a5   : > { %p3590_p5 = scmp.lt.s32.totalorder %s3588_s21, %s3582_s7 }
 0x8a6   : > { %2517 = vmatmul.mubr.f32.gmra.mrb[14].mxu0 %v2367_v12  ;;  %v2352_v58 = vmul.f32 %v3557_v0, %v2336_v1 }
 0x8a7   : > { %2542 = vmatmul.mubr.f32.gmra.mrb[8].mxu1 %v2377_v28  ;;  %p3591_p6 = por %p3590_p5, %p3589_p4 }
 0x8a8   : > { %2546 = vmatprep.mubr.f32.mxu1 %v2380_v48  ;;  %v2384_v50 = vmul.f32 %v2352_v58, %v5879_v2  ;;  %v2383_v9 = vmul.f32 %v2352_v58, %v5877_v44 }
 0x8a9   : > { %p3592_p7 = pnand %p3591_p6, %p3585_p2 }
 0x8ab   : > { %2547 = vmatmul.mubr.f32.gmra.mrb[10].mxu1 %v2379_v55 }
 0x8ac   : > { %2551 = vmatprep.mubr.f32.mxu1 %v2382_v26 }
 0x8af   : > { %2552 = vmatmul.mubr.f32.gmra.mrb[12].mxu1 %v2381_v37 }
 0x8b0   : > { %2556 = vmatprep.mubr.f32.mxu1 %v2384_v50 }
 0x8b3   : > { %2557 = vmatmul.mubr.f32.gmra.mrb[14].mxu1 %v2383_v9 }
 0x95d   : > { %v2975_v11 = vpop.f32.mrb[0].mxu0 }
 0x95e   : > { %v2976_v20 = vpop.f32.mrb[1].mxu0 }
 0x95f   : > { %v2977_v51 = vadd.f32 %v2976_v20, %v2975_v11 }
 0x961   : > { %v2978_v15 = vpop.f32.mrb[2].mxu0  ;;  %2562 = vxpose.xlu1.b32.start [1/16] (narrow) %v2977_v51, 8 }
 0x962   : > { %v2979_v5 = vpop.f32.mrb[3].mxu0 }
 0x963   : > { %v2980_v62 = vadd.f32 %v2979_v5, %v2978_v15 }
 0x965   : > { %2563 = vxpose.xlu1.b32.cont [2/16] (narrow) %v2980_v62, 8  ;;  %v2981_v47 = vpop.f32.mrb[4].mxu0 }
 0x966   : > { %v2982_v57 = vpop.f32.mrb[5].mxu0 }
 0x967   : > { %v2983_v59 = vadd.f32 %v2982_v57, %v2981_v47 }
 0x969   : > { %2564 = vxpose.xlu1.b32.cont [3/16] (narrow) %v2983_v59, 8  ;;  %v2984_v29 = vpop.f32.mrb[6].mxu0 }
 0x96a   : > { %v2999_v22 = vpop.f32.mrb[0].mxu1  ;;  %v2985_v2 = vpop.f32.mrb[7].mxu0 }
 0x96b   : > { %v2986_v21 = vadd.f32 %v2985_v2, %v2984_v29  ;;  %v3000_v32 = vpop.f32.mrb[1].mxu1 }
 0x96c   : > { %v3001_v42 = vadd.f32 %v3000_v32, %v2999_v22 }
 0x96d   : > { %v2987_v44 = vpop.f32.mrb[8].mxu0  ;;  %2565 = vxpose.xlu1.b32.cont [4/16] (narrow) %v2986_v21, 8 }
 0x96e   : > { %v3002_v38 = vpop.f32.mrb[2].mxu1  ;;  %v2988_v45 = vpop.f32.mrb[9].mxu0 }
 0x96f   : > { %v2989_v25 = vadd.f32 %v2988_v45, %v2987_v44  ;;  %v3003_v10 = vpop.f32.mrb[3].mxu1 }
 0x970   : > { %v3004_v4 = vadd.f32 %v3003_v10, %v3002_v38 }
 0x971   : > { %v2990_v7 = vpop.f32.mrb[10].mxu0  ;;  %2566 = vxpose.xlu1.b32.cont [5/16] (narrow) %v2989_v25, 8 }
 0x972   : > { %v3005_v30 = vpop.f32.mrb[4].mxu1  ;;  %v2991_v46 = vpop.f32.mrb[11].mxu0 }
 0x973   : > { %v2992_v52 = vadd.f32 %v2991_v46, %v2990_v7  ;;  %v3006_v33 = vpop.f32.mrb[5].mxu1 }
 0x974   : > { %v3007_v56 = vadd.f32 %v3006_v33, %v3005_v30 }
 0x975   : > { %v2993_v40 = vpop.f32.mrb[12].mxu0  ;;  %2567 = vxpose.xlu1.b32.cont [6/16] (narrow) %v2992_v52, 8 }
 0x976   : > { %v3008_v6 = vpop.f32.mrb[6].mxu1  ;;  %v2994_v39 = vpop.f32.mrb[13].mxu0 }
 0x977   : > { %v2995_v27 = vadd.f32 %v2994_v39, %v2993_v40  ;;  %v3009_v14 = vpop.f32.mrb[7].mxu1 }
 0x978   : > { %v3010_v63 = vadd.f32 %v3009_v14, %v3008_v6 }
 0x979   : > { %v2996_v3 = vpop.f32.mrb[14].mxu0  ;;  %2568 = vxpose.xlu1.b32.cont [7/16] (narrow) %v2995_v27, 8 }
 0x97a   : > { %v3011_v31 = vpop.f32.mrb[8].mxu1  ;;  %v2997_v36 = vpop.f32.mrb[15].mxu0 }
 0x97b   : > { %v2998_v54 = vadd.f32 %v2997_v36, %v2996_v3  ;;  %v3012_v49 = vpop.f32.mrb[9].mxu1 }
 0x97c   : > { %v3013_v24 = vadd.f32 %v3012_v49, %v3011_v31 }
 0x97d   : > { %2569 = vxpose.xlu1.b32.cont [8/16] (narrow) %v2998_v54, 8 }
 0x97e   : > { %v3014_v19 = vpop.f32.mrb[10].mxu1 }
 0x97f   : > { %v3015_v35 = vpop.f32.mrb[11].mxu1 }
 0x980   : > { %v3016_v34 = vadd.f32 %v3015_v35, %v3014_v19 }
 0x981   : > { %2570 = vxpose.xlu1.b32.cont [9/16] (narrow) %v3001_v42, 8 }
 0x982   : > { %v3017_v61 = vpop.f32.mrb[12].mxu1 }
 0x983   : > { %v3018_v23 = vpop.f32.mrb[13].mxu1 }
 0x984   : > { %v3019_v17 = vadd.f32 %v3018_v23, %v3017_v61 }
 0x985   : > { %2571 = vxpose.xlu1.b32.cont [10/16] (narrow) %v3004_v4, 8 }
 0x986   : > { %v3020_v8 = vpop.f32.mrb[14].mxu1 }
 0x987   : > { %v3021_v53 = vpop.f32.mrb[15].mxu1 }
 0x988   : > { %v3022_v0 = vadd.f32 %v3021_v53, %v3020_v8 }
 0x989   : > { %2572 = vxpose.xlu1.b32.cont [11/16] (narrow) %v3007_v56, 8 }
 0x98d   : > { %2573 = vxpose.xlu1.b32.cont [12/16] (narrow) %v3010_v63, 8 }
 0x991   : > { %2574 = vxpose.xlu1.b32.cont [13/16] (narrow) %v3013_v24, 8 }
 0x995   : > { %2575 = vxpose.xlu1.b32.cont [14/16] (narrow) %v3016_v34, 8 }
 0x999   : > { %2576 = vxpose.xlu1.b32.cont [15/16] (narrow) %v3019_v17, 8 }
 0x99d   : > { %2577 = vxpose.xlu1.b32.end [16/16] (narrow) %v3022_v0, 8 }
 0x9e1   : > { %v2578_v13 = vpop.trf.xlu1 }
 0x9e2   : > { %v2596_v16 = vmul.f32 %v2595_v41, %v2578_v13 }
 0x9e4   : > { %v2597_v18 = vadd.f32 %v2596_v16, %v6353_v60 }
 0x9e6   : > { %2598 = vst [vmem:[%s6354_s27] sm:$0xf] %v2597_v18 }
 0x9e7   : > { %3595 = shalt.err (!%p3592_p7)
}
 0x9e8   : > { %s3596_s26 = scalar_lea.hbm %s5923_s25, 64  ;;  %s3600_s28 = scalar_lea.hbm %s5988_s8, 256 }
 0x9e9   : > { %p3597_p9 = scmp.ne.s32.totalorder %s5923_s25, %s3596_s26  ;;  %p3601_p12 = scmp.lt.u32.totalorder %s5923_s25, %s5988_s8 }
 0x9ea   : > { %p3602_p13 = scmp.lt.u32.totalorder %s3600_s28, %s3596_s26  ;;  %p3604_p1 = scmp.lt.u32.totalorder %s3596_s26, %s5923_s25 }
 0x9eb   : > { %p3598_p10 = pnand %p3597_p9, %p4053_p3 }
 0x9ec   : > { %p3603_p0 = por %p3602_p13, %p3601_p12 }
 0x9ed   : > { %p3599_p11 = pneg %p3598_p10 }
 0x9ee   : > { %p3605_p2 = por %p3604_p1, %p3603_p0 }
 0x9f0   : > { %p3606_p4 = pnand %p3605_p2, %p3599_p11 }
 0x9f2   : > { %3609 = shalt.err (!%p3606_p4)
}
 0x9f3   : > { %3110 = dma.vmem_to_hbm [thread:$0]  (%p4053_p3), %s5925_s13, 64, %s5923_s25, %s2600_s11  }
 0x9f4 PF: > { %p3116_p5 = scmp.ge.s32.totalorder %s3810_s14, 2  ;;  %s2627_s27 = sand.u32 1, %s3782_s29  }
 0x9f5   : > { %s2628_s10 = scalar_lea.sflag [#allocation8], %s2627_s27 }
 0x9f6   : > { %p3113_p6 = pnand %p3116_p5, %p4062_p8 }
 0x9f8   : > { %3777 = dma.done.wait (!%p3113_p6), %s2628_s10, 64  }
 0x9f9   : > { %3779 = vsyncadd (!%p3113_p6), %s2628_s10, 4294967232  ;;  %s22_s14 = sadd.s32 1, %s3810_s14   ;;  %s6356_s11 = sld [smem:[#allocation15_spill]] }
 0x9fa   : > { %p19_p7 = scmp.ge.s32.totalorder %s22_s14, 6   ;;  %s6357_s19 = sld [smem:[#allocation16_spill]] }
 0x9fb   : > { %s6358_s13 = sld [smem:[#allocation17_spill]]  ;;  %s6359_s29 = smov %s3786_s30 }
 0x9fc   : > { %s6360_s30 = smov %s3790_s9  ;;  %s6361_s9 = smov %s4071_s24 }
 0x9fd   : > { %s6362_s10 = smov %s3802_s12  ;;  %21 = sbr.rel (!%p19_p7) target bundleno = 7 (0x7), region = 108 }
 0xa00   : > { %s6363_s12 = smov %s6357_s19 }
 0xa04   :  { %2633 = vsyncpa [#allocation8], 1 }
 0xa05   :  { %2635 = vsyncpa [#allocation8 + $0x1], 1 }
 0xa06   :  { %2636 = vsyncmov [#allocation5] }
 0xa09   :  { %s2637_s20 = vpop.sfrf %2636 }
 0xa0a   :  { %p2859_p3 = scmp.ne.s32.totalorder %s2637_s20, 0 }
 0xa0c   :  { %2641 = shalt.err (%p2859_p3)  }

</bundles_post_ra>
